<compile_context>
chip_gen: v7x
topology: tpu7x:2x2x1
jax: 0.10.0
libtpu: 0.0.40
codegen_flags: <defaults>
</compile_context>

<pallas_src>
import jax
import jax.numpy as jnp
from jax import lax
from jax.experimental import pallas as pl
from jax.experimental.pallas import tpu as pltpu

# ---------------- synthetic config (small) ----------------
IMAGE = 16          # image size
PATCH = 4           # patch size
CHANNELS = 4        # input channels
EMBED = 32          # embed_depth
LAYERS = 2          # transformer layers
HEADS = 4
DIM_HEAD = 8
MLP_DIM = 64
NUM_CLASSES = 10
POOL = "cls"

NUM_PATCHES = (IMAGE // PATCH) ** 2            # 16
SEQ = NUM_PATCHES + 1                          # 17
SEQ_PAD = ((SEQ + 7) // 8) * 8                 # 24 (sublane-aligned)
PATCH_DIM = CHANNELS * PATCH * PATCH           # 64
INNER = HEADS * DIM_HEAD                       # 32
EPS = 1e-5
SQRT_2_OVER_PI = 0.7978845608028654
NEG_BIG = -1e30
MXU_DTYPE = jnp.bfloat16                       # MXU operand dtype (f32 accumulate)


# ---------------- in-kernel helpers ----------------
def _layernorm(v, g, b):
    mu = jnp.mean(v, axis=-1, keepdims=True)
    var = jnp.mean(jnp.square(v - mu), axis=-1, keepdims=True)
    return (v - mu) * lax.rsqrt(var + EPS) * g + b


def _gelu(x):
    # tanh-approximate GELU (EUP tanh). Tiny deviation from exact erf GELU.
    return 0.5 * x * (1.0 + jnp.tanh(SQRT_2_OVER_PI * (x + 0.044715 * x * x * x)))


def _bdot(lhs, rhs):
    # (H, S, K) @ (H, K, N) -> (H, S, N), f32 accumulate on the MXU
    return lax.dot_general(lhs, rhs, (((2,), (1,)), ((0,), (0,))),
                           preferred_element_type=jnp.float32)


def _bdot_t(lhs, rhs):
    # 'hqd,hkd->hqk'
    return lax.dot_general(lhs, rhs, (((2,), (2,)), ((0,), (0,))),
                           preferred_element_type=jnp.float32)


# ---------------- fused Pallas kernel ----------------
def _eevit_kernel(patches_ref, pw_ref, pb_ref, cls_ref, pos_ref,
                  ln1g_ref, ln1b_ref, wq_ref, wk_ref, wv_ref, wo_ref, bo_ref,
                  ln2g_ref, ln2b_ref, w1_ref, b1_ref, w2_ref, b2_ref,
                  hw_ref, hb_ref, o_ref, xbuf_ref):
    # ---- patch embedding (conv k=s=PATCH as matmul) + cls/pos, padded tokens
    proj = jnp.dot(patches_ref[...].astype(MXU_DTYPE), pw_ref[...],
                   preferred_element_type=jnp.float32) + pb_ref[...]
    xbuf_ref[...] = jnp.zeros((SEQ_PAD, EMBED), jnp.float32)
    xbuf_ref[0:1, :] = cls_ref[...] + pos_ref[0:1, :]
    xbuf_ref[1:SEQ, :] = proj + pos_ref[1:SEQ, :]
    x = xbuf_ref[...]                                      # (SEQ_PAD, EMBED) f32

    # additive bias masking padded key columns out of every attention softmax
    key_ids = lax.broadcasted_iota(jnp.int32, (1, SEQ_PAD), 1)
    key_bias = jnp.where(key_ids >= SEQ, NEG_BIG, 0.0)     # (1, SEQ_PAD) f32

    scale = DIM_HEAD ** -0.5
    for l in range(LAYERS):                                # static unroll
        # -------- multi-head attention (head-batched matmuls) --------
        h = _layernorm(x, ln1g_ref[l], ln1b_ref[l])
        hb = jnp.broadcast_to(h.astype(MXU_DTYPE)[None],
                              (HEADS, SEQ_PAD, EMBED))
        q = _bdot(hb, wq_ref[l])                           # (H, S, D) f32
        k = _bdot(hb, wk_ref[l])
        v = _bdot(hb, wv_ref[l])
        scores = _bdot_t(q.astype(MXU_DTYPE), k.astype(MXU_DTYPE)) * scale
        scores = scores + key_bias                         # mask padded keys
        scores = scores - jnp.max(scores, axis=-1, keepdims=True)
        e = jnp.exp(scores)
        attn = e * pl.reciprocal(jnp.sum(e, axis=-1, keepdims=True), approx=True)
        out_h = _bdot(attn.astype(MXU_DTYPE), v.astype(MXU_DTYPE))   # (H, S, D)
        proj_h = _bdot(out_h.astype(MXU_DTYPE), wo_ref[l])           # (H, S, E)
        x = x + jnp.sum(proj_h, axis=0) + bo_ref[l]        # attention residual

        # -------- MLP --------
        h2 = _layernorm(x, ln2g_ref[l], ln2b_ref[l])
        m = jnp.dot(h2.astype(MXU_DTYPE), w1_ref[l],
                    preferred_element_type=jnp.float32) + b1_ref[l]
        m = _gelu(m)
        m = jnp.dot(m.astype(MXU_DTYPE), w2_ref[l],
                    preferred_element_type=jnp.float32) + b2_ref[l]
        x = x + m                                          # MLP residual

    # ---- fused classifier head (pool -> linear -> softmax) ----
    if POOL == "mean":
        row_ids = lax.broadcasted_iota(jnp.int32, (SEQ_PAD, 1), 0)
        valid = (row_ids < SEQ).astype(jnp.float32)
        pooled = jnp.sum(x * valid, axis=0, keepdims=True) * (1.0 / SEQ)
    else:
        pooled = x[0:1, :]                                 # cls token
    logits = jnp.dot(pooled.astype(MXU_DTYPE), hw_ref[...],
                     preferred_element_type=jnp.float32) + hb_ref[...]
    e = jnp.exp(logits - jnp.max(logits, axis=-1, keepdims=True))
    o_ref[...] = e * pl.reciprocal(jnp.sum(e, axis=-1, keepdims=True), approx=True)


# ---------------- glue ----------------
def _vmem_spec():
    return pl.BlockSpec(memory_space=pltpu.MemorySpace.VMEM)


def _patchify(image):
    # (1, C, H, W) NCHW -> (NUM_PATCHES, C*PATCH*PATCH), matching Conv2d weight
    # flattened as (C, ph, pw).
    x = image[0]
    x = x.reshape(CHANNELS, IMAGE // PATCH, PATCH, IMAGE // PATCH, PATCH)
    x = x.transpose(1, 3, 0, 2, 4)
    return x.reshape(NUM_PATCHES, PATCH_DIM)


_KP_ORDER = ("patch_w", "patch_b", "cls", "pos", "ln1_g", "ln1_b", "wq", "wk",
             "wv", "wo", "bo", "ln2_g", "ln2_b", "w1", "b1", "w2", "b2",
             "head_w", "head_b")


def prepare_params(params):
    """Stack per-layer weights, expose per-head QKV/O layouts, cast MXU weights
    to bf16 (biases / LN params stay f32)."""
    blocks = params["blocks"]
    stack = lambda k: jnp.stack([b[k] for b in blocks])
    wqkv = stack("wqkv").reshape(LAYERS, EMBED, 3, HEADS, DIM_HEAD)
    wqkv = jnp.transpose(wqkv, (2, 0, 3, 1, 4))            # (3, L, H, E, D)
    return {
        "patch_w": params["patch_w"].astype(MXU_DTYPE),
        "patch_b": params["patch_b"],
        "cls": params["cls"],
        "pos": params["pos"],
        "ln1_g": stack("ln1_g"), "ln1_b": stack("ln1_b"),
        "wq": wqkv[0].astype(MXU_DTYPE),
        "wk": wqkv[1].astype(MXU_DTYPE),
        "wv": wqkv[2].astype(MXU_DTYPE),
        "wo": stack("wo").reshape(LAYERS, HEADS, DIM_HEAD, EMBED).astype(MXU_DTYPE),
        "bo": stack("bo"),
        "ln2_g": stack("ln2_g"), "ln2_b": stack("ln2_b"),
        "w1": stack("w1").astype(MXU_DTYPE), "b1": stack("b1"),
        "w2": stack("w2").astype(MXU_DTYPE), "b2": stack("b2"),
        "head_w": params["head_w"].astype(MXU_DTYPE),
        "head_b": params["head_b"],
    }


def eevit_forward(image, kp):
    patches = _patchify(image)
    inputs = (patches,) + tuple(kp[k] for k in _KP_ORDER)
    probs = pl.pallas_call(
        _eevit_kernel,
        out_shape=jax.ShapeDtypeStruct((1, NUM_CLASSES), jnp.float32),
        in_specs=[_vmem_spec() for _ in inputs],
        out_specs=_vmem_spec(),
        scratch_shapes=[pltpu.VMEM((SEQ_PAD, EMBED), jnp.float32)],
    )(*inputs)

    # TODO(synk): early-exit highway classifiers of TransformerEnconder are not
    # configured in this synthetic setup, so intermediate predictions stay zeros
    # and the fast-pass flag never fires; the reference's cond path is kept.
    intermediate_predictions = jnp.zeros((1, NUM_CLASSES + 1), jnp.float32)
    fp = jnp.zeros((1, SEQ, 1), jnp.float32)               # get_fast_pass(x_fp)

    def fast_pass(_):
        return intermediate_predictions

    def last_classifier_fw(_):
        return jnp.concatenate([probs, jnp.full((1, 1), -1.0, jnp.float32)],
                               axis=1)

    return lax.cond(jnp.any(fp != 0.0), fast_pass, last_classifier_fw, None)


# ---------------- deterministic param init (original layout, f32) ----------------
def init_params(key):
    keys = iter(jax.random.split(key, 8 + 12 * LAYERS))

    def nrm(shape, scale=0.02):
        return (scale * jax.random.normal(next(keys), shape)).astype(jnp.float32)

    params = {
        "patch_w": nrm((PATCH_DIM, EMBED)),
        "patch_b": jnp.zeros((1, EMBED), jnp.float32),
        "cls": nrm((1, EMBED)),
        "pos": nrm((SEQ, EMBED)),
        "head_w": nrm((EMBED, NUM_CLASSES)),
        "head_b": jnp.zeros((1, NUM_CLASSES), jnp.float32),
        "blocks": [],
    }
    for _ in range(LAYERS):
        params["blocks"].append({
            "ln1_g": jnp.ones((1, EMBED), jnp.float32),
            "ln1_b": jnp.zeros((1, EMBED), jnp.float32),
            "wqkv": nrm((EMBED, 3 * INNER)),   # no bias (vit-style to_qkv)
            "wo": nrm((INNER, EMBED)),
            "bo": jnp.zeros((1, EMBED), jnp.float32),
            "ln2_g": jnp.ones((1, EMBED), jnp.float32),
            "ln2_b": jnp.zeros((1, EMBED), jnp.float32),
            "w1": nrm((EMBED, MLP_DIM)),
            "b1": jnp.zeros((1, MLP_DIM), jnp.float32),
            "w2": nrm((MLP_DIM, EMBED)),
            "b2": jnp.zeros((1, EMBED), jnp.float32),
        })
    return params


if __name__ == "__main__":
    key = jax.random.PRNGKey(0)
    pkey, ikey = jax.random.split(key)
    params = init_params(pkey)
    kernel_params = prepare_params(params)   # stack / relayout / bf16-cast once
    image = jax.random.normal(ikey, (1, CHANNELS, IMAGE, IMAGE), jnp.float32)

    out = jax.jit(eevit_forward)(image, kernel_params)
    jax.block_until_ready(out)

    assert out.shape == (1, NUM_CLASSES + 1), out.shape
    assert bool(jnp.isfinite(out).all())
    print("KERNEL_OK")
</pallas_src>

<mosaic_0001>
module attributes {stable_mosaic.version = 11 : i64} {
  func.func @_eevit_kernel(%arg0: memref<16x64xf32, #tpu.memory_space<vmem>>, %arg1: memref<64x32xbf16, #tpu.memory_space<vmem>>, %arg2: memref<1x32xf32, #tpu.memory_space<vmem>>, %arg3: memref<1x32xf32, #tpu.memory_space<vmem>>, %arg4: memref<17x32xf32, #tpu.memory_space<vmem>>, %arg5: memref<2x1x32xf32, #tpu.memory_space<vmem>>, %arg6: memref<2x1x32xf32, #tpu.memory_space<vmem>>, %arg7: memref<2x4x32x8xbf16, #tpu.memory_space<vmem>>, %arg8: memref<2x4x32x8xbf16, #tpu.memory_space<vmem>>, %arg9: memref<2x4x32x8xbf16, #tpu.memory_space<vmem>>, %arg10: memref<2x4x8x32xbf16, #tpu.memory_space<vmem>>, %arg11: memref<2x1x32xf32, #tpu.memory_space<vmem>>, %arg12: memref<2x1x32xf32, #tpu.memory_space<vmem>>, %arg13: memref<2x1x32xf32, #tpu.memory_space<vmem>>, %arg14: memref<2x32x64xbf16, #tpu.memory_space<vmem>>, %arg15: memref<2x1x64xf32, #tpu.memory_space<vmem>>, %arg16: memref<2x64x32xbf16, #tpu.memory_space<vmem>>, %arg17: memref<2x1x32xf32, #tpu.memory_space<vmem>>, %arg18: memref<32x10xbf16, #tpu.memory_space<vmem>>, %arg19: memref<1x10xf32, #tpu.memory_space<vmem>>, %arg20: memref<1x10xf32, #tpu.memory_space<vmem>>, %arg21: memref<24x32xf32, #tpu.memory_space<vmem>>) attributes {dimension_semantics = [], scalar_prefetch = 0 : i64, scratch_operands = 1 : i64, tpu.core_type = #tpu.core_type<tc>} {
    %c0 = arith.constant 0 : index
    %c0_0 = arith.constant 0 : index
    %0 = vector.load %arg0[%c0, %c0_0] : memref<16x64xf32, #tpu.memory_space<vmem>>, vector<16x64xf32>
    %1 = arith.truncf %0 : vector<16x64xf32> to vector<16x64xbf16>
    %c0_1 = arith.constant 0 : index
    %c0_2 = arith.constant 0 : index
    %2 = vector.load %arg1[%c0_1, %c0_2] : memref<64x32xbf16, #tpu.memory_space<vmem>>, vector<64x32xbf16>
    %cst = arith.constant dense<0.000000e+00> : vector<16x32xf32>
    %3 = tpu.matmul %1, %2, %cst {dimension_numbers = #tpu.dot_dimension_numbers<[1], [0], [0], [1], [0, 0, 1, 1], [], []>} : vector<16x64xbf16>, vector<64x32xbf16>, vector<16x32xf32> -> vector<16x32xf32>
    %c0_3 = arith.constant 0 : index
    %c0_4 = arith.constant 0 : index
    %4 = vector.load %arg2[%c0_3, %c0_4] : memref<1x32xf32, #tpu.memory_space<vmem>>, vector<1x32xf32>
    %5 = vector.broadcast %4 : vector<1x32xf32> to vector<16x32xf32>
    %6 = arith.addf %3, %5 : vector<16x32xf32>
    %cst_5 = arith.constant 0.000000e+00 : f32
    %7 = vector.broadcast %cst_5 : f32 to vector<24x32xf32>
    %c0_6 = arith.constant 0 : index
    %c0_7 = arith.constant 0 : index
    %8 = vector.load %arg21[%c0_6, %c0_7] : memref<24x32xf32, #tpu.memory_space<vmem>>, vector<24x32xf32>
    tpu.vector_store %arg21[%c0_6, %c0_7], %7 {strides = array<i32>} : memref<24x32xf32, #tpu.memory_space<vmem>>, vector<24x32xf32>,
    %c0_8 = arith.constant 0 : index
    %c0_9 = arith.constant 0 : index
    %9 = vector.load %arg3[%c0_8, %c0_9] : memref<1x32xf32, #tpu.memory_space<vmem>>, vector<1x32xf32>
    %c0_10 = arith.constant 0 : index
    %c0_11 = arith.constant 0 : index
    %10 = vector.load %arg4[%c0_10, %c0_11] : memref<17x32xf32, #tpu.memory_space<vmem>>, vector<1x32xf32>
    %11 = arith.addf %9, %10 : vector<1x32xf32>
    %c0_12 = arith.constant 0 : index
    %c0_13 = arith.constant 0 : index
    %12 = vector.load %arg21[%c0_12, %c0_13] : memref<24x32xf32, #tpu.memory_space<vmem>>, vector<1x32xf32>
    tpu.vector_store %arg21[%c0_12, %c0_13], %11 {strides = array<i32>} : memref<24x32xf32, #tpu.memory_space<vmem>>, vector<1x32xf32>,
    %c1 = arith.constant 1 : index
    %c0_14 = arith.constant 0 : index
    %13 = vector.load %arg4[%c1, %c0_14] : memref<17x32xf32, #tpu.memory_space<vmem>>, vector<16x32xf32>
    %14 = arith.addf %6, %13 : vector<16x32xf32>
    %c1_15 = arith.constant 1 : index
    %c0_16 = arith.constant 0 : index
    %15 = vector.load %arg21[%c1_15, %c0_16] : memref<24x32xf32, #tpu.memory_space<vmem>>, vector<16x32xf32>
    tpu.vector_store %arg21[%c1_15, %c0_16], %14 {strides = array<i32>} : memref<24x32xf32, #tpu.memory_space<vmem>>, vector<16x32xf32>,
    %c0_17 = arith.constant 0 : index
    %c0_18 = arith.constant 0 : index
    %16 = vector.load %arg21[%c0_17, %c0_18] : memref<24x32xf32, #tpu.memory_space<vmem>>, vector<24x32xf32>
    %17 = tpu.iota {dimensions = array<i32: 1>} : vector<1x24xi32>
    %c17_i32 = arith.constant 17 : i32
    %18 = vector.broadcast %c17_i32 : i32 to vector<1x24xi32>
    %19 = arith.cmpi sge, %17, %18 : vector<1x24xi32>
    %cst_19 = arith.constant -1.000000e+30 : f32
    %cst_20 = arith.constant 0.000000e+00 : f32
    %20 = vector.broadcast %cst_19 : f32 to vector<1x24xf32>
    %21 = vector.broadcast %cst_20 : f32 to vector<1x24xf32>
    %22 = arith.select %19, %20, %21 : vector<1x24xi1>, vector<1x24xf32>
    %c0_21 = arith.constant 0 : index
    %c0_22 = arith.constant 0 : index
    %c0_23 = arith.constant 0 : index
    %23 = vector.load %arg5[%c0_21, %c0_22, %c0_23] : memref<2x1x32xf32, #tpu.memory_space<vmem>>, vector<1x1x32xf32>
    %24 = vector.shape_cast %23 : vector<1x1x32xf32> to vector<1x32xf32>
    %c0_24 = arith.constant 0 : index
    %c0_25 = arith.constant 0 : index
    %c0_26 = arith.constant 0 : index
    %25 = vector.load %arg6[%c0_24, %c0_25, %c0_26] : memref<2x1x32xf32, #tpu.memory_space<vmem>>, vector<1x1x32xf32>
    %26 = vector.shape_cast %25 : vector<1x1x32xf32> to vector<1x32xf32>
    %cst_27 = arith.constant dense<0.000000e+00> : vector<24xf32>
    %27 = vector.multi_reduction <add>, %16, %cst_27 [1] : vector<24x32xf32> to vector<24xf32>
    %28 = vector.shape_cast %27 : vector<24xf32> to vector<24x1xf32>
    %cst_28 = arith.constant 3.200000e+01 : f32
    %29 = vector.broadcast %cst_28 : f32 to vector<24x1xf32>
    %30 = arith.divf %28, %29 : vector<24x1xf32>
    %31 = vector.broadcast %30 : vector<24x1xf32> to vector<24x32xf32>
    %32 = arith.subf %16, %31 : vector<24x32xf32>
    %33 = arith.mulf %32, %32 : vector<24x32xf32>
    %cst_29 = arith.constant dense<0.000000e+00> : vector<24xf32>
    %34 = vector.multi_reduction <add>, %33, %cst_29 [1] : vector<24x32xf32> to vector<24xf32>
    %35 = vector.shape_cast %34 : vector<24xf32> to vector<24x1xf32>
    %cst_30 = arith.constant 3.200000e+01 : f32
    %36 = vector.broadcast %cst_30 : f32 to vector<24x1xf32>
    %37 = arith.divf %35, %36 : vector<24x1xf32>
    %38 = vector.broadcast %30 : vector<24x1xf32> to vector<24x32xf32>
    %39 = arith.subf %16, %38 : vector<24x32xf32>
    %cst_31 = arith.constant 9.99999974E-6 : f32
    %40 = vector.broadcast %cst_31 : f32 to vector<24x1xf32>
    %41 = arith.addf %37, %40 : vector<24x1xf32>
    %42 = math.rsqrt %41 : vector<24x1xf32>
    %43 = vector.broadcast %42 : vector<24x1xf32> to vector<24x32xf32>
    %44 = arith.mulf %39, %43 : vector<24x32xf32>
    %45 = vector.broadcast %24 : vector<1x32xf32> to vector<24x32xf32>
    %46 = arith.mulf %44, %45 : vector<24x32xf32>
    %47 = vector.broadcast %26 : vector<1x32xf32> to vector<24x32xf32>
    %48 = arith.addf %46, %47 : vector<24x32xf32>
    %49 = arith.truncf %48 : vector<24x32xf32> to vector<24x32xbf16>
    %50 = vector.shape_cast %49 : vector<24x32xbf16> to vector<1x24x32xbf16>
    %51 = vector.shape_cast %50 : vector<1x24x32xbf16> to vector<1x24x32xbf16>
    %52 = vector.broadcast %51 : vector<1x24x32xbf16> to vector<4x24x32xbf16>
    %c0_32 = arith.constant 0 : index
    %c0_33 = arith.constant 0 : index
    %c0_34 = arith.constant 0 : index
    %c0_35 = arith.constant 0 : index
    %53 = vector.load %arg7[%c0_32, %c0_33, %c0_34, %c0_35] : memref<2x4x32x8xbf16, #tpu.memory_space<vmem>>, vector<1x4x32x8xbf16>
    %54 = vector.shape_cast %53 : vector<1x4x32x8xbf16> to vector<4x32x8xbf16>
    %cst_36 = arith.constant dense<0.000000e+00> : vector<4x24x8xf32>
    %55 = tpu.matmul %52, %54, %cst_36 {dimension_numbers = #tpu.dot_dimension_numbers<[2], [1], [1], [2], [0, 0, 0, 1, 1, 2], [0], [0]>} : vector<4x24x32xbf16>, vector<4x32x8xbf16>, vector<4x24x8xf32> -> vector<4x24x8xf32>
    %c0_37 = arith.constant 0 : index
    %c0_38 = arith.constant 0 : index
    %c0_39 = arith.constant 0 : index
    %c0_40 = arith.constant 0 : index
    %56 = vector.load %arg8[%c0_37, %c0_38, %c0_39, %c0_40] : memref<2x4x32x8xbf16, #tpu.memory_space<vmem>>, vector<1x4x32x8xbf16>
    %57 = vector.shape_cast %56 : vector<1x4x32x8xbf16> to vector<4x32x8xbf16>
    %cst_41 = arith.constant dense<0.000000e+00> : vector<4x24x8xf32>
    %58 = tpu.matmul %52, %57, %cst_41 {dimension_numbers = #tpu.dot_dimension_numbers<[2], [1], [1], [2], [0, 0, 0, 1, 1, 2], [0], [0]>} : vector<4x24x32xbf16>, vector<4x32x8xbf16>, vector<4x24x8xf32> -> vector<4x24x8xf32>
    %c0_42 = arith.constant 0 : index
    %c0_43 = arith.constant 0 : index
    %c0_44 = arith.constant 0 : index
    %c0_45 = arith.constant 0 : index
    %59 = vector.load %arg9[%c0_42, %c0_43, %c0_44, %c0_45] : memref<2x4x32x8xbf16, #tpu.memory_space<vmem>>, vector<1x4x32x8xbf16>
    %60 = vector.shape_cast %59 : vector<1x4x32x8xbf16> to vector<4x32x8xbf16>
    %cst_46 = arith.constant dense<0.000000e+00> : vector<4x24x8xf32>
    %61 = tpu.matmul %52, %60, %cst_46 {dimension_numbers = #tpu.dot_dimension_numbers<[2], [1], [1], [2], [0, 0, 0, 1, 1, 2], [0], [0]>} : vector<4x24x32xbf16>, vector<4x32x8xbf16>, vector<4x24x8xf32> -> vector<4x24x8xf32>
    %62 = arith.truncf %55 : vector<4x24x8xf32> to vector<4x24x8xbf16>
    %63 = arith.truncf %58 : vector<4x24x8xf32> to vector<4x24x8xbf16>
    %cst_47 = arith.constant dense<0.000000e+00> : vector<4x24x24xf32>
    %64 = tpu.matmul %62, %63, %cst_47 {dimension_numbers = #tpu.dot_dimension_numbers<[2], [2], [1], [1], [0, 0, 0, 1, 1, 1], [0], [0]>} : vector<4x24x8xbf16>, vector<4x24x8xbf16>, vector<4x24x24xf32> -> vector<4x24x24xf32>
    %cst_48 = arith.constant 0.353553385 : f32
    %65 = vector.broadcast %cst_48 : f32 to vector<4x24x24xf32>
    %66 = arith.mulf %64, %65 : vector<4x24x24xf32>
    %67 = vector.shape_cast %22 : vector<1x24xf32> to vector<1x1x24xf32>
    %68 = vector.broadcast %67 : vector<1x1x24xf32> to vector<4x24x24xf32>
    %69 = arith.addf %66, %68 : vector<4x24x24xf32>
    %cst_49 = arith.constant dense<0xFF800000> : vector<4x24xf32>
    %70 = vector.multi_reduction <maximumf>, %69, %cst_49 [2] : vector<4x24x24xf32> to vector<4x24xf32>
    %71 = vector.shape_cast %70 : vector<4x24xf32> to vector<4x24x1xf32>
    %72 = vector.broadcast %71 : vector<4x24x1xf32> to vector<4x24x24xf32>
    %73 = arith.subf %69, %72 : vector<4x24x24xf32>
    %74 = math.exp %73 : vector<4x24x24xf32>
    %cst_50 = arith.constant dense<0.000000e+00> : vector<4x24xf32>
    %75 = vector.multi_reduction <add>, %74, %cst_50 [2] : vector<4x24x24xf32> to vector<4x24xf32>
    %76 = vector.shape_cast %75 : vector<4x24xf32> to vector<4x24x1xf32>
    %77 = tpu.reciprocal %76 {approx = true} : vector<4x24x1xf32> -> vector<4x24x1xf32>
    %78 = vector.broadcast %77 : vector<4x24x1xf32> to vector<4x24x24xf32>
    %79 = arith.mulf %74, %78 : vector<4x24x24xf32>
    %80 = arith.truncf %79 : vector<4x24x24xf32> to vector<4x24x24xbf16>
    %81 = arith.truncf %61 : vector<4x24x8xf32> to vector<4x24x8xbf16>
    %cst_51 = arith.constant dense<0.000000e+00> : vector<4x24x8xf32>
    %82 = tpu.matmul %80, %81, %cst_51 {dimension_numbers = #tpu.dot_dimension_numbers<[2], [1], [1], [2], [0, 0, 0, 1, 1, 2], [0], [0]>} : vector<4x24x24xbf16>, vector<4x24x8xbf16>, vector<4x24x8xf32> -> vector<4x24x8xf32>
    %83 = arith.truncf %82 : vector<4x24x8xf32> to vector<4x24x8xbf16>
    %c0_52 = arith.constant 0 : index
    %c0_53 = arith.constant 0 : index
    %c0_54 = arith.constant 0 : index
    %c0_55 = arith.constant 0 : index
    %84 = vector.load %arg10[%c0_52, %c0_53, %c0_54, %c0_55] : memref<2x4x8x32xbf16, #tpu.memory_space<vmem>>, vector<1x4x8x32xbf16>
    %85 = vector.shape_cast %84 : vector<1x4x8x32xbf16> to vector<4x8x32xbf16>
    %cst_56 = arith.constant dense<0.000000e+00> : vector<4x24x32xf32>
    %86 = tpu.matmul %83, %85, %cst_56 {dimension_numbers = #tpu.dot_dimension_numbers<[2], [1], [1], [2], [0, 0, 0, 1, 1, 2], [0], [0]>} : vector<4x24x8xbf16>, vector<4x8x32xbf16>, vector<4x24x32xf32> -> vector<4x24x32xf32>
    %cst_57 = arith.constant dense<0.000000e+00> : vector<24x32xf32>
    %87 = vector.multi_reduction <add>, %86, %cst_57 [0] : vector<4x24x32xf32> to vector<24x32xf32>
    %88 = arith.addf %16, %87 : vector<24x32xf32>
    %c0_58 = arith.constant 0 : index
    %c0_59 = arith.constant 0 : index
    %c0_60 = arith.constant 0 : index
    %89 = vector.load %arg11[%c0_58, %c0_59, %c0_60] : memref<2x1x32xf32, #tpu.memory_space<vmem>>, vector<1x1x32xf32>
    %90 = vector.shape_cast %89 : vector<1x1x32xf32> to vector<1x32xf32>
    %91 = vector.broadcast %90 : vector<1x32xf32> to vector<24x32xf32>
    %92 = arith.addf %88, %91 : vector<24x32xf32>
    %c0_61 = arith.constant 0 : index
    %c0_62 = arith.constant 0 : index
    %c0_63 = arith.constant 0 : index
    %93 = vector.load %arg12[%c0_61, %c0_62, %c0_63] : memref<2x1x32xf32, #tpu.memory_space<vmem>>, vector<1x1x32xf32>
    %94 = vector.shape_cast %93 : vector<1x1x32xf32> to vector<1x32xf32>
    %c0_64 = arith.constant 0 : index
    %c0_65 = arith.constant 0 : index
    %c0_66 = arith.constant 0 : index
    %95 = vector.load %arg13[%c0_64, %c0_65, %c0_66] : memref<2x1x32xf32, #tpu.memory_space<vmem>>, vector<1x1x32xf32>
    %96 = vector.shape_cast %95 : vector<1x1x32xf32> to vector<1x32xf32>
    %cst_67 = arith.constant dense<0.000000e+00> : vector<24xf32>
    %97 = vector.multi_reduction <add>, %92, %cst_67 [1] : vector<24x32xf32> to vector<24xf32>
    %98 = vector.shape_cast %97 : vector<24xf32> to vector<24x1xf32>
    %cst_68 = arith.constant 3.200000e+01 : f32
    %99 = vector.broadcast %cst_68 : f32 to vector<24x1xf32>
    %100 = arith.divf %98, %99 : vector<24x1xf32>
    %101 = vector.broadcast %100 : vector<24x1xf32> to vector<24x32xf32>
    %102 = arith.subf %92, %101 : vector<24x32xf32>
    %103 = arith.mulf %102, %102 : vector<24x32xf32>
    %cst_69 = arith.constant dense<0.000000e+00> : vector<24xf32>
    %104 = vector.multi_reduction <add>, %103, %cst_69 [1] : vector<24x32xf32> to vector<24xf32>
    %105 = vector.shape_cast %104 : vector<24xf32> to vector<24x1xf32>
    %cst_70 = arith.constant 3.200000e+01 : f32
    %106 = vector.broadcast %cst_70 : f32 to vector<24x1xf32>
    %107 = arith.divf %105, %106 : vector<24x1xf32>
    %108 = vector.broadcast %100 : vector<24x1xf32> to vector<24x32xf32>
    %109 = arith.subf %92, %108 : vector<24x32xf32>
    %cst_71 = arith.constant 9.99999974E-6 : f32
    %110 = vector.broadcast %cst_71 : f32 to vector<24x1xf32>
    %111 = arith.addf %107, %110 : vector<24x1xf32>
    %112 = math.rsqrt %111 : vector<24x1xf32>
    %113 = vector.broadcast %112 : vector<24x1xf32> to vector<24x32xf32>
    %114 = arith.mulf %109, %113 : vector<24x32xf32>
    %115 = vector.broadcast %94 : vector<1x32xf32> to vector<24x32xf32>
    %116 = arith.mulf %114, %115 : vector<24x32xf32>
    %117 = vector.broadcast %96 : vector<1x32xf32> to vector<24x32xf32>
    %118 = arith.addf %116, %117 : vector<24x32xf32>
    %119 = arith.truncf %118 : vector<24x32xf32> to vector<24x32xbf16>
    %c0_72 = arith.constant 0 : index
    %c0_73 = arith.constant 0 : index
    %c0_74 = arith.constant 0 : index
    %120 = vector.load %arg14[%c0_72, %c0_73, %c0_74] : memref<2x32x64xbf16, #tpu.memory_space<vmem>>, vector<1x32x64xbf16>
    %121 = vector.shape_cast %120 : vector<1x32x64xbf16> to vector<32x64xbf16>
    %cst_75 = arith.constant dense<0.000000e+00> : vector<24x64xf32>
    %122 = tpu.matmul %119, %121, %cst_75 {dimension_numbers = #tpu.dot_dimension_numbers<[1], [0], [0], [1], [0, 0, 1, 1], [], []>} : vector<24x32xbf16>, vector<32x64xbf16>, vector<24x64xf32> -> vector<24x64xf32>
    %c0_76 = arith.constant 0 : index
    %c0_77 = arith.constant 0 : index
    %c0_78 = arith.constant 0 : index
    %123 = vector.load %arg15[%c0_76, %c0_77, %c0_78] : memref<2x1x64xf32, #tpu.memory_space<vmem>>, vector<1x1x64xf32>
    %124 = vector.shape_cast %123 : vector<1x1x64xf32> to vector<1x64xf32>
    %125 = vector.broadcast %124 : vector<1x64xf32> to vector<24x64xf32>
    %126 = arith.addf %122, %125 : vector<24x64xf32>
    %cst_79 = arith.constant 5.000000e-01 : f32
    %127 = vector.broadcast %cst_79 : f32 to vector<24x64xf32>
    %128 = arith.mulf %127, %126 : vector<24x64xf32>
    %cst_80 = arith.constant 4.471500e-02 : f32
    %129 = vector.broadcast %cst_80 : f32 to vector<24x64xf32>
    %130 = arith.mulf %129, %126 : vector<24x64xf32>
    %131 = arith.mulf %130, %126 : vector<24x64xf32>
    %132 = arith.mulf %131, %126 : vector<24x64xf32>
    %133 = arith.addf %126, %132 : vector<24x64xf32>
    %cst_81 = arith.constant 0.797884583 : f32
    %134 = vector.broadcast %cst_81 : f32 to vector<24x64xf32>
    %135 = arith.mulf %134, %133 : vector<24x64xf32>
    %136 = math.tanh %135 : vector<24x64xf32>
    %cst_82 = arith.constant 1.000000e+00 : f32
    %137 = vector.broadcast %cst_82 : f32 to vector<24x64xf32>
    %138 = arith.addf %137, %136 : vector<24x64xf32>
    %139 = arith.mulf %128, %138 : vector<24x64xf32>
    %140 = arith.truncf %139 : vector<24x64xf32> to vector<24x64xbf16>
    %c0_83 = arith.constant 0 : index
    %c0_84 = arith.constant 0 : index
    %c0_85 = arith.constant 0 : index
    %141 = vector.load %arg16[%c0_83, %c0_84, %c0_85] : memref<2x64x32xbf16, #tpu.memory_space<vmem>>, vector<1x64x32xbf16>
    %142 = vector.shape_cast %141 : vector<1x64x32xbf16> to vector<64x32xbf16>
    %cst_86 = arith.constant dense<0.000000e+00> : vector<24x32xf32>
    %143 = tpu.matmul %140, %142, %cst_86 {dimension_numbers = #tpu.dot_dimension_numbers<[1], [0], [0], [1], [0, 0, 1, 1], [], []>} : vector<24x64xbf16>, vector<64x32xbf16>, vector<24x32xf32> -> vector<24x32xf32>
    %c0_87 = arith.constant 0 : index
    %c0_88 = arith.constant 0 : index
    %c0_89 = arith.constant 0 : index
    %144 = vector.load %arg17[%c0_87, %c0_88, %c0_89] : memref<2x1x32xf32, #tpu.memory_space<vmem>>, vector<1x1x32xf32>
    %145 = vector.shape_cast %144 : vector<1x1x32xf32> to vector<1x32xf32>
    %146 = vector.broadcast %145 : vector<1x32xf32> to vector<24x32xf32>
    %147 = arith.addf %143, %146 : vector<24x32xf32>
    %148 = arith.addf %92, %147 : vector<24x32xf32>
    %c1_90 = arith.constant 1 : index
    %c0_91 = arith.constant 0 : index
    %c0_92 = arith.constant 0 : index
    %149 = vector.load %arg5[%c1_90, %c0_91, %c0_92] : memref<2x1x32xf32, #tpu.memory_space<vmem>>, vector<1x1x32xf32>
    %150 = vector.shape_cast %149 : vector<1x1x32xf32> to vector<1x32xf32>
    %c1_93 = arith.constant 1 : index
    %c0_94 = arith.constant 0 : index
    %c0_95 = arith.constant 0 : index
    %151 = vector.load %arg6[%c1_93, %c0_94, %c0_95] : memref<2x1x32xf32, #tpu.memory_space<vmem>>, vector<1x1x32xf32>
    %152 = vector.shape_cast %151 : vector<1x1x32xf32> to vector<1x32xf32>
    %cst_96 = arith.constant dense<0.000000e+00> : vector<24xf32>
    %153 = vector.multi_reduction <add>, %148, %cst_96 [1] : vector<24x32xf32> to vector<24xf32>
    %154 = vector.shape_cast %153 : vector<24xf32> to vector<24x1xf32>
    %cst_97 = arith.constant 3.200000e+01 : f32
    %155 = vector.broadcast %cst_97 : f32 to vector<24x1xf32>
    %156 = arith.divf %154, %155 : vector<24x1xf32>
    %157 = vector.broadcast %156 : vector<24x1xf32> to vector<24x32xf32>
    %158 = arith.subf %148, %157 : vector<24x32xf32>
    %159 = arith.mulf %158, %158 : vector<24x32xf32>
    %cst_98 = arith.constant dense<0.000000e+00> : vector<24xf32>
    %160 = vector.multi_reduction <add>, %159, %cst_98 [1] : vector<24x32xf32> to vector<24xf32>
    %161 = vector.shape_cast %160 : vector<24xf32> to vector<24x1xf32>
    %cst_99 = arith.constant 3.200000e+01 : f32
    %162 = vector.broadcast %cst_99 : f32 to vector<24x1xf32>
    %163 = arith.divf %161, %162 : vector<24x1xf32>
    %164 = vector.broadcast %156 : vector<24x1xf32> to vector<24x32xf32>
    %165 = arith.subf %148, %164 : vector<24x32xf32>
    %cst_100 = arith.constant 9.99999974E-6 : f32
    %166 = vector.broadcast %cst_100 : f32 to vector<24x1xf32>
    %167 = arith.addf %163, %166 : vector<24x1xf32>
    %168 = math.rsqrt %167 : vector<24x1xf32>
    %169 = vector.broadcast %168 : vector<24x1xf32> to vector<24x32xf32>
    %170 = arith.mulf %165, %169 : vector<24x32xf32>
    %171 = vector.broadcast %150 : vector<1x32xf32> to vector<24x32xf32>
    %172 = arith.mulf %170, %171 : vector<24x32xf32>
    %173 = vector.broadcast %152 : vector<1x32xf32> to vector<24x32xf32>
    %174 = arith.addf %172, %173 : vector<24x32xf32>
    %175 = arith.truncf %174 : vector<24x32xf32> to vector<24x32xbf16>
    %176 = vector.shape_cast %175 : vector<24x32xbf16> to vector<1x24x32xbf16>
    %177 = vector.shape_cast %176 : vector<1x24x32xbf16> to vector<1x24x32xbf16>
    %178 = vector.broadcast %177 : vector<1x24x32xbf16> to vector<4x24x32xbf16>
    %c1_101 = arith.constant 1 : index
    %c0_102 = arith.constant 0 : index
    %c0_103 = arith.constant 0 : index
    %c0_104 = arith.constant 0 : index
    %179 = vector.load %arg7[%c1_101, %c0_102, %c0_103, %c0_104] : memref<2x4x32x8xbf16, #tpu.memory_space<vmem>>, vector<1x4x32x8xbf16>
    %180 = vector.shape_cast %179 : vector<1x4x32x8xbf16> to vector<4x32x8xbf16>
    %cst_105 = arith.constant dense<0.000000e+00> : vector<4x24x8xf32>
    %181 = tpu.matmul %178, %180, %cst_105 {dimension_numbers = #tpu.dot_dimension_numbers<[2], [1], [1], [2], [0, 0, 0, 1, 1, 2], [0], [0]>} : vector<4x24x32xbf16>, vector<4x32x8xbf16>, vector<4x24x8xf32> -> vector<4x24x8xf32>
    %c1_106 = arith.constant 1 : index
    %c0_107 = arith.constant 0 : index
    %c0_108 = arith.constant 0 : index
    %c0_109 = arith.constant 0 : index
    %182 = vector.load %arg8[%c1_106, %c0_107, %c0_108, %c0_109] : memref<2x4x32x8xbf16, #tpu.memory_space<vmem>>, vector<1x4x32x8xbf16>
    %183 = vector.shape_cast %182 : vector<1x4x32x8xbf16> to vector<4x32x8xbf16>
    %cst_110 = arith.constant dense<0.000000e+00> : vector<4x24x8xf32>
    %184 = tpu.matmul %178, %183, %cst_110 {dimension_numbers = #tpu.dot_dimension_numbers<[2], [1], [1], [2], [0, 0, 0, 1, 1, 2], [0], [0]>} : vector<4x24x32xbf16>, vector<4x32x8xbf16>, vector<4x24x8xf32> -> vector<4x24x8xf32>
    %c1_111 = arith.constant 1 : index
    %c0_112 = arith.constant 0 : index
    %c0_113 = arith.constant 0 : index
    %c0_114 = arith.constant 0 : index
    %185 = vector.load %arg9[%c1_111, %c0_112, %c0_113, %c0_114] : memref<2x4x32x8xbf16, #tpu.memory_space<vmem>>, vector<1x4x32x8xbf16>
    %186 = vector.shape_cast %185 : vector<1x4x32x8xbf16> to vector<4x32x8xbf16>
    %cst_115 = arith.constant dense<0.000000e+00> : vector<4x24x8xf32>
    %187 = tpu.matmul %178, %186, %cst_115 {dimension_numbers = #tpu.dot_dimension_numbers<[2], [1], [1], [2], [0, 0, 0, 1, 1, 2], [0], [0]>} : vector<4x24x32xbf16>, vector<4x32x8xbf16>, vector<4x24x8xf32> -> vector<4x24x8xf32>
    %188 = arith.truncf %181 : vector<4x24x8xf32> to vector<4x24x8xbf16>
    %189 = arith.truncf %184 : vector<4x24x8xf32> to vector<4x24x8xbf16>
    %cst_116 = arith.constant dense<0.000000e+00> : vector<4x24x24xf32>
    %190 = tpu.matmul %188, %189, %cst_116 {dimension_numbers = #tpu.dot_dimension_numbers<[2], [2], [1], [1], [0, 0, 0, 1, 1, 1], [0], [0]>} : vector<4x24x8xbf16>, vector<4x24x8xbf16>, vector<4x24x24xf32> -> vector<4x24x24xf32>
    %cst_117 = arith.constant 0.353553385 : f32
    %191 = vector.broadcast %cst_117 : f32 to vector<4x24x24xf32>
    %192 = arith.mulf %190, %191 : vector<4x24x24xf32>
    %193 = vector.shape_cast %22 : vector<1x24xf32> to vector<1x1x24xf32>
    %194 = vector.broadcast %193 : vector<1x1x24xf32> to vector<4x24x24xf32>
    %195 = arith.addf %192, %194 : vector<4x24x24xf32>
    %cst_118 = arith.constant dense<0xFF800000> : vector<4x24xf32>
    %196 = vector.multi_reduction <maximumf>, %195, %cst_118 [2] : vector<4x24x24xf32> to vector<4x24xf32>
    %197 = vector.shape_cast %196 : vector<4x24xf32> to vector<4x24x1xf32>
    %198 = vector.broadcast %197 : vector<4x24x1xf32> to vector<4x24x24xf32>
    %199 = arith.subf %195, %198 : vector<4x24x24xf32>
    %200 = math.exp %199 : vector<4x24x24xf32>
    %cst_119 = arith.constant dense<0.000000e+00> : vector<4x24xf32>
    %201 = vector.multi_reduction <add>, %200, %cst_119 [2] : vector<4x24x24xf32> to vector<4x24xf32>
    %202 = vector.shape_cast %201 : vector<4x24xf32> to vector<4x24x1xf32>
    %203 = tpu.reciprocal %202 {approx = true} : vector<4x24x1xf32> -> vector<4x24x1xf32>
    %204 = vector.broadcast %203 : vector<4x24x1xf32> to vector<4x24x24xf32>
    %205 = arith.mulf %200, %204 : vector<4x24x24xf32>
    %206 = arith.truncf %205 : vector<4x24x24xf32> to vector<4x24x24xbf16>
    %207 = arith.truncf %187 : vector<4x24x8xf32> to vector<4x24x8xbf16>
    %cst_120 = arith.constant dense<0.000000e+00> : vector<4x24x8xf32>
    %208 = tpu.matmul %206, %207, %cst_120 {dimension_numbers = #tpu.dot_dimension_numbers<[2], [1], [1], [2], [0, 0, 0, 1, 1, 2], [0], [0]>} : vector<4x24x24xbf16>, vector<4x24x8xbf16>, vector<4x24x8xf32> -> vector<4x24x8xf32>
    %209 = arith.truncf %208 : vector<4x24x8xf32> to vector<4x24x8xbf16>
    %c1_121 = arith.constant 1 : index
    %c0_122 = arith.constant 0 : index
    %c0_123 = arith.constant 0 : index
    %c0_124 = arith.constant 0 : index
    %210 = vector.load %arg10[%c1_121, %c0_122, %c0_123, %c0_124] : memref<2x4x8x32xbf16, #tpu.memory_space<vmem>>, vector<1x4x8x32xbf16>
    %211 = vector.shape_cast %210 : vector<1x4x8x32xbf16> to vector<4x8x32xbf16>
    %cst_125 = arith.constant dense<0.000000e+00> : vector<4x24x32xf32>
    %212 = tpu.matmul %209, %211, %cst_125 {dimension_numbers = #tpu.dot_dimension_numbers<[2], [1], [1], [2], [0, 0, 0, 1, 1, 2], [0], [0]>} : vector<4x24x8xbf16>, vector<4x8x32xbf16>, vector<4x24x32xf32> -> vector<4x24x32xf32>
    %cst_126 = arith.constant dense<0.000000e+00> : vector<24x32xf32>
    %213 = vector.multi_reduction <add>, %212, %cst_126 [0] : vector<4x24x32xf32> to vector<24x32xf32>
    %214 = arith.addf %148, %213 : vector<24x32xf32>
    %c1_127 = arith.constant 1 : index
    %c0_128 = arith.constant 0 : index
    %c0_129 = arith.constant 0 : index
    %215 = vector.load %arg11[%c1_127, %c0_128, %c0_129] : memref<2x1x32xf32, #tpu.memory_space<vmem>>, vector<1x1x32xf32>
    %216 = vector.shape_cast %215 : vector<1x1x32xf32> to vector<1x32xf32>
    %217 = vector.broadcast %216 : vector<1x32xf32> to vector<24x32xf32>
    %218 = arith.addf %214, %217 : vector<24x32xf32>
    %c1_130 = arith.constant 1 : index
    %c0_131 = arith.constant 0 : index
    %c0_132 = arith.constant 0 : index
    %219 = vector.load %arg12[%c1_130, %c0_131, %c0_132] : memref<2x1x32xf32, #tpu.memory_space<vmem>>, vector<1x1x32xf32>
    %220 = vector.shape_cast %219 : vector<1x1x32xf32> to vector<1x32xf32>
    %c1_133 = arith.constant 1 : index
    %c0_134 = arith.constant 0 : index
    %c0_135 = arith.constant 0 : index
    %221 = vector.load %arg13[%c1_133, %c0_134, %c0_135] : memref<2x1x32xf32, #tpu.memory_space<vmem>>, vector<1x1x32xf32>
    %222 = vector.shape_cast %221 : vector<1x1x32xf32> to vector<1x32xf32>
    %cst_136 = arith.constant dense<0.000000e+00> : vector<24xf32>
    %223 = vector.multi_reduction <add>, %218, %cst_136 [1] : vector<24x32xf32> to vector<24xf32>
    %224 = vector.shape_cast %223 : vector<24xf32> to vector<24x1xf32>
    %cst_137 = arith.constant 3.200000e+01 : f32
    %225 = vector.broadcast %cst_137 : f32 to vector<24x1xf32>
    %226 = arith.divf %224, %225 : vector<24x1xf32>
    %227 = vector.broadcast %226 : vector<24x1xf32> to vector<24x32xf32>
    %228 = arith.subf %218, %227 : vector<24x32xf32>
    %229 = arith.mulf %228, %228 : vector<24x32xf32>
    %cst_138 = arith.constant dense<0.000000e+00> : vector<24xf32>
    %230 = vector.multi_reduction <add>, %229, %cst_138 [1] : vector<24x32xf32> to vector<24xf32>
    %231 = vector.shape_cast %230 : vector<24xf32> to vector<24x1xf32>
    %cst_139 = arith.constant 3.200000e+01 : f32
    %232 = vector.broadcast %cst_139 : f32 to vector<24x1xf32>
    %233 = arith.divf %231, %232 : vector<24x1xf32>
    %234 = vector.broadcast %226 : vector<24x1xf32> to vector<24x32xf32>
    %235 = arith.subf %218, %234 : vector<24x32xf32>
    %cst_140 = arith.constant 9.99999974E-6 : f32
    %236 = vector.broadcast %cst_140 : f32 to vector<24x1xf32>
    %237 = arith.addf %233, %236 : vector<24x1xf32>
    %238 = math.rsqrt %237 : vector<24x1xf32>
    %239 = vector.broadcast %238 : vector<24x1xf32> to vector<24x32xf32>
    %240 = arith.mulf %235, %239 : vector<24x32xf32>
    %241 = vector.broadcast %220 : vector<1x32xf32> to vector<24x32xf32>
    %242 = arith.mulf %240, %241 : vector<24x32xf32>
    %243 = vector.broadcast %222 : vector<1x32xf32> to vector<24x32xf32>
    %244 = arith.addf %242, %243 : vector<24x32xf32>
    %245 = arith.truncf %244 : vector<24x32xf32> to vector<24x32xbf16>
    %c1_141 = arith.constant 1 : index
    %c0_142 = arith.constant 0 : index
    %c0_143 = arith.constant 0 : index
    %246 = vector.load %arg14[%c1_141, %c0_142, %c0_143] : memref<2x32x64xbf16, #tpu.memory_space<vmem>>, vector<1x32x64xbf16>
    %247 = vector.shape_cast %246 : vector<1x32x64xbf16> to vector<32x64xbf16>
    %cst_144 = arith.constant dense<0.000000e+00> : vector<24x64xf32>
    %248 = tpu.matmul %245, %247, %cst_144 {dimension_numbers = #tpu.dot_dimension_numbers<[1], [0], [0], [1], [0, 0, 1, 1], [], []>} : vector<24x32xbf16>, vector<32x64xbf16>, vector<24x64xf32> -> vector<24x64xf32>
    %c1_145 = arith.constant 1 : index
    %c0_146 = arith.constant 0 : index
    %c0_147 = arith.constant 0 : index
    %249 = vector.load %arg15[%c1_145, %c0_146, %c0_147] : memref<2x1x64xf32, #tpu.memory_space<vmem>>, vector<1x1x64xf32>
    %250 = vector.shape_cast %249 : vector<1x1x64xf32> to vector<1x64xf32>
    %251 = vector.broadcast %250 : vector<1x64xf32> to vector<24x64xf32>
    %252 = arith.addf %248, %251 : vector<24x64xf32>
    %cst_148 = arith.constant 5.000000e-01 : f32
    %253 = vector.broadcast %cst_148 : f32 to vector<24x64xf32>
    %254 = arith.mulf %253, %252 : vector<24x64xf32>
    %cst_149 = arith.constant 4.471500e-02 : f32
    %255 = vector.broadcast %cst_149 : f32 to vector<24x64xf32>
    %256 = arith.mulf %255, %252 : vector<24x64xf32>
    %257 = arith.mulf %256, %252 : vector<24x64xf32>
    %258 = arith.mulf %257, %252 : vector<24x64xf32>
    %259 = arith.addf %252, %258 : vector<24x64xf32>
    %cst_150 = arith.constant 0.797884583 : f32
    %260 = vector.broadcast %cst_150 : f32 to vector<24x64xf32>
    %261 = arith.mulf %260, %259 : vector<24x64xf32>
    %262 = math.tanh %261 : vector<24x64xf32>
    %cst_151 = arith.constant 1.000000e+00 : f32
    %263 = vector.broadcast %cst_151 : f32 to vector<24x64xf32>
    %264 = arith.addf %263, %262 : vector<24x64xf32>
    %265 = arith.mulf %254, %264 : vector<24x64xf32>
    %266 = arith.truncf %265 : vector<24x64xf32> to vector<24x64xbf16>
    %c1_152 = arith.constant 1 : index
    %c0_153 = arith.constant 0 : index
    %c0_154 = arith.constant 0 : index
    %267 = vector.load %arg16[%c1_152, %c0_153, %c0_154] : memref<2x64x32xbf16, #tpu.memory_space<vmem>>, vector<1x64x32xbf16>
    %268 = vector.shape_cast %267 : vector<1x64x32xbf16> to vector<64x32xbf16>
    %cst_155 = arith.constant dense<0.000000e+00> : vector<24x32xf32>
    %269 = tpu.matmul %266, %268, %cst_155 {dimension_numbers = #tpu.dot_dimension_numbers<[1], [0], [0], [1], [0, 0, 1, 1], [], []>} : vector<24x64xbf16>, vector<64x32xbf16>, vector<24x32xf32> -> vector<24x32xf32>
    %c1_156 = arith.constant 1 : index
    %c0_157 = arith.constant 0 : index
    %c0_158 = arith.constant 0 : index
    %270 = vector.load %arg17[%c1_156, %c0_157, %c0_158] : memref<2x1x32xf32, #tpu.memory_space<vmem>>, vector<1x1x32xf32>
    %271 = vector.shape_cast %270 : vector<1x1x32xf32> to vector<1x32xf32>
    %272 = vector.broadcast %271 : vector<1x32xf32> to vector<24x32xf32>
    %273 = arith.addf %269, %272 : vector<24x32xf32>
    %274 = arith.addf %218, %273 : vector<24x32xf32>
    %275 = vector.extract_strided_slice %274 {offsets = [0, 0], sizes = [1, 32], strides = [1, 1]} : vector<24x32xf32> to vector<1x32xf32>
    %276 = arith.truncf %275 : vector<1x32xf32> to vector<1x32xbf16>
    %c0_159 = arith.constant 0 : index
    %c0_160 = arith.constant 0 : index
    %277 = vector.load %arg18[%c0_159, %c0_160] : memref<32x10xbf16, #tpu.memory_space<vmem>>, vector<32x10xbf16>
    %cst_161 = arith.constant dense<0.000000e+00> : vector<1x10xf32>
    %278 = tpu.matmul %276, %277, %cst_161 {dimension_numbers = #tpu.dot_dimension_numbers<[1], [0], [0], [1], [0, 0, 1, 1], [], []>} : vector<1x32xbf16>, vector<32x10xbf16>, vector<1x10xf32> -> vector<1x10xf32>
    %c0_162 = arith.constant 0 : index
    %c0_163 = arith.constant 0 : index
    %279 = vector.load %arg19[%c0_162, %c0_163] : memref<1x10xf32, #tpu.memory_space<vmem>>, vector<1x10xf32>
    %280 = arith.addf %278, %279 : vector<1x10xf32>
    %cst_164 = arith.constant dense<0xFF800000> : vector<1xf32>
    %281 = vector.multi_reduction <maximumf>, %280, %cst_164 [1] : vector<1x10xf32> to vector<1xf32>
    %282 = vector.shape_cast %281 : vector<1xf32> to vector<1x1xf32>
    %283 = vector.broadcast %282 : vector<1x1xf32> to vector<1x10xf32>
    %284 = arith.subf %280, %283 : vector<1x10xf32>
    %285 = math.exp %284 : vector<1x10xf32>
    %cst_165 = arith.constant dense<0.000000e+00> : vector<1xf32>
    %286 = vector.multi_reduction <add>, %285, %cst_165 [1] : vector<1x10xf32> to vector<1xf32>
    %287 = vector.shape_cast %286 : vector<1xf32> to vector<1x1xf32>
    %288 = tpu.reciprocal %287 {approx = true} : vector<1x1xf32> -> vector<1x1xf32>
    %289 = vector.broadcast %288 : vector<1x1xf32> to vector<1x10xf32>
    %290 = arith.mulf %285, %289 : vector<1x10xf32>
    %c0_166 = arith.constant 0 : index
    %c0_167 = arith.constant 0 : index
    %291 = vector.load %arg20[%c0_166, %c0_167] : memref<1x10xf32, #tpu.memory_space<vmem>>, vector<1x10xf32>
    tpu.vector_store %arg20[%c0_166, %c0_167], %290 {strides = array<i32>} : memref<1x10xf32, #tpu.memory_space<vmem>>, vector<1x10xf32>,
    return
  }
}

</mosaic_0001>

<bundles_post_ra>
// kernel: squeeze.1
= control target key start
LH: loop header
LB: loop body
LE: loop exit
PB: predicated region body
PF: predicated region fallthrough
CT: control target
= control target key end

     0   :  { %vm3_vm0 = vcmask 31744   ;;  %s807_s12 = smov 124   ;;  %s809_s23 = smov 116   ;;  %s1100_s0 = inlined_call_operand.vmem [shape: f32[1,4,16,16], index: 0, kind: input, shape index: {}]   ;;  %s1101_s1 = inlined_call_operand.vmem [shape: f32[4,4,4,4,4], index: 1, kind: output, shape index: {}]  }
   0x1   :  { %v721_v0 = vld [vmem:[%s1100_s0 + $0x10] sm:$0xff]   ;;  %v55_v1 = vld [vmem:[%s1100_s0] sm:$0xff]   ;;  %v722_v2 = vld [vmem:[%s1100_s0 + $0x18] sm:$0xff]  }
   0x2   :  { %74 = vrot.lane.b32.xlu1 %v721_v0, %s807_s12  ;;  %56 = vrot.lane.b32.xlu0 %v55_v1, %s807_s12  ;;  %v720_v3 = vld [vmem:[%s1100_s0 + $0x8] sm:$0xff]   ;;  %17 = vst.msk [vmem:[#allocation0 + $0x80] ss:$8 sm:$0xf] %vm3_vm0, %v721_v0   ;;  %v723_v5 = vld [vmem:[%s1100_s0 + $0x20] sm:$0xff]  }
   0x3   :  { %v724_v4 = vld [vmem:[%s1100_s0 + $0x28] sm:$0xff]   ;;  %19 = vst.msk [vmem:[#allocation0 + $0x80] ss:$8 sm:$0xf0] %vm3_vm0, %v721_v0   ;;  %v726_v6 = vld [vmem:[%s1100_s0 + $0x38] sm:$0xff]   ;;  %v725_v7 = vld [vmem:[%s1100_s0 + $0x30] sm:$0xff]  }
   0x4   :  { %4 = vst.msk [vmem:[#allocation0] ss:$8 sm:$0xf] %vm3_vm0, %v55_v1   ;;  %5 = vst.msk [vmem:[#allocation0] ss:$8 sm:$0xf0] %vm3_vm0, %v55_v1  }
   0x5   :  { %24 = vst.msk [vmem:[#allocation0 + $0xc0] ss:$8 sm:$0xf] %vm3_vm0, %v722_v2   ;;  %26 = vst.msk [vmem:[#allocation0 + $0xc0] ss:$8 sm:$0xf0] %vm3_vm0, %v722_v2  }
   0x6   :  { %10 = vst.msk [vmem:[#allocation0 + $0x40] ss:$8 sm:$0xf] %vm3_vm0, %v720_v3   ;;  %12 = vst.msk [vmem:[#allocation0 + $0x40] ss:$8 sm:$0xf0] %vm3_vm0, %v720_v3   ;;  %83 = vrot.lane.b32.xlu1 %v722_v2, %s807_s12  ;;  %65 = vrot.lane.b32.xlu0 %v720_v3, %s807_s12 }
   0x7   :  { %38 = vst.msk [vmem:[#allocation0 + $0x140] ss:$8 sm:$0xf] %vm3_vm0, %v724_v4   ;;  %40 = vst.msk [vmem:[#allocation0 + $0x140] ss:$8 sm:$0xf0] %vm3_vm0, %v724_v4  }
   0x8   :  { %31 = vst.msk [vmem:[#allocation0 + $0x100] ss:$8 sm:$0xf] %vm3_vm0, %v723_v5   ;;  %33 = vst.msk [vmem:[#allocation0 + $0x100] ss:$8 sm:$0xf0] %vm3_vm0, %v723_v5  }
   0x9   :  { %52 = vst.msk [vmem:[#allocation0 + $0x1c0] ss:$8 sm:$0xf] %vm3_vm0, %v726_v6   ;;  %54 = vst.msk [vmem:[#allocation0 + $0x1c0] ss:$8 sm:$0xf0] %vm3_vm0, %v726_v6  }
   0xa   :  { %45 = vst.msk [vmem:[#allocation0 + $0x180] ss:$8 sm:$0xf] %vm3_vm0, %v725_v7   ;;  %47 = vst.msk [vmem:[#allocation0 + $0x180] ss:$8 sm:$0xf0] %vm3_vm0, %v725_v7   ;;  %101 = vrot.lane.b32.xlu1 %v724_v4, %s807_s12  ;;  %92 = vrot.lane.b32.xlu0 %v723_v5, %s807_s12 }
   0xb   :  { %s808_s0 = smov 120  }
   0xe   :  { %119 = vrot.lane.b32.xlu1 %v726_v6, %s807_s12  ;;  %110 = vrot.lane.b32.xlu0 %v725_v7, %s807_s12 }
  0x12   :  { %136 = vrot.lane.b32.xlu1 %v720_v3, %s808_s0  ;;  %127 = vrot.lane.b32.xlu0 %v55_v1, %s808_s0 }
  0x16   :  { %154 = vrot.lane.b32.xlu1 %v722_v2, %s808_s0  ;;  %145 = vrot.lane.b32.xlu0 %v721_v0, %s808_s0 }
  0x1a   :  { %172 = vrot.lane.b32.xlu1 %v724_v4, %s808_s0  ;;  %163 = vrot.lane.b32.xlu0 %v723_v5, %s808_s0 }
  0x1e   :  { %190 = vrot.lane.b32.xlu1 %v726_v6, %s808_s0  ;;  %181 = vrot.lane.b32.xlu0 %v725_v7, %s808_s0 }
  0x22   :  { %207 = vrot.lane.b32.xlu1 %v720_v3, %s809_s23  ;;  %198 = vrot.lane.b32.xlu0 %v55_v1, %s809_s23 }
  0x26   :  { %225 = vrot.lane.b32.xlu1 %v722_v2, %s809_s23  ;;  %216 = vrot.lane.b32.xlu0 %v721_v0, %s809_s23 }
  0x2a   :  { %243 = vrot.lane.b32.xlu1 %v724_v4, %s809_s23  ;;  %234 = vrot.lane.b32.xlu0 %v723_v5, %s809_s23 }
  0x2e   :  { %261 = vrot.lane.b32.xlu1 %v726_v6, %s809_s23  ;;  %252 = vrot.lane.b32.xlu0 %v725_v7, %s809_s23 }
  0x74   :  { %v75_v8 = vpop.permute.xlu1 %74   ;;  %v57_v9 = vpop.permute.xlu0 %56  }
  0x75   :  { %78 = vst.msk [vmem:[#allocation0 + $0x81] ss:$8 sm:$0xf] %vm3_vm0, %v75_v8   ;;  %80 = vst.msk [vmem:[#allocation0 + $0x81] ss:$8 sm:$0xf0] %vm3_vm0, %v75_v8  }
  0x76   :  { %60 = vst.msk [vmem:[#allocation0 + $0x1] ss:$8 sm:$0xf] %vm3_vm0, %v57_v9   ;;  %62 = vst.msk [vmem:[#allocation0 + $0x1] ss:$8 sm:$0xf0] %vm3_vm0, %v57_v9  }
  0x78   :  { %v84_v10 = vpop.permute.xlu1 %83   ;;  %v66_v11 = vpop.permute.xlu0 %65  }
  0x79   :  { %87 = vst.msk [vmem:[#allocation0 + $0xc1] ss:$8 sm:$0xf] %vm3_vm0, %v84_v10   ;;  %89 = vst.msk [vmem:[#allocation0 + $0xc1] ss:$8 sm:$0xf0] %vm3_vm0, %v84_v10  }
  0x7a   :  { %69 = vst.msk [vmem:[#allocation0 + $0x41] ss:$8 sm:$0xf] %vm3_vm0, %v66_v11   ;;  %71 = vst.msk [vmem:[#allocation0 + $0x41] ss:$8 sm:$0xf0] %vm3_vm0, %v66_v11  }
  0x7c   :  { %v102_v12 = vpop.permute.xlu1 %101   ;;  %v93_v13 = vpop.permute.xlu0 %92  }
  0x7d   :  { %105 = vst.msk [vmem:[#allocation0 + $0x141] ss:$8 sm:$0xf] %vm3_vm0, %v102_v12   ;;  %107 = vst.msk [vmem:[#allocation0 + $0x141] ss:$8 sm:$0xf0] %vm3_vm0, %v102_v12  }
  0x7e   :  { %96 = vst.msk [vmem:[#allocation0 + $0x101] ss:$8 sm:$0xf] %vm3_vm0, %v93_v13   ;;  %98 = vst.msk [vmem:[#allocation0 + $0x101] ss:$8 sm:$0xf0] %vm3_vm0, %v93_v13  }
  0x80   :  { %v120_v14 = vpop.permute.xlu1 %119   ;;  %v111_v15 = vpop.permute.xlu0 %110  }
  0x81   :  { %123 = vst.msk [vmem:[#allocation0 + $0x1c1] ss:$8 sm:$0xf] %vm3_vm0, %v120_v14   ;;  %125 = vst.msk [vmem:[#allocation0 + $0x1c1] ss:$8 sm:$0xf0] %vm3_vm0, %v120_v14  }
  0x82   :  { %114 = vst.msk [vmem:[#allocation0 + $0x181] ss:$8 sm:$0xf] %vm3_vm0, %v111_v15   ;;  %116 = vst.msk [vmem:[#allocation0 + $0x181] ss:$8 sm:$0xf0] %vm3_vm0, %v111_v15  }
  0x84   :  { %v137_v16 = vpop.permute.xlu1 %136   ;;  %v128_v17 = vpop.permute.xlu0 %127  }
  0x85   :  { %140 = vst.msk [vmem:[#allocation0 + $0x42] ss:$8 sm:$0xf] %vm3_vm0, %v137_v16   ;;  %142 = vst.msk [vmem:[#allocation0 + $0x42] ss:$8 sm:$0xf0] %vm3_vm0, %v137_v16  }
  0x86   :  { %131 = vst.msk [vmem:[#allocation0 + $0x2] ss:$8 sm:$0xf] %vm3_vm0, %v128_v17   ;;  %133 = vst.msk [vmem:[#allocation0 + $0x2] ss:$8 sm:$0xf0] %vm3_vm0, %v128_v17  }
  0x88   :  { %v155_v18 = vpop.permute.xlu1 %154   ;;  %v146_v19 = vpop.permute.xlu0 %145  }
  0x89   :  { %158 = vst.msk [vmem:[#allocation0 + $0xc2] ss:$8 sm:$0xf] %vm3_vm0, %v155_v18   ;;  %160 = vst.msk [vmem:[#allocation0 + $0xc2] ss:$8 sm:$0xf0] %vm3_vm0, %v155_v18  }
  0x8a   :  { %149 = vst.msk [vmem:[#allocation0 + $0x82] ss:$8 sm:$0xf] %vm3_vm0, %v146_v19   ;;  %151 = vst.msk [vmem:[#allocation0 + $0x82] ss:$8 sm:$0xf0] %vm3_vm0, %v146_v19  }
  0x8c   :  { %v173_v20 = vpop.permute.xlu1 %172   ;;  %v164_v21 = vpop.permute.xlu0 %163  }
  0x8d   :  { %176 = vst.msk [vmem:[#allocation0 + $0x142] ss:$8 sm:$0xf] %vm3_vm0, %v173_v20   ;;  %178 = vst.msk [vmem:[#allocation0 + $0x142] ss:$8 sm:$0xf0] %vm3_vm0, %v173_v20  }
  0x8e   :  { %167 = vst.msk [vmem:[#allocation0 + $0x102] ss:$8 sm:$0xf] %vm3_vm0, %v164_v21   ;;  %169 = vst.msk [vmem:[#allocation0 + $0x102] ss:$8 sm:$0xf0] %vm3_vm0, %v164_v21  }
  0x90   :  { %v191_v22 = vpop.permute.xlu1 %190   ;;  %v182_v23 = vpop.permute.xlu0 %181  }
  0x91   :  { %194 = vst.msk [vmem:[#allocation0 + $0x1c2] ss:$8 sm:$0xf] %vm3_vm0, %v191_v22   ;;  %196 = vst.msk [vmem:[#allocation0 + $0x1c2] ss:$8 sm:$0xf0] %vm3_vm0, %v191_v22  }
  0x92   :  { %185 = vst.msk [vmem:[#allocation0 + $0x182] ss:$8 sm:$0xf] %vm3_vm0, %v182_v23   ;;  %187 = vst.msk [vmem:[#allocation0 + $0x182] ss:$8 sm:$0xf0] %vm3_vm0, %v182_v23  }
  0x94   :  { %v208_v24 = vpop.permute.xlu1 %207   ;;  %v199_v25 = vpop.permute.xlu0 %198  }
  0x95   :  { %211 = vst.msk [vmem:[#allocation0 + $0x43] ss:$8 sm:$0xf] %vm3_vm0, %v208_v24   ;;  %213 = vst.msk [vmem:[#allocation0 + $0x43] ss:$8 sm:$0xf0] %vm3_vm0, %v208_v24  }
  0x96   :  { %202 = vst.msk [vmem:[#allocation0 + $0x3] ss:$8 sm:$0xf] %vm3_vm0, %v199_v25   ;;  %204 = vst.msk [vmem:[#allocation0 + $0x3] ss:$8 sm:$0xf0] %vm3_vm0, %v199_v25  }
  0x98   :  { %v226_v26 = vpop.permute.xlu1 %225   ;;  %v217_v27 = vpop.permute.xlu0 %216  }
  0x99   :  { %229 = vst.msk [vmem:[#allocation0 + $0xc3] ss:$8 sm:$0xf] %vm3_vm0, %v226_v26   ;;  %231 = vst.msk [vmem:[#allocation0 + $0xc3] ss:$8 sm:$0xf0] %vm3_vm0, %v226_v26  }
  0x9a   :  { %220 = vst.msk [vmem:[#allocation0 + $0x83] ss:$8 sm:$0xf] %vm3_vm0, %v217_v27   ;;  %222 = vst.msk [vmem:[#allocation0 + $0x83] ss:$8 sm:$0xf0] %vm3_vm0, %v217_v27  }
  0x9c   :  { %v316_v28 = vld [vmem:[#allocation0 + $0x40] sm:$0xf]  ;;  %v322_v29 = vld [vmem:[#allocation0 + $0x48] sm:$0xf]  ;;  %v328_v30 = vld [vmem:[#allocation0 + $0x50] sm:$0xf]  ;;  %v244_v31 = vpop.permute.xlu1 %243   ;;  %v235_v32 = vpop.permute.xlu0 %234  }
  0x9d   :  { %v334_v33 = vld [vmem:[#allocation0 + $0x58] sm:$0xf]  ;;  %v340_v34 = vld [vmem:[#allocation0 + $0x60] sm:$0xf]  ;;  %v346_v35 = vld [vmem:[#allocation0 + $0x68] sm:$0xf] }
  0x9e   :  { %748 = vst [vmem:[%s1101_s1 + $0x20] sm:$0xf] %v316_v28  ;;  %749 = vst [vmem:[%s1101_s1 + $0x24] sm:$0xf] %v322_v29  ;;  %v352_v36 = vld [vmem:[#allocation0 + $0x70] sm:$0xf] }
  0x9f   :  { %750 = vst [vmem:[%s1101_s1 + $0x28] sm:$0xf] %v328_v30  ;;  %247 = vst.msk [vmem:[#allocation0 + $0x143] ss:$8 sm:$0xf] %vm3_vm0, %v244_v31  }
  0xa0   :  { %249 = vst.msk [vmem:[#allocation0 + $0x143] ss:$8 sm:$0xf0] %vm3_vm0, %v244_v31   ;;  %238 = vst.msk [vmem:[#allocation0 + $0x103] ss:$8 sm:$0xf] %vm3_vm0, %v235_v32   ;;  %v262_v45 = vpop.permute.xlu1 %261   ;;  %v253_v46 = vpop.permute.xlu0 %252  }
  0xa1   :  { %240 = vst.msk [vmem:[#allocation0 + $0x103] ss:$8 sm:$0xf0] %vm3_vm0, %v235_v32   ;;  %v358_v37 = vld [vmem:[#allocation0 + $0x78] sm:$0xf] }
  0xa2   :  { %v271_v38 = vld [vmem:[#allocation0] sm:$0xf]  ;;  %751 = vst [vmem:[%s1101_s1 + $0x2c] sm:$0xf] %v334_v33  ;;  %752 = vst [vmem:[%s1101_s1 + $0x30] sm:$0xf] %v340_v34 }
  0xa3   :  { %753 = vst [vmem:[%s1101_s1 + $0x34] sm:$0xf] %v346_v35  ;;  %v275_v39 = vld [vmem:[#allocation0 + $0x8] sm:$0xf]  ;;  %v280_v40 = vld [vmem:[#allocation0 + $0x10] sm:$0xf] }
  0xa4   :  { %v286_v41 = vld [vmem:[#allocation0 + $0x18] sm:$0xf]  ;;  %754 = vst [vmem:[%s1101_s1 + $0x38] sm:$0xf] %v352_v36  ;;  %755 = vst [vmem:[%s1101_s1 + $0x3c] sm:$0xf] %v358_v37 }
  0xa5   :  { %273 = vst [vmem:[%s1101_s1] sm:$0xf] %v271_v38  ;;  %v292_v42 = vld [vmem:[#allocation0 + $0x20] sm:$0xf]  ;;  %v298_v43 = vld [vmem:[#allocation0 + $0x28] sm:$0xf] }
  0xa6   :  { %v304_v44 = vld [vmem:[#allocation0 + $0x30] sm:$0xf]  ;;  %741 = vst [vmem:[%s1101_s1 + $0x4] sm:$0xf] %v275_v39  ;;  %742 = vst [vmem:[%s1101_s1 + $0x8] sm:$0xf] %v280_v40 }
  0xa7   :  { %743 = vst [vmem:[%s1101_s1 + $0xc] sm:$0xf] %v286_v41  ;;  %v310_v47 = vld [vmem:[#allocation0 + $0x38] sm:$0xf]  ;;  %744 = vst [vmem:[%s1101_s1 + $0x10] sm:$0xf] %v292_v42 }
  0xa8   :  { %745 = vst [vmem:[%s1101_s1 + $0x14] sm:$0xf] %v298_v43  ;;  %746 = vst [vmem:[%s1101_s1 + $0x18] sm:$0xf] %v304_v44  ;;  %v412_v48 = vld [vmem:[#allocation0 + $0xc0] sm:$0xf] }
  0xa9   :  { %v418_v49 = vld [vmem:[#allocation0 + $0xc8] sm:$0xf]  ;;  %265 = vst.msk [vmem:[#allocation0 + $0x1c3] ss:$8 sm:$0xf] %vm3_vm0, %v262_v45  }
  0xaa   :  { %267 = vst.msk [vmem:[#allocation0 + $0x1c3] ss:$8 sm:$0xf0] %vm3_vm0, %v262_v45   ;;  %256 = vst.msk [vmem:[#allocation0 + $0x183] ss:$8 sm:$0xf] %vm3_vm0, %v253_v46  }
  0xab   :  { %258 = vst.msk [vmem:[#allocation0 + $0x183] ss:$8 sm:$0xf0] %vm3_vm0, %v253_v46   ;;  %747 = vst [vmem:[%s1101_s1 + $0x1c] sm:$0xf] %v310_v47 }
  0xac   :  { %v424_v50 = vld [vmem:[#allocation0 + $0xd0] sm:$0xf]  ;;  %v430_v51 = vld [vmem:[#allocation0 + $0xd8] sm:$0xf]  ;;  %v436_v52 = vld [vmem:[#allocation0 + $0xe0] sm:$0xf] }
  0xad   :  { %764 = vst [vmem:[%s1101_s1 + $0x60] sm:$0xf] %v412_v48  ;;  %765 = vst [vmem:[%s1101_s1 + $0x64] sm:$0xf] %v418_v49  ;;  %v442_v53 = vld [vmem:[#allocation0 + $0xe8] sm:$0xf] }
  0xae   :  { %v448_v54 = vld [vmem:[#allocation0 + $0xf0] sm:$0xf]  ;;  %v454_v55 = vld [vmem:[#allocation0 + $0xf8] sm:$0xf]  ;;  %766 = vst [vmem:[%s1101_s1 + $0x68] sm:$0xf] %v424_v50 }
  0xaf   :  { %767 = vst [vmem:[%s1101_s1 + $0x6c] sm:$0xf] %v430_v51  ;;  %768 = vst [vmem:[%s1101_s1 + $0x70] sm:$0xf] %v436_v52  ;;  %v364_v56 = vld [vmem:[#allocation0 + $0x80] sm:$0xf] }
  0xb0   :  { %v370_v57 = vld [vmem:[#allocation0 + $0x88] sm:$0xf]  ;;  %v376_v58 = vld [vmem:[#allocation0 + $0x90] sm:$0xf]  ;;  %769 = vst [vmem:[%s1101_s1 + $0x74] sm:$0xf] %v442_v53 }
  0xb1   :  { %770 = vst [vmem:[%s1101_s1 + $0x78] sm:$0xf] %v448_v54  ;;  %771 = vst [vmem:[%s1101_s1 + $0x7c] sm:$0xf] %v454_v55  ;;  %v382_v59 = vld [vmem:[#allocation0 + $0x98] sm:$0xf] }
  0xb2   :  { %v388_v60 = vld [vmem:[#allocation0 + $0xa0] sm:$0xf]  ;;  %v394_v61 = vld [vmem:[#allocation0 + $0xa8] sm:$0xf]  ;;  %756 = vst [vmem:[%s1101_s1 + $0x40] sm:$0xf] %v364_v56 }
  0xb3   :  { %757 = vst [vmem:[%s1101_s1 + $0x44] sm:$0xf] %v370_v57  ;;  %758 = vst [vmem:[%s1101_s1 + $0x48] sm:$0xf] %v376_v58  ;;  %v400_v62 = vld [vmem:[#allocation0 + $0xb0] sm:$0xf] }
  0xb4   :  { %v406_v63 = vld [vmem:[#allocation0 + $0xb8] sm:$0xf]  ;;  %v508_v0 = vld [vmem:[#allocation0 + $0x140] sm:$0xf]  ;;  %759 = vst [vmem:[%s1101_s1 + $0x4c] sm:$0xf] %v382_v59 }
  0xb5   :  { %760 = vst [vmem:[%s1101_s1 + $0x50] sm:$0xf] %v388_v60  ;;  %761 = vst [vmem:[%s1101_s1 + $0x54] sm:$0xf] %v394_v61  ;;  %v514_v1 = vld [vmem:[#allocation0 + $0x148] sm:$0xf] }
  0xb6   :  { %780 = vst [vmem:[%s1101_s1 + $0xa0] sm:$0xf] %v508_v0  ;;  %v520_v2 = vld [vmem:[#allocation0 + $0x150] sm:$0xf]  ;;  %v526_v3 = vld [vmem:[#allocation0 + $0x158] sm:$0xf] }
  0xb7   :  { %762 = vst [vmem:[%s1101_s1 + $0x58] sm:$0xf] %v400_v62  ;;  %763 = vst [vmem:[%s1101_s1 + $0x5c] sm:$0xf] %v406_v63  ;;  %v532_v4 = vld [vmem:[#allocation0 + $0x160] sm:$0xf] }
  0xb8   :  { %781 = vst [vmem:[%s1101_s1 + $0xa4] sm:$0xf] %v514_v1  ;;  %782 = vst [vmem:[%s1101_s1 + $0xa8] sm:$0xf] %v520_v2  ;;  %v538_v5 = vld [vmem:[#allocation0 + $0x168] sm:$0xf] }
  0xb9   :  { %783 = vst [vmem:[%s1101_s1 + $0xac] sm:$0xf] %v526_v3  ;;  %v544_v6 = vld [vmem:[#allocation0 + $0x170] sm:$0xf]  ;;  %784 = vst [vmem:[%s1101_s1 + $0xb0] sm:$0xf] %v532_v4 }
  0xba   :  { %785 = vst [vmem:[%s1101_s1 + $0xb4] sm:$0xf] %v538_v5  ;;  %786 = vst [vmem:[%s1101_s1 + $0xb8] sm:$0xf] %v544_v6  ;;  %v550_v7 = vld [vmem:[#allocation0 + $0x178] sm:$0xf] }
  0xbb   :  { %v460_v8 = vld [vmem:[#allocation0 + $0x100] sm:$0xf]  ;;  %v466_v9 = vld [vmem:[#allocation0 + $0x108] sm:$0xf]  ;;  %787 = vst [vmem:[%s1101_s1 + $0xbc] sm:$0xf] %v550_v7 }
  0xbc   :  { %772 = vst [vmem:[%s1101_s1 + $0x80] sm:$0xf] %v460_v8  ;;  %773 = vst [vmem:[%s1101_s1 + $0x84] sm:$0xf] %v466_v9  ;;  %v472_v10 = vld [vmem:[#allocation0 + $0x110] sm:$0xf] }
  0xbd   :  { %v478_v11 = vld [vmem:[#allocation0 + $0x118] sm:$0xf]  ;;  %v484_v12 = vld [vmem:[#allocation0 + $0x120] sm:$0xf]  ;;  %774 = vst [vmem:[%s1101_s1 + $0x88] sm:$0xf] %v472_v10 }
  0xbe   :  { %775 = vst [vmem:[%s1101_s1 + $0x8c] sm:$0xf] %v478_v11  ;;  %776 = vst [vmem:[%s1101_s1 + $0x90] sm:$0xf] %v484_v12  ;;  %v490_v13 = vld [vmem:[#allocation0 + $0x128] sm:$0xf] }
  0xbf   :  { %v496_v14 = vld [vmem:[#allocation0 + $0x130] sm:$0xf]  ;;  %v502_v15 = vld [vmem:[#allocation0 + $0x138] sm:$0xf]  ;;  %777 = vst [vmem:[%s1101_s1 + $0x94] sm:$0xf] %v490_v13 }
  0xc0   :  { %778 = vst [vmem:[%s1101_s1 + $0x98] sm:$0xf] %v496_v14  ;;  %779 = vst [vmem:[%s1101_s1 + $0x9c] sm:$0xf] %v502_v15  ;;  %v604_v16 = vld [vmem:[#allocation0 + $0x1c0] sm:$0xf] }
  0xc1   :  { %v610_v17 = vld [vmem:[#allocation0 + $0x1c8] sm:$0xf]  ;;  %v616_v18 = vld [vmem:[#allocation0 + $0x1d0] sm:$0xf]  ;;  %796 = vst [vmem:[%s1101_s1 + $0xe0] sm:$0xf] %v604_v16 }
  0xc2   :  { %797 = vst [vmem:[%s1101_s1 + $0xe4] sm:$0xf] %v610_v17  ;;  %798 = vst [vmem:[%s1101_s1 + $0xe8] sm:$0xf] %v616_v18  ;;  %v622_v19 = vld [vmem:[#allocation0 + $0x1d8] sm:$0xf] }
  0xc3   :  { %v628_v20 = vld [vmem:[#allocation0 + $0x1e0] sm:$0xf]  ;;  %v634_v21 = vld [vmem:[#allocation0 + $0x1e8] sm:$0xf]  ;;  %799 = vst [vmem:[%s1101_s1 + $0xec] sm:$0xf] %v622_v19 }
  0xc4   :  { %800 = vst [vmem:[%s1101_s1 + $0xf0] sm:$0xf] %v628_v20  ;;  %801 = vst [vmem:[%s1101_s1 + $0xf4] sm:$0xf] %v634_v21  ;;  %v640_v22 = vld [vmem:[#allocation0 + $0x1f0] sm:$0xf] }
  0xc5   :  { %v646_v23 = vld [vmem:[#allocation0 + $0x1f8] sm:$0xf]  ;;  %v556_v24 = vld [vmem:[#allocation0 + $0x180] sm:$0xf]  ;;  %802 = vst [vmem:[%s1101_s1 + $0xf8] sm:$0xf] %v640_v22 }
  0xc6   :  { %803 = vst [vmem:[%s1101_s1 + $0xfc] sm:$0xf] %v646_v23  ;;  %788 = vst [vmem:[%s1101_s1 + $0xc0] sm:$0xf] %v556_v24  ;;  %v562_v25 = vld [vmem:[#allocation0 + $0x188] sm:$0xf] }
  0xc7   :  { %v568_v26 = vld [vmem:[#allocation0 + $0x190] sm:$0xf]  ;;  %v574_v27 = vld [vmem:[#allocation0 + $0x198] sm:$0xf]  ;;  %789 = vst [vmem:[%s1101_s1 + $0xc4] sm:$0xf] %v562_v25 }
  0xc8   :  { %790 = vst [vmem:[%s1101_s1 + $0xc8] sm:$0xf] %v568_v26  ;;  %791 = vst [vmem:[%s1101_s1 + $0xcc] sm:$0xf] %v574_v27  ;;  %v580_v28 = vld [vmem:[#allocation0 + $0x1a0] sm:$0xf] }
  0xc9   :  { %v586_v29 = vld [vmem:[#allocation0 + $0x1a8] sm:$0xf]  ;;  %v592_v30 = vld [vmem:[#allocation0 + $0x1b0] sm:$0xf]  ;;  %792 = vst [vmem:[%s1101_s1 + $0xd0] sm:$0xf] %v580_v28 }
  0xca   :  { %793 = vst [vmem:[%s1101_s1 + $0xd4] sm:$0xf] %v586_v29  ;;  %794 = vst [vmem:[%s1101_s1 + $0xd8] sm:$0xf] %v592_v30  ;;  %v598_v31 = vld [vmem:[#allocation0 + $0x1b8] sm:$0xf] }
  0xcb   :  { %795 = vst [vmem:[%s1101_s1 + $0xdc] sm:$0xf] %v598_v31 }

// kernel: eevit_forward.1
= control target key start
LH: loop header
LB: loop body
LE: loop exit
PB: predicated region body
PF: predicated region fallthrough
CT: control target
= control target key end

     0   :  { %v5459_v0 = vmov 0.0   ;;  %vm5460_vm0 = vmmov 0   ;;  %vm108_vm1 = vcmask 523264   ;;  %vm153_vm2 = vcmask 261120   ;;  %s6484_s1 = inlined_call_operand.vmem [shape: bf16[64,32], index: 1, kind: input, shape index: {}]   ;;  %s6485_s0 = inlined_call_operand.vmem [shape: f32[16,64], index: 0, kind: input, shape index: {}]   ;;  %s6486_s3 = inlined_call_operand.vmem [shape: f32[1,32], index: 3, kind: input, shape index: {}]   ;;  %s6487_s4 = inlined_call_operand.vmem [shape: f32[17,32], index: 4, kind: input, shape index: {}]   ;;  %s6488_s2 = inlined_call_operand.vmem [shape: f32[1,32], index: 2, kind: input, shape index: {}]   ;;  %s6489_s7 = inlined_call_operand.vmem [shape: bf16[2,4,32,8], index: 7, kind: input, shape index: {}]   ;;  %s6490_s8 = inlined_call_operand.vmem [shape: bf16[2,4,32,8], index: 8, kind: input, shape index: {}]   ;;  %s6491_s9 = inlined_call_operand.vmem [shape: bf16[2,4,32,8], index: 9, kind: input, shape index: {}]   ;;  %s6492_s5 = inlined_call_operand.vmem [shape: f32[2,1,32], index: 5, kind: input, shape index: {}]   ;;  %s6493_s6 = inlined_call_operand.vmem [shape: f32[2,1,32], index: 6, kind: input, shape index: {}]   ;;  %s6494_s10 = inlined_call_operand.vmem [shape: bf16[2,4,8,32], index: 10, kind: input, shape index: {}]   ;;  %s6495_s11 = inlined_call_operand.vmem [shape: f32[2,1,32], index: 11, kind: input, shape index: {}]   ;;  %s6496_s14 = inlined_call_operand.vmem [shape: bf16[2,32,64], index: 14, kind: input, shape index: {}]   ;;  %s6497_s12 = inlined_call_operand.vmem [shape: f32[2,1,32], index: 12, kind: input, shape index: {}]   ;;  %s6498_s13 = inlined_call_operand.vmem [shape: f32[2,1,32], index: 13, kind: input, shape index: {}]   ;;  %s6499_s16 = inlined_call_operand.vmem [shape: bf16[2,64,32], index: 16, kind: input, shape index: {}]   ;;  %s6500_s15 = inlined_call_operand.vmem [shape: f32[2,1,64], index: 15, kind: input, shape index: {}]   ;;  %s6501_s17 = inlined_call_operand.vmem [shape: f32[2,1,32], index: 17, kind: input, shape index: {}]   ;;  %s6502_s18 = inlined_call_operand.vmem [shape: bf16[32,10], index: 18, kind: input, shape index: {}]   ;;  %s6503_s19 = inlined_call_operand.vmem [shape: f32[1,10], index: 19, kind: input, shape index: {}]   ;;  %s6504_s20 = inlined_call_operand.vmem [shape: f32[1,10], index: 20, kind: output, shape index: {}]  }
   0x1   :  { %6508 = sst [smem:[#allocation3_spill]] %s6484_s1  ;;  %4792 = vmatprep.subr.bf16.mxu0 %v5459_v0  ;;  %4800 = vmatprep.mubr.msk.bf16.mxu0 %vm5460_vm0, %v5459_v0  ;;  %vm160_vm3 = vcmask 253952   ;;  %154 = vst.msk [vmem:[#allocation2] sm:$0xff] %vm153_vm2, %v5459_v0  ;;  %155 = vst.msk [vmem:[#allocation2 + $0x8] sm:$0xff] %vm153_vm2, %v5459_v0  ;;  %v5258_v43 = vld [vmem:[%s6489_s7] sm:$0xff]   ;;  %v5260_v45 = vld [vmem:[%s6489_s7 + $0x8] sm:$0xff]  }
   0x2   :  { %6509 = sst [smem:[#allocation4_spill]] %s6485_s0  ;;  %s6513_s23 = sld [smem:[#allocation3_spill]]  ;;  %156 = vst.msk [vmem:[#allocation2 + $0x10] sm:$0xff] %vm153_vm2, %v5459_v0  ;;  %v5259_v44 = vld [vmem:[%s6489_s7 + $0x20] sm:$0xff]   ;;  %4804 = vmatprep.subr.bf16.mxu1 %v5258_v43  ;;  %v5261_v46 = vld [vmem:[%s6489_s7 + $0x28] sm:$0xff]   ;;  %v5262_v47 = vld [vmem:[%s6489_s7 + $0x10] sm:$0xff]  }
   0x3   :  { %6510 = sst [smem:[#allocation5_spill]] %s6486_s3  ;;  %s6514_s29 = sld [smem:[#allocation4_spill]]  ;;  %4805 = vmatpush3.bf16.msra.mxu1 %v5258_v43  ;;  %v5263_v48 = vld [vmem:[%s6490_s8] sm:$0xff]   ;;  %vm1027_vm4 = vcmask 64512   ;;  %vm1447_vm5 = vcmask 1043456   ;;  %vm1292_vm7 = vcmask 195584  }
   0x4   :  { %6511 = sst [smem:[#allocation6_spill]] %s6487_s4  ;;  %s6515_s22 = sld [smem:[#allocation5_spill]]  ;;  %4806 = vmatprep.subr.bf16.mxu1 %v5260_v45  ;;  %v4328_v60 = vld [vmem:[%s6492_s5] ss:$0 sm:$0xff]  ;;  %vm4305_vm8 = vcmask 73728  }
   0x5   :  { %6512 = sst [smem:[#allocation7_spill]] %s6488_s2  ;;  %s6516_s3 = sld [smem:[#allocation6_spill]] }
   0x6   :  { %s6517_s26 = sld [smem:[#allocation7_spill]] }
   0x7   :  { %4807 = vmatpush3.bf16.msra.mxu1 %v5260_v45 }
   0x8   :  { %v5254_v1 = vld [vmem:[%s6513_s23] sm:$0xff]   ;;  %v5255_v2 = vld [vmem:[%s6513_s23 + $0x8] sm:$0xff]   ;;  %v5256_v3 = vld [vmem:[%s6513_s23 + $0x10] sm:$0xff]   ;;  %4812 = vmatprep.subr.bf16.mxu1 %v5262_v47 }
   0x9   :  { %4793 = vmatpush3.bf16.msra.mxu0 %v5254_v1  ;;  %v5257_v4 = vld [vmem:[%s6513_s23 + $0x18] sm:$0xff]   ;;  %v66_v5 = vld [vmem:[%s6514_s29] sm:$0xff]  ;;  %v67_v6 = vld [vmem:[%s6514_s29 + $0x8] sm:$0xff] }
   0xa   :  { %4794 = vmatprep.subr.bf16.mxu0 %v5459_v0  ;;  %v68_v7 = vpack.c.bf16 %v67_v6, %v66_v5  ;;  %v157_v8 = vld [vmem:[%s6515_s22] sm:$0x1] }
   0xb   :  { %v158_v9 = vld [vmem:[%s6516_s3] sm:$0x1]  ;;  %v162_v13 = vld [vmem:[%s6516_s3 + $0x1] sm:$0xff]  ;;  %v163_v17 = vld [vmem:[%s6516_s3 + $0x9] sm:$0xff] }
   0xc   :  { %v159_v10 = vadd.f32 %v158_v9, %v157_v8  ;;  %v4322_v11 = vld [vmem:[%s6517_s26] ss:$0 sm:$0xff] }
   0xd   :  { %4795 = vmatpush3.bf16.msra.mxu0 %v5255_v2 }
   0xe   :  { %4796 = vmatprep.subr.bf16.mxu0 %v5459_v0  ;;  %161 = vst.msk [vmem:[#allocation2] sm:$0x1] %vm160_vm3, %v159_v10 }
  0x11   :  { %4797 = vmatpush3.bf16.msra.mxu0 %v5256_v3  ;;  %v4329_v3 = vld [vmem:[%s6493_s6] ss:$0 sm:$0xff] }
  0x12   :  { %4798 = vmatprep.subr.bf16.mxu0 %v5459_v0 }
  0x15   :  { %4799 = vmatpush3.bf16.msra.mxu0 %v5257_v4 }
  0x16   :  { %4820 = vmatprep.subr.bf16.mxu0 %v5259_v44 }
  0x18   :  { %4801 = vmatmul.mubr.msk.bf16.vlgmr.msra.gmra.mrb[0].mxu0 %vm108_vm1, %v68_v7 }
  0x19   :  { %4821 = vmatpush3.bf16.msra.mxu0 %v5259_v44 }
  0x1a   :  { %4822 = vmatprep.subr.bf16.mxu0 %v5261_v46 }
  0x1d   :  { %4823 = vmatpush3.bf16.msra.mxu0 %v5261_v46 }
  0x1e   :  { %4836 = vmatprep.subr.bf16.mxu0 %v5263_v48 }
  0xeb   :  { %v146_v12 = vpop.f32.mrb[0].mxu0 }
  0xec   :  { %v147_v14 = vadd.f32 %v4322_v11, %v146_v12  ;;  %v4802_v15 = vpop.f32.mrb[1].mxu0  ;;  %v5265_v12 = vld [vmem:[%s6490_s8 + $0x8] sm:$0xff]  }
  0xed   :  { %v149_v16 = vpop.f32.mrb[2].mxu0  ;;  %v5268_v15 = vld [vmem:[%s6489_s7 + $0x38] sm:$0xff]  }
  0xee   :  { %v164_v18 = vadd.f32 %v162_v13, %v147_v14  ;;  %v150_v19 = vadd.f32 %v4322_v11, %v149_v16  ;;  %v4803_v20 = vpop.f32.mrb[3].mxu0  ;;  %v5264_v11 = vld [vmem:[%s6489_s7 + $0x18] sm:$0xff]   ;;  %v5266_v13 = vld [vmem:[%s6489_s7 + $0x30] sm:$0xff]   ;;  %v5267_v14 = vld [vmem:[%s6490_s8 + $0x20] sm:$0xff]  }
  0xef   :  { %v5269_v16 = vld [vmem:[%s6490_s8 + $0x28] sm:$0xff]  }
  0xf0   :  { %166 = vst.msk [vmem:[#allocation2 + $0x1] sm:$0xff] %vm153_vm2, %v164_v18  ;;  %v165_v21 = vadd.f32 %v163_v17, %v150_v19  ;;  %v5270_v17 = vld [vmem:[%s6490_s8 + $0x10] sm:$0xff]   ;;  %v5271_v18 = vld [vmem:[%s6491_s9] sm:$0xff]   ;;  %v5272_v19 = vld [vmem:[%s6490_s8 + $0x18] sm:$0xff]  }
  0xf1   :  { %v5273_v20 = vld [vmem:[%s6491_s9 + $0x8] sm:$0xff]  }
  0xf2   :  { %167 = vst.msk [vmem:[#allocation2 + $0x9] sm:$0xff] %vm153_vm2, %v165_v21  ;;  %v5274_v21 = vld [vmem:[%s6490_s8 + $0x30] sm:$0xff]  }
  0xf7   :  { %v168_v22 = vld [vmem:[#allocation2] sm:$0xff] }
  0xf8   :  { %v177_v23 = vsel %vm153_vm2, %v168_v22, 0.0 }
  0xf9   :  { %178 = vadd.xlane.f32.xlu0 %v177_v23  ;;  %v170_v24 = vld [vmem:[#allocation2 + $0x10] sm:$0xff]  ;;  %v169_v25 = vld [vmem:[#allocation2 + $0x8] sm:$0xff]  ;;  %v5276_v23 = vld [vmem:[%s6490_s8 + $0x38] sm:$0xff]  }
  0xfa   :  { %v183_v26 = vsel %vm153_vm2, %v170_v24, 0.0  ;;  %v180_v27 = vsel %vm153_vm2, %v169_v25, 0.0 }
  0xfb   :  { %184 = vadd.xlane.f32.xlu1 %v183_v26  ;;  %v5279_v26 = vld [vmem:[%s6491_s9 + $0x18] sm:$0xff]  }
  0xfd   :  { %181 = vadd.xlane.f32.xlu0 %v180_v27  ;;  %v5280_v27 = vld [vmem:[%s6491_s9 + $0x30] sm:$0xff]  }
 0x186   :  { %v179_v28 = vpop.xlane.xlu0 %178 }
 0x187   :  { %v187_v29 = vmul.f32 0.03125, %v179_v28  ;;  %v5281_v28 = vld [vmem:[%s6491_s9 + $0x38] sm:$0xff]  }
 0x188   :  { %v185_v30 = vpop.xlane.xlu1 %184 }
 0x189   :  { %v190_v31 = vsub.f32 %v168_v22, %v187_v29  ;;  %v189_v32 = vmul.f32 0.03125, %v185_v30  ;;  %v5275_v22 = vld [vmem:[%s6491_s9 + $0x20] sm:$0xff]  }
 0x18a   :  { %v182_v33 = vpop.xlane.xlu0 %181 }
 0x18b   :  { %v192_v34 = vsub.f32 %v170_v24, %v189_v32  ;;  %v188_v35 = vmul.f32 0.03125, %v182_v33  ;;  %v193_v36 = vmul.f32 %v190_v31, %v190_v31  ;;  %v5277_v24 = vld [vmem:[%s6491_s9 + $0x28] sm:$0xff]  }
 0x18d   :  { %v191_v37 = vsub.f32 %v169_v25, %v188_v35  ;;  %v196_v38 = vsel %vm153_vm2, %v193_v36, 0.0  ;;  %v195_v39 = vmul.f32 %v192_v34, %v192_v34  ;;  %v5278_v25 = vld [vmem:[%s6491_s9 + $0x10] sm:$0xff]  }
 0x18e   :  { %197 = vadd.xlane.f32.xlu1 %v196_v38 }
 0x18f   :  { %v194_v40 = vmul.f32 %v191_v37, %v191_v37  ;;  %v202_v41 = vsel %vm153_vm2, %v195_v39, 0.0 }
 0x191   :  { %v199_v42 = vsel %vm153_vm2, %v194_v40, 0.0 }
 0x192   :  { %203 = vadd.xlane.f32.xlu1 %v202_v41  ;;  %200 = vadd.xlane.f32.xlu0 %v199_v42 }
 0x21b   :  { %v198_v49 = vpop.xlane.xlu1 %197 }
 0x21c   :  { %v205_v50 = vmul.f32 0.03125, %v198_v49 }
 0x21e   :  { %v208_v51 = vadd.f32 1e-05, %v205_v50 }
 0x21f   :  { %v204_v52 = vpop.xlane.xlu1 %203  ;;  %v201_v53 = vpop.xlane.xlu0 %200 }
 0x220   :  { %5320 = vrsqrt.f32 %v208_v51  ;;  %v207_v54 = vmul.f32 0.03125, %v204_v52  ;;  %v206_v55 = vmul.f32 0.03125, %v201_v53 }
 0x222   :  { %v210_v56 = vadd.f32 1e-05, %v207_v54  ;;  %v209_v57 = vadd.f32 1e-05, %v206_v55 }
 0x224   :  { %5322 = vrsqrt.f32 %v210_v56 }
 0x225   :  { %5324 = vrsqrt.f32 %v209_v57 }
 0x22a   :  { %v5321_v58 = vpop.eup %5320 }
 0x22b   :  { %v214_v59 = vmul.f32 %v5321_v58, %v190_v31 }
 0x22d   :  { %v223_v1 = vmul.f32 %v4328_v60, %v214_v59 }
 0x22e   :  { %v5323_v61 = vpop.eup %5322 }
 0x22f   :  { %v5325_v62 = vpop.eup %5324  ;;  %v216_v63 = vmul.f32 %v5323_v61, %v192_v34  ;;  %v232_v7 = vadd.f32 %v4329_v3, %v223_v1 }
 0x230   :  { %v215_v2 = vmul.f32 %v5325_v62, %v191_v37 }
 0x231   :  { %v225_v4 = vmul.f32 %v4328_v60, %v216_v63 }
 0x232   :  { %v224_v5 = vmul.f32 %v4328_v60, %v215_v2 }
 0x233   :  { %v234_v6 = vadd.f32 %v4329_v3, %v225_v4 }
 0x234   :  { %v233_v8 = vadd.f32 %v4329_v3, %v224_v5 }
 0x235   :  { %v5644_v9 = vpack.c.bf16 %v234_v6, %v234_v6 }
 0x236   :  { %v5646_v10 = vpack.c.bf16 %v233_v8, %v232_v7 }
 0x238   :  { %4808 = vmatprep.mubr.msk.bf16.mxu1 %vm153_vm2, %v5646_v10  ;;  %4824 = vmatprep.mubr.msk.bf16.mxu0 %vm153_vm2, %v5646_v10 }
 0x239   :  { %4809 = vmatmul.mubr.msk.bf16.vlgmr.msra.gmra.mrb[0].mxu1 %vm153_vm2, %v5644_v9  ;;  %4825 = vmatmul.mubr.msk.bf16.vlgmr.msra.gmra.mrb[4].mxu0 %vm153_vm2, %v5644_v9 }
 0x23a   :  { %4813 = vmatpush3.bf16.msra.mxu1 %v5262_v47  ;;  %4816 = vmatprep.mubr.msk.bf16.mxu1 %vm153_vm2, %v5646_v10 }
 0x23b   :  { %4837 = vmatpush3.bf16.msra.mxu0 %v5263_v48  ;;  %4840 = vmatprep.mubr.msk.bf16.mxu0 %vm153_vm2, %v5646_v10 }
 0x23c   :  { %4814 = vmatprep.subr.bf16.mxu1 %v5264_v11  ;;  %4838 = vmatprep.subr.bf16.mxu0 %v5265_v12 }
 0x23e   :  { %4815 = vmatpush3.bf16.msra.mxu1 %v5264_v11 }
 0x23f   :  { %4839 = vmatpush3.bf16.msra.mxu0 %v5265_v12  ;;  %4828 = vmatprep.subr.bf16.mxu1 %v5266_v13 }
 0x240   :  { %4852 = vmatprep.subr.bf16.mxu0 %v5267_v14 }
 0x241   :  { %4817 = vmatmul.mubr.msk.bf16.vlgmr.msra.gmra.mrb[4].mxu1 %vm153_vm2, %v5644_v9 }
 0x242   :  { %4829 = vmatpush3.bf16.msra.mxu1 %v5266_v13  ;;  %4841 = vmatmul.mubr.msk.bf16.vlgmr.msra.gmra.mrb[8].mxu0 %vm153_vm2, %v5644_v9 }
 0x243   :  { %4832 = vmatprep.mubr.msk.bf16.mxu1 %vm153_vm2, %v5646_v10  ;;  %4853 = vmatpush3.bf16.msra.mxu0 %v5267_v14 }
 0x244   :  { %4856 = vmatprep.mubr.msk.bf16.mxu0 %vm153_vm2, %v5646_v10  ;;  %4830 = vmatprep.subr.bf16.mxu1 %v5268_v15 }
 0x245   :  { %4854 = vmatprep.subr.bf16.mxu0 %v5269_v16 }
 0x246   :  { %4831 = vmatpush3.bf16.msra.mxu1 %v5268_v15 }
 0x247   :  { %4855 = vmatpush3.bf16.msra.mxu0 %v5269_v16  ;;  %4844 = vmatprep.subr.bf16.mxu1 %v5270_v17 }
 0x248   :  { %4868 = vmatprep.subr.bf16.mxu0 %v5271_v18 }
 0x249   :  { %4833 = vmatmul.mubr.msk.bf16.vlgmr.msra.gmra.mrb[8].mxu1 %vm153_vm2, %v5644_v9 }
 0x24a   :  { %4845 = vmatpush3.bf16.msra.mxu1 %v5270_v17  ;;  %4857 = vmatmul.mubr.msk.bf16.vlgmr.msra.gmra.mrb[12].mxu0 %vm153_vm2, %v5644_v9 }
 0x24b   :  { %4848 = vmatprep.mubr.msk.bf16.mxu1 %vm153_vm2, %v5646_v10  ;;  %4869 = vmatpush3.bf16.msra.mxu0 %v5271_v18 }
 0x24c   :  { %4872 = vmatprep.mubr.msk.bf16.mxu0 %vm153_vm2, %v5646_v10  ;;  %4846 = vmatprep.subr.bf16.mxu1 %v5272_v19 }
 0x24d   :  { %4870 = vmatprep.subr.bf16.mxu0 %v5273_v20 }
 0x24e   :  { %4847 = vmatpush3.bf16.msra.mxu1 %v5272_v19 }
 0x24f   :  { %4871 = vmatpush3.bf16.msra.mxu0 %v5273_v20  ;;  %4860 = vmatprep.subr.bf16.mxu1 %v5274_v21 }
 0x250   :  { %4884 = vmatprep.subr.bf16.mxu0 %v5275_v22 }
 0x251   :  { %4849 = vmatmul.mubr.msk.bf16.vlgmr.msra.gmra.mrb[12].mxu1 %vm153_vm2, %v5644_v9 }
 0x252   :  { %4873 = vmatmul.mubr.msk.bf16.vlgmr.msra.gmra.mrb[16].mxu0 %vm153_vm2, %v5644_v9  ;;  %4861 = vmatpush3.bf16.msra.mxu1 %v5274_v21 }
 0x253   :  { %4864 = vmatprep.mubr.msk.bf16.mxu1 %vm153_vm2, %v5646_v10  ;;  %4885 = vmatpush3.bf16.msra.mxu0 %v5275_v22 }
 0x254   :  { %4888 = vmatprep.mubr.msk.bf16.mxu0 %vm153_vm2, %v5646_v10  ;;  %4862 = vmatprep.subr.bf16.mxu1 %v5276_v23 }
 0x255   :  { %4886 = vmatprep.subr.bf16.mxu0 %v5277_v24 }
 0x256   :  { %4863 = vmatpush3.bf16.msra.mxu1 %v5276_v23 }
 0x257   :  { %4887 = vmatpush3.bf16.msra.mxu0 %v5277_v24  ;;  %4876 = vmatprep.subr.bf16.mxu1 %v5278_v25 }
 0x259   :  { %4865 = vmatmul.mubr.msk.bf16.vlgmr.msra.gmra.mrb[16].mxu1 %vm153_vm2, %v5644_v9 }
 0x25a   :  { %4889 = vmatmul.mubr.msk.bf16.vlgmr.msra.gmra.mrb[20].mxu0 %vm153_vm2, %v5644_v9  ;;  %4877 = vmatpush3.bf16.msra.mxu1 %v5278_v25 }
 0x25b   :  { %4880 = vmatprep.mubr.msk.bf16.mxu1 %vm153_vm2, %v5646_v10  ;;  %4878 = vmatprep.subr.bf16.mxu1 %v5279_v26 }
 0x25e   :  { %4879 = vmatpush3.bf16.msra.mxu1 %v5279_v26 }
 0x25f   :  { %4892 = vmatprep.subr.bf16.mxu1 %v5280_v27 }
 0x261   :  { %4881 = vmatmul.mubr.msk.bf16.vlgmr.msra.gmra.mrb[20].mxu1 %vm153_vm2, %v5644_v9 }
 0x262   :  { %4893 = vmatpush3.bf16.msra.mxu1 %v5280_v27  ;;  %4896 = vmatprep.mubr.msk.bf16.mxu1 %vm153_vm2, %v5646_v10 }
 0x263   :  { %4894 = vmatprep.subr.bf16.mxu1 %v5281_v28 }
 0x266   :  { %4895 = vmatpush3.bf16.msra.mxu1 %v5281_v28 }
 0x269   :  { %4897 = vmatmul.mubr.msk.bf16.vlgmr.msra.gmra.mrb[24].mxu1 %vm153_vm2, %v5644_v9 }
 0x30c   :  { %v4810_v29 = vpop.f32.mrb[0].mxu1  ;;  %v5750_v30 = vpop.f32.mrb[4].mxu0 }
 0x30d   :  { %v305_v31 = vpop.f32.mrb[1].mxu1  ;;  %v425_v32 = vpop.f32.mrb[5].mxu0  ;;  %v1012_v8 = vpack.c.bf16 %v4810_v29, %v4810_v29 }
 0x30e   :  { %v4811_v33 = vpop.f32.mrb[2].mxu1  ;;  %v4827_v34 = vpop.f32.mrb[6].mxu0 }
 0x30f   :  { %v308_v35 = vpop.f32.mrb[3].mxu1  ;;  %v428_v36 = vpop.f32.mrb[7].mxu0  ;;  %v1016_v33 = vpack.c.bf16 %v5750_v30, %v5750_v30 }
 0x310   :  { %v1011_v37 = vpack.c.bf16 %v308_v35, %v305_v31  ;;  %v1015_v38 = vpack.c.bf16 %v428_v36, %v425_v32 }
 0x312   :  { %4904 = vmatprep.mubr.msk.bf16.mxu0 %vm1027_vm4, %v1011_v37 }
 0x314   :  { %v5753_v39 = vpop.f32.mrb[4].mxu1 }
 0x315   :  { %v4842_v40 = vpop.f32.mrb[8].mxu0  ;;  %v365_v41 = vpop.f32.mrb[5].mxu1  ;;  %v1014_v31 = vpack.c.bf16 %v5753_v39, %v5753_v39 }
 0x316   :  { %v561_v42 = vpop.f32.mrb[9].mxu0  ;;  %v4819_v43 = vpop.f32.mrb[6].mxu1  ;;  %v1020_v49 = vpack.c.bf16 %v4842_v40, %v4842_v40 }
 0x317   :  { %v4843_v44 = vpop.f32.mrb[10].mxu0  ;;  %v368_v45 = vpop.f32.mrb[7].mxu1 }
 0x318   :  { %v1013_v46 = vpack.c.bf16 %v368_v45, %v365_v41  ;;  %v564_v47 = vpop.f32.mrb[11].mxu0  ;;  %v1038_v61 = vsel %vm1027_vm4, %v1020_v49, 0 }
 0x319   :  { %v1019_v48 = vpack.c.bf16 %v564_v47, %v561_v42 }
 0x31a   :  { %4912 = vmatprep.mubr.msk.bf16.mxu1 %vm1027_vm4, %v1013_v46  ;;  %v171_v46 = vlaneseq }
 0x31b   :  { %v1035_v50 = vsel %vm1027_vm4, %v1019_v48, 0  ;;  %5220 = vmatprep.subr.msk.bf16.mxu0 %vm1027_vm4, %v1019_v48 }
 0x31c   :  { %4901 = vmatpush3.bf16.xpose.msra.mxu0 %v1035_v50  ;;  %v5758_v51 = vpop.f32.mrb[8].mxu1  ;;  %v172_v47 = vand.u32 127, %v171_v46 }
 0x31d   :  { %v4858_v52 = vpop.f32.mrb[12].mxu0  ;;  %5221 = vmatprep.subr.msk.bf16.mxu0 %vm1027_vm4, %v1020_v49  ;;  %v5761_v53 = vpop.f32.mrb[9].mxu1  ;;  %v1018_v43 = vpack.c.bf16 %v5758_v51, %v5758_v51 }
 0x31e   :  { %v681_v54 = vpop.f32.mrb[13].mxu0  ;;  %v4835_v55 = vpop.f32.mrb[10].mxu1  ;;  %v1024_v11 = vpack.c.bf16 %v4858_v52, %v4858_v52  ;;  %vm173_vm6 = vcmp.ge.s32.totalorder %v172_v47, 17 }
 0x31f   :  { %v4859_v56 = vpop.f32.mrb[14].mxu0  ;;  %v488_v57 = vpop.f32.mrb[11].mxu1  ;;  %v5804_v48 = vsel %vm173_vm6, -1e+30, %v5459_v0 }
 0x320   :  { %v1017_v58 = vpack.c.bf16 %v488_v57, %v5761_v53  ;;  %v684_v59 = vpop.f32.mrb[15].mxu0  ;;  %v1158_v25 = vsel %vm1027_vm4, %v1024_v11, 0 }
 0x321   :  { %v1023_v60 = vpack.c.bf16 %v684_v59, %v681_v54 }
 0x323   :  { %v1155_v12 = vsel %vm1027_vm4, %v1023_v60, 0 }
 0x324   :  { %4903 = vmatpush3.bf16.xpose.msra.mxu0 %v1038_v61  ;;  %v4850_v62 = vpop.f32.mrb[12].mxu1 }
 0x325   :  { %v4874_v63 = vpop.f32.mrb[16].mxu0  ;;  %5224 = vmatprep.subr.msk.bf16.mxu0 %vm1027_vm4, %v1023_v60  ;;  %v621_v1 = vpop.f32.mrb[13].mxu1  ;;  %v1022_v13 = vpack.c.bf16 %v4850_v62, %v4850_v62 }
 0x326   :  { %v817_v2 = vpop.f32.mrb[17].mxu0  ;;  %v4851_v3 = vpop.f32.mrb[14].mxu1  ;;  %v1434_v35 = vpack.c.bf16 %v4874_v63, %v4874_v63 }
 0x327   :  { %v4875_v4 = vpop.f32.mrb[18].mxu0  ;;  %v624_v5 = vpop.f32.mrb[15].mxu1  ;;  %v1098_v24 = vsel %vm1027_vm4, %v1022_v13, 0 }
 0x328   :  { %v1021_v6 = vpack.c.bf16 %v624_v5, %v621_v1  ;;  %v820_v7 = vpop.f32.mrb[19].mxu0  ;;  %v1449_v39 = vsel %vm1447_vm5, %v1434_v35, 0 }
 0x329   :  { %v1433_v9 = vpack.c.bf16 %v820_v7, %v817_v2 }
 0x32a   :  { %v1095_v10 = vsel %vm1027_vm4, %v1021_v6, 0  ;;  %5222 = vmatprep.subr.msk.bf16.mxu1 %vm1027_vm4, %v1021_v6 }
 0x32b   :  { %4905 = vmatmul.mubr.msk.bf16.vlgmr.msra.gmra.mrb[24].mxu0 %vm1027_vm4, %v1012_v8  ;;  %4909 = vmatpush3.bf16.xpose.msra.mxu1 %v1095_v10 }
 0x32c   :  { %4917 = vmatpush3.bf16.xpose.msra.mxu0 %v1155_v12  ;;  %4920 = vmatprep.mubr.msk.bf16.mxu0 %vm1027_vm4, %v1015_v38  ;;  %v4866_v14 = vpop.f32.mrb[16].mxu1 }
 0x32d   :  { %v5771_v15 = vpop.f32.mrb[20].mxu0  ;;  %5223 = vmatprep.subr.msk.bf16.mxu1 %vm1027_vm4, %v1022_v13  ;;  %5225 = vmatprep.subr.msk.bf16.mxu0 %vm1027_vm4, %v1024_v11  ;;  %v741_v16 = vpop.f32.mrb[17].mxu1  ;;  %v1026_v36 = vpack.c.bf16 %v4866_v14, %v4866_v14 }
 0x32e   :  { %v937_v17 = vpop.f32.mrb[21].mxu0  ;;  %v4867_v18 = vpop.f32.mrb[18].mxu1 }
 0x32f   :  { %v4891_v19 = vpop.f32.mrb[22].mxu0  ;;  %v744_v20 = vpop.f32.mrb[19].mxu1  ;;  %v1218_v42 = vsel %vm1027_vm4, %v1026_v36, 0 }
 0x330   :  { %v1025_v21 = vpack.c.bf16 %v744_v20, %v741_v16  ;;  %v940_v22 = vpop.f32.mrb[23].mxu0 }
 0x331   :  { %v5775_v23 = vpack.c.bf16 %v940_v22, %v937_v17 }
 0x332   :  { %v1215_v34 = vsel %vm1027_vm4, %v1025_v21, 0 }
 0x333   :  { %4911 = vmatpush3.bf16.xpose.msra.mxu1 %v1098_v24 }
 0x334   :  { %4919 = vmatpush3.bf16.xpose.msra.mxu0 %v1158_v25  ;;  %v4882_v26 = vpop.f32.mrb[20].mxu1  ;;  %5226 = vmatprep.subr.msk.bf16.mxu1 %vm1027_vm4, %v1025_v21 }
 0x335   :  { %4932 = vmatprep.subr.bf16.mxu0 %v1433_v9  ;;  %v877_v27 = vpop.f32.mrb[21].mxu1  ;;  %v1436_v44 = vpack.c.bf16 %v4882_v26, %v4882_v26 }
 0x336   :  { %v4883_v28 = vpop.f32.mrb[22].mxu1 }
 0x337   :  { %v880_v29 = vpop.f32.mrb[23].mxu1  ;;  %v1506_v45 = vsel %vm1447_vm5, %v1436_v44, 0 }
 0x338   :  { %v1435_v32 = vpack.c.bf16 %v880_v29, %v877_v27 }
 0x33a   :  { %4913 = vmatmul.mubr.msk.bf16.vlgmr.msra.gmra.mrb[28].mxu1 %vm1027_vm4, %v1014_v31 }
 0x33b   :  { %4921 = vmatmul.mubr.msk.bf16.vlgmr.msra.gmra.mrb[28].mxu0 %vm1027_vm4, %v1016_v33  ;;  %4925 = vmatpush3.bf16.xpose.msra.mxu1 %v1215_v34 }
 0x33c   :  { %4928 = vmatprep.mubr.msk.bf16.mxu1 %vm1027_vm4, %v1017_v58  ;;  %4933 = vmatpush3.bf16.msra.mxu0 %v1433_v9  ;;  %v5788_v37 = vpop.f32.mrb[24].mxu1 }
 0x33d   :  { %5227 = vmatprep.subr.msk.bf16.mxu1 %vm1027_vm4, %v1026_v36  ;;  %5228 = vmatprep.subr.msk.bf16.mxu0 %vm1447_vm5, %v1434_v35  ;;  %v997_v30 = vpop.f32.mrb[25].mxu1 }
 0x33e   :  { %v4899_v38 = vpop.f32.mrb[26].mxu1 }
 0x33f   :  { %v1000_v40 = vpop.f32.mrb[27].mxu1 }
 0x340   :  { %v5793_v41 = vpack.c.bf16 %v1000_v40, %v997_v30  ;;  %4935 = vmatpush3.bf16.msra.mxu0 %v1449_v39 }
 0x341   :  { %4948 = vmatprep.subr.bf16.mxu0 %v5775_v23 }
 0x343   :  { %4927 = vmatpush3.bf16.xpose.msra.mxu1 %v1218_v42 }
 0x344   :  { %4940 = vmatprep.subr.bf16.mxu1 %v1435_v32 }
 0x34a   :  { %4929 = vmatmul.mubr.msk.bf16.vlgmr.msra.gmra.mrb[32].mxu1 %vm1027_vm4, %v1018_v43 }
 0x34b   :  { %4941 = vmatpush3.bf16.msra.mxu1 %v1435_v32 }
 0x34c   :  { %5229 = vmatprep.subr.msk.bf16.mxu1 %vm1447_vm5, %v1436_v44 }
 0x34f   :  { %4943 = vmatpush3.bf16.msra.mxu1 %v1506_v45 }
 0x350   :  { %4956 = vmatprep.subr.bf16.mxu1 %v5793_v41 }
 0x3fe   :  { %v4906_v49 = vpop.f32.mrb[24].mxu0 }
 0x3ff   :  { %v1270_v50 = vmul.f32 0.35355338, %v4906_v49  ;;  %v1074_v51 = vpop.f32.mrb[25].mxu0 }
 0x400   :  { %v1268_v52 = vmul.f32 0.35355338, %v1074_v51  ;;  %v4907_v53 = vpop.f32.mrb[26].mxu0 }
 0x401   :  { %v1077_v54 = vpop.f32.mrb[27].mxu0  ;;  %v1282_v55 = vadd.f32 %v1270_v50, %v5804_v48 }
 0x402   :  { %v1269_v56 = vmul.f32 0.35355338, %v1077_v54  ;;  %v5809_v58 = vadd.f32 %v1268_v52, %v5804_v48 }
 0x403   :  { %v1299_v57 = vsel %vm1292_vm7, %v1282_v55, -inf }
 0x404   :  { %1300 = vmax.xlane.f32.xlu0 %v1299_v57  ;;  %v1281_v59 = vadd.f32 %v1269_v56, %v5804_v48  ;;  %v1293_v61 = vsel %vm1292_vm7, %v5809_v58, -inf }
 0x406   :  { %v1296_v60 = vsel %vm1292_vm7, %v1281_v59, -inf }
 0x407   :  { %1297 = vmax.xlane.f32.xlu1 %v1296_v60 }
 0x408   :  { %1294 = vmax.xlane.f32.xlu0 %v1293_v61 }
 0x40d   :  { %v4914_v62 = vpop.f32.mrb[28].mxu1 }
 0x40e   :  { %v1273_v63 = vmul.f32 0.35355338, %v4914_v62  ;;  %v4922_v1 = vpop.f32.mrb[28].mxu0  ;;  %v1134_v2 = vpop.f32.mrb[29].mxu1 }
 0x40f   :  { %v1271_v3 = vmul.f32 0.35355338, %v1134_v2  ;;  %v1194_v4 = vpop.f32.mrb[29].mxu0  ;;  %v4915_v5 = vpop.f32.mrb[30].mxu1  ;;  %v1276_v17 = vmul.f32 0.35355338, %v4922_v1 }
 0x410   :  { %v1274_v6 = vmul.f32 0.35355338, %v1194_v4  ;;  %v4923_v7 = vpop.f32.mrb[30].mxu0  ;;  %v1137_v8 = vpop.f32.mrb[31].mxu1  ;;  %v1285_v9 = vadd.f32 %v1273_v63, %v5804_v48 }
 0x411   :  { %v1272_v10 = vmul.f32 0.35355338, %v1137_v8  ;;  %v1197_v11 = vpop.f32.mrb[31].mxu0  ;;  %v5819_v16 = vadd.f32 %v1271_v3, %v5804_v48  ;;  %v5833_v24 = vadd.f32 %v1276_v17, %v5804_v48 }
 0x412   :  { %v1275_v12 = vmul.f32 0.35355338, %v1197_v11  ;;  %v1308_v13 = vsel %vm1292_vm7, %v1285_v9, -inf  ;;  %v1286_v14 = vadd.f32 %v1274_v6, %v5804_v48 }
 0x413   :  { %1309 = vmax.xlane.f32.xlu1 %v1308_v13  ;;  %v5823_v19 = vadd.f32 %v1272_v10, %v5804_v48  ;;  %v1302_v20 = vsel %vm1292_vm7, %v5819_v16, -inf  ;;  %v1317_v26 = vsel %vm1292_vm7, %v5833_v24, -inf }
 0x414   :  { %v1311_v18 = vsel %vm1292_vm7, %v1286_v14, -inf  ;;  %v5828_v21 = vadd.f32 %v1275_v12, %v5804_v48 }
 0x415   :  { %1312 = vmax.xlane.f32.xlu0 %v1311_v18  ;;  %v1305_v22 = vsel %vm1292_vm7, %v5823_v19, -inf }
 0x416   :  { %v1314_v25 = vsel %vm1292_vm7, %v5828_v21, -inf }
 0x417   :  { %1303 = vmax.xlane.f32.xlu1 %v1302_v20 }
 0x419   :  { %1306 = vmax.xlane.f32.xlu0 %v1305_v22 }
 0x41b   :  { %1315 = vmax.xlane.f32.xlu1 %v1314_v25 }
 0x41d   :  { %1318 = vmax.xlane.f32.xlu0 %v1317_v26  ;;  %v4930_v27 = vpop.f32.mrb[32].mxu1 }
 0x41e   :  { %v1254_v28 = vpop.f32.mrb[33].mxu1  ;;  %v1279_v29 = vmul.f32 0.35355338, %v4930_v27 }
 0x41f   :  { %v1277_v31 = vmul.f32 0.35355338, %v1254_v28  ;;  %v4931_v32 = vpop.f32.mrb[34].mxu1 }
 0x420   :  { %v1257_v33 = vpop.f32.mrb[35].mxu1  ;;  %v5848_v38 = vadd.f32 %v1279_v29, %v5804_v48 }
 0x421   :  { %v1278_v34 = vmul.f32 0.35355338, %v1257_v33  ;;  %v5840_v35 = vadd.f32 %v1277_v31, %v5804_v48 }
 0x422   :  { %v1326_v40 = vsel %vm1292_vm7, %v5848_v38, -inf }
 0x423   :  { %v1320_v36 = vsel %vm1292_vm7, %v5840_v35, -inf  ;;  %v5845_v30 = vadd.f32 %v1278_v34, %v5804_v48 }
 0x424   :  { %1321 = vmax.xlane.f32.xlu1 %v1320_v36 }
 0x425   :  { %v1323_v39 = vsel %vm1292_vm7, %v5845_v30, -inf }
 0x426   :  { %1324 = vmax.xlane.f32.xlu0 %v1323_v39 }
 0x428   :  { %1327 = vmax.xlane.f32.xlu1 %v1326_v40 }
 0x491   :  { %v1301_v42 = vpop.xlane.xlu0 %1300 }
 0x492   :  { %v1331_v43 = vsub.f32 %v1282_v55, %v1301_v42 }
 0x494   :  { %v1345_v44 = vmul.f32 1.442695, %v1331_v43  ;;  %v1298_v45 = vpop.xlane.xlu1 %1297 }
 0x495   :  { %v1330_v46 = vsub.f32 %v1281_v59, %v1298_v45  ;;  %v1295_v47 = vpop.xlane.xlu0 %1294 }
 0x496   :  { %5326 = vpow2.f32 %v1345_v44  ;;  %v1329_v49 = vsub.f32 %v5809_v58, %v1295_v47 }
 0x497   :  { %v1343_v50 = vmul.f32 1.442695, %v1330_v46 }
 0x498   :  { %v1341_v51 = vmul.f32 1.442695, %v1329_v49 }
 0x499   :  { %5328 = vpow2.f32 %v1343_v50 }
 0x49a   :  { %5330 = vpow2.f32 %v1341_v51 }
 0x4a0   :  { %v5855_v52 = vpop.eup %5326  ;;  %v1310_v53 = vpop.xlane.xlu1 %1309 }
 0x4a1   :  { %v1334_v54 = vsub.f32 %v1285_v9, %v1310_v53  ;;  %v1371_v56 = vsel %vm1292_vm7, %v5855_v52, 0.0 }
 0x4a2   :  { %1372 = vadd.xlane.f32.xlu0 %v1371_v56  ;;  %v1313_v55 = vpop.xlane.xlu0 %1312 }
 0x4a3   :  { %v5859_v57 = vpop.eup %5328  ;;  %v1351_v59 = vmul.f32 1.442695, %v1334_v54  ;;  %v1335_v60 = vsub.f32 %v1286_v14, %v1313_v55 }
 0x4a4   :  { %v5861_v61 = vpop.eup %5330  ;;  %v1304_v58 = vpop.xlane.xlu1 %1303  ;;  %v1368_v62 = vsel %vm1292_vm7, %v5859_v57, 0.0 }
 0x4a5   :  { %5332 = vpow2.f32 %v1351_v59  ;;  %v1353_v63 = vmul.f32 1.442695, %v1335_v60  ;;  %v1332_v1 = vsub.f32 %v5819_v16, %v1304_v58  ;;  %1369 = vadd.xlane.f32.xlu1 %v1368_v62  ;;  %v1365_v2 = vsel %vm1292_vm7, %v5861_v61, 0.0 }
 0x4a6   :  { %1366 = vadd.xlane.f32.xlu0 %v1365_v2  ;;  %v1307_v3 = vpop.xlane.xlu0 %1306  ;;  %v1438_v62 = vpack.c.bf16 %v5771_v15, %v5771_v15 }
 0x4a7   :  { %5334 = vpow2.f32 %v1353_v63  ;;  %v1347_v4 = vmul.f32 1.442695, %v1332_v1  ;;  %v1333_v5 = vsub.f32 %v5823_v19, %v1307_v3 }
 0x4a8   :  { %v1316_v6 = vpop.xlane.xlu1 %1315 }
 0x4a9   :  { %5336 = vpow2.f32 %v1347_v4  ;;  %v1349_v7 = vmul.f32 1.442695, %v1333_v5  ;;  %v1336_v8 = vsub.f32 %v5828_v21, %v1316_v6 }
 0x4aa   :  { %v1319_v9 = vpop.xlane.xlu0 %1318 }
 0x4ab   :  { %5338 = vpow2.f32 %v1349_v7  ;;  %v1355_v10 = vmul.f32 1.442695, %v1336_v8  ;;  %v1337_v11 = vsub.f32 %v5833_v24, %v1319_v9 }
 0x4ad   :  { %5340 = vpow2.f32 %v1355_v10  ;;  %v1357_v12 = vmul.f32 1.442695, %v1337_v11 }
 0x4af   :  { %v5871_v13 = vpop.eup %5332  ;;  %5342 = vpow2.f32 %v1357_v12 }
 0x4b0   :  { %v1380_v14 = vsel %vm1292_vm7, %v5871_v13, 0.0 }
 0x4b1   :  { %v5875_v16 = vpop.eup %5334  ;;  %1381 = vadd.xlane.f32.xlu1 %v1380_v14  ;;  %v1322_v17 = vpop.xlane.xlu1 %1321 }
 0x4b2   :  { %v1338_v18 = vsub.f32 %v5840_v35, %v1322_v17  ;;  %v1383_v19 = vsel %vm1292_vm7, %v5875_v16, 0.0 }
 0x4b3   :  { %v5880_v20 = vpop.eup %5336  ;;  %1384 = vadd.xlane.f32.xlu0 %v1383_v19  ;;  %v1325_v21 = vpop.xlane.xlu0 %1324  ;;  %v1440_v19 = vpack.c.bf16 %v5788_v37, %v5788_v37 }
 0x4b4   :  { %v1359_v22 = vmul.f32 1.442695, %v1338_v18  ;;  %v1339_v24 = vsub.f32 %v5845_v30, %v1325_v21  ;;  %v1374_v25 = vsel %vm1292_vm7, %v5880_v20, 0.0 }
 0x4b5   :  { %v5885_v26 = vpop.eup %5338  ;;  %1375 = vadd.xlane.f32.xlu1 %v1374_v25  ;;  %v1328_v27 = vpop.xlane.xlu1 %1327 }
 0x4b6   :  { %5344 = vpow2.f32 %v1359_v22  ;;  %v1361_v28 = vmul.f32 1.442695, %v1339_v24  ;;  %v1340_v29 = vsub.f32 %v5848_v38, %v1328_v27  ;;  %v1377_v31 = vsel %vm1292_vm7, %v5885_v26, 0.0 }
 0x4b7   :  { %v5890_v32 = vpop.eup %5340  ;;  %1378 = vadd.xlane.f32.xlu0 %v1377_v31  ;;  %v1679_v31 = vld [vmem:[%s6494_s10 + $0x4] sm:$0xf] }
 0x4b8   :  { %5346 = vpow2.f32 %v1361_v28  ;;  %v1363_v33 = vmul.f32 1.442695, %v1340_v29  ;;  %v1386_v34 = vsel %vm1292_vm7, %v5890_v32, 0.0  ;;  %v1678_v28 = vld [vmem:[%s6494_s10] sm:$0xf] }
 0x4b9   :  { %v5894_v35 = vpop.eup %5342  ;;  %1387 = vadd.xlane.f32.xlu1 %v1386_v34  ;;  %v1689_v29 = vsel %vm1447_vm5, %v1678_v28, 0  ;;  %v1681_v34 = vld [vmem:[%s6494_s10 + $0xc] sm:$0xf] }
 0x4ba   :  { %5348 = vpow2.f32 %v1363_v33  ;;  %v1389_v36 = vsel %vm1292_vm7, %v5894_v35, 0.0  ;;  %v1680_v33 = vld [vmem:[%s6494_s10 + $0x8] sm:$0xf] }
 0x4bb   :  { %1390 = vadd.xlane.f32.xlu0 %v1389_v36 }
 0x4c0   :  { %v5898_v30 = vpop.eup %5344 }
 0x4c1   :  { %v1392_v38 = vsel %vm1292_vm7, %v5898_v30, 0.0 }
 0x4c2   :  { %v5902_v39 = vpop.eup %5346  ;;  %1393 = vadd.xlane.f32.xlu1 %v1392_v38 }
 0x4c3   :  { %v1395_v40 = vsel %vm1292_vm7, %v5902_v39, 0.0 }
 0x4c4   :  { %v5906_v42 = vpop.eup %5348  ;;  %1396 = vadd.xlane.f32.xlu0 %v1395_v40 }
 0x4c5   :  { %v1398_v43 = vsel %vm1292_vm7, %v5906_v42, 0.0 }
 0x4c6   :  { %1399 = vadd.xlane.f32.xlu1 %v1398_v43 }
 0x52f   :  { %v1373_v44 = vpop.xlane.xlu0 %1372 }
 0x530   :  { %5350 = vrcp.f32 %v1373_v44 }
 0x532   :  { %v1370_v45 = vpop.xlane.xlu1 %1369 }
 0x533   :  { %5352 = vrcp.f32 %v1370_v45  ;;  %v1367_v46 = vpop.xlane.xlu0 %1366 }
 0x534   :  { %5354 = vrcp.f32 %v1367_v46 }
 0x53a   :  { %v5351_v47 = vpop.eup %5350 }
 0x53b   :  { %v1415_v51 = vmul.f32 %v5351_v47, %v5855_v52 }
 0x53d   :  { %v5353_v49 = vpop.eup %5352  ;;  %v1426_v58 = vpack.c.bf16 %v1415_v51, %v1415_v51 }
 0x53e   :  { %v5355_v50 = vpop.eup %5354  ;;  %v1382_v53 = vpop.xlane.xlu1 %1381  ;;  %v1414_v54 = vmul.f32 %v5353_v49, %v5859_v57  ;;  %v1563_v57 = vsel %vm1447_vm5, %v1438_v62, 0 }
 0x53f   :  { %v1413_v56 = vmul.f32 %v5355_v50, %v5861_v61  ;;  %5356 = vrcp.f32 %v1382_v53 }
 0x540   :  { %v1385_v55 = vpop.xlane.xlu0 %1384 }
 0x541   :  { %v1425_v59 = vpack.c.bf16 %v1414_v54, %v1413_v56  ;;  %v1860_v54 = vsel %vm1447_vm5, %v1681_v34, 0 }
 0x542   :  { %v1376_v60 = vpop.xlane.xlu1 %1375 }
 0x543   :  { %4936 = vmatprep.mubr.msk.bf16.mxu0 %vm1292_vm7, %v1425_v59  ;;  %5358 = vrcp.f32 %v1376_v60 }
 0x544   :  { %5360 = vrcp.f32 %v1385_v55  ;;  %v1379_v63 = vpop.xlane.xlu0 %1378  ;;  %4937 = vmatmul.mubr.msk.bf16.vlgmr.msra.gmra.mrb[32].mxu0 %vm1292_vm7, %v1426_v58 }
 0x545   :  { %5362 = vrcp.f32 %v1379_v63  ;;  %4949 = vmatpush3.bf16.msra.mxu0 %v5775_v23 }
 0x546   :  { %5230 = vmatprep.subr.msk.bf16.mxu0 %vm1447_vm5, %v1438_v62  ;;  %v1388_v52 = vpop.xlane.xlu1 %1387 }
 0x547   :  { %5364 = vrcp.f32 %v1388_v52 }
 0x548   :  { %v1391_v61 = vpop.xlane.xlu0 %1390 }
 0x549   :  { %5366 = vrcp.f32 %v1391_v61  ;;  %4951 = vmatpush3.bf16.msra.mxu0 %v1563_v57  ;;  %v5357_v1 = vpop.eup %5356 }
 0x54a   :  { %v1418_v5 = vmul.f32 %v5357_v1, %v5871_v13  ;;  %5232 = vmatprep.subr.msk.bf16.mxu0 %vm1447_vm5, %v1678_v28 }
 0x54c   :  { %v1428_v17 = vpack.c.bf16 %v1418_v5, %v1418_v5 }
 0x54d   :  { %v5359_v2 = vpop.eup %5358 }
 0x54e   :  { %v5361_v3 = vpop.eup %5360  ;;  %v1416_v15 = vmul.f32 %v5359_v2, %v5880_v20  ;;  %v1620_v20 = vsel %vm1447_vm5, %v1440_v19, 0 }
 0x54f   :  { %v5363_v4 = vpop.eup %5362  ;;  %v1394_v6 = vpop.xlane.xlu1 %1393  ;;  %v1419_v10 = vmul.f32 %v5361_v3, %v5875_v16 }
 0x550   :  { %5368 = vrcp.f32 %v1394_v6  ;;  %v1417_v23 = vmul.f32 %v5363_v4, %v5885_v26 }
 0x551   :  { %v5365_v7 = vpop.eup %5364  ;;  %v1397_v8 = vpop.xlane.xlu0 %1396 }
 0x552   :  { %5370 = vrcp.f32 %v1397_v8  ;;  %v1427_v9 = vpack.c.bf16 %v1417_v23, %v1416_v15  ;;  %v1420_v11 = vmul.f32 %v5365_v7, %v5890_v32  ;;  %v1746_v32 = vsel %vm1447_vm5, %v1679_v31, 0 }
 0x553   :  { %v5367_v12 = vpop.eup %5366  ;;  %v1400_v14 = vpop.xlane.xlu1 %1399 }
 0x554   :  { %v1421_v18 = vmul.f32 %v5367_v12, %v5894_v35  ;;  %4944 = vmatprep.mubr.msk.bf16.mxu1 %vm1292_vm7, %v1427_v9  ;;  %5372 = vrcp.f32 %v1400_v14  ;;  %v1429_v13 = vpack.c.bf16 %v1420_v11, %v1419_v10 }
 0x555   :  { %4945 = vmatmul.mubr.msk.bf16.vlgmr.msra.gmra.mrb[36].mxu1 %vm1292_vm7, %v1428_v17 }
 0x556   :  { %4957 = vmatpush3.bf16.msra.mxu1 %v5793_v41  ;;  %4952 = vmatprep.mubr.msk.bf16.mxu0 %vm1292_vm7, %v1429_v13  ;;  %v1430_v16 = vpack.c.bf16 %v1421_v18, %v1421_v18 }
 0x557   :  { %5231 = vmatprep.subr.msk.bf16.mxu1 %vm1447_vm5, %v1440_v19 }
 0x558   :  { %4953 = vmatmul.mubr.msk.bf16.vlgmr.msra.gmra.mrb[36].mxu0 %vm1292_vm7, %v1430_v16 }
 0x559   :  { %4965 = vmatpush3.bf16.msra.mxu0 %v1689_v29 }
 0x55a   :  { %v5369_v21 = vpop.eup %5368  ;;  %4959 = vmatpush3.bf16.msra.mxu1 %v1620_v20  ;;  %5234 = vmatprep.subr.msk.bf16.mxu0 %vm1447_vm5, %v1680_v33 }
 0x55b   :  { %v1422_v24 = vmul.f32 %v5369_v21, %v5898_v30  ;;  %5233 = vmatprep.subr.msk.bf16.mxu1 %vm1447_vm5, %v1679_v31 }
 0x55c   :  { %v5371_v22 = vpop.eup %5370 }
 0x55d   :  { %v1423_v37 = vmul.f32 %v5371_v22, %v5902_v39 }
 0x55e   :  { %v5373_v25 = vpop.eup %5372 }
 0x55f   :  { %v1424_v26 = vmul.f32 %v5373_v25, %v5906_v42  ;;  %v1431_v41 = vpack.c.bf16 %v1423_v37, %v1422_v24  ;;  %v1803_v42 = vsel %vm1447_vm5, %v1680_v33, 0 }
 0x561   :  { %4960 = vmatprep.mubr.msk.bf16.mxu1 %vm1292_vm7, %v1431_v41  ;;  %v1432_v27 = vpack.c.bf16 %v1424_v26, %v1424_v26 }
 0x563   :  { %4961 = vmatmul.mubr.msk.bf16.vlgmr.msra.gmra.mrb[40].mxu1 %vm1292_vm7, %v1432_v27 }
 0x564   :  { %4971 = vmatpush3.bf16.msra.mxu1 %v1746_v32 }
 0x565   :  { %5235 = vmatprep.subr.msk.bf16.mxu1 %vm1447_vm5, %v1681_v34 }
 0x617   :  { %v4938_v35 = vpop.f32.mrb[32].mxu0 }
 0x618   :  { %v1485_v36 = vpop.f32.mrb[33].mxu0  ;;  %v1671_v40 = vpack.c.bf16 %v4938_v35, %v4938_v35  ;;  %v4402_v35 = vld [vmem:[%s6495_s11] ss:$0 sm:$0xff] }
 0x619   :  { %v4939_v30 = vpop.f32.mrb[34].mxu0 }
 0x61a   :  { %v1488_v38 = vpop.f32.mrb[35].mxu0 }
 0x61b   :  { %v1670_v39 = vpack.c.bf16 %v1488_v38, %v1485_v36  ;;  %v5456_v36 = vld [vmem:[#allocation2 + $0x10] sm:$0xff]  ;;  %v5457_v38 = vld [vmem:[#allocation2] sm:$0xff] }
 0x61d   :  { %4966 = vmatprep.mubr.msk.bf16.mxu0 %vm1027_vm4, %v1670_v39 }
 0x61e   :  { %4967 = vmatmul.mubr.msk.bf16.vlgmr.msra.gmra.mrb[40].mxu0 %vm1027_vm4, %v1671_v40 }
 0x61f   :  { %4977 = vmatpush3.bf16.msra.mxu0 %v1803_v42  ;;  %v5458_v42 = vld [vmem:[#allocation2 + $0x8] sm:$0xff] }
 0x628   :  { %v4946_v43 = vpop.f32.mrb[36].mxu1 }
 0x629   :  { %v1542_v44 = vpop.f32.mrb[37].mxu1  ;;  %v1673_v51 = vpack.c.bf16 %v4946_v43, %v4946_v43 }
 0x62a   :  { %v4947_v45 = vpop.f32.mrb[38].mxu1 }
 0x62b   :  { %v1545_v46 = vpop.f32.mrb[39].mxu1  ;;  %v4954_v47 = vpop.f32.mrb[36].mxu0 }
 0x62c   :  { %v1672_v49 = vpack.c.bf16 %v1545_v46, %v1542_v44  ;;  %v1599_v50 = vpop.f32.mrb[37].mxu0  ;;  %v1675_v59 = vpack.c.bf16 %v4954_v47, %v4954_v47 }
 0x62d   :  { %v4955_v53 = vpop.f32.mrb[38].mxu0 }
 0x62e   :  { %v1602_v56 = vpop.f32.mrb[39].mxu0  ;;  %4972 = vmatprep.mubr.msk.bf16.mxu1 %vm1027_vm4, %v1672_v49 }
 0x62f   :  { %v1674_v55 = vpack.c.bf16 %v1602_v56, %v1599_v50  ;;  %4973 = vmatmul.mubr.msk.bf16.vlgmr.msra.gmra.mrb[44].mxu1 %vm1027_vm4, %v1673_v51 }
 0x630   :  { %4983 = vmatpush3.bf16.msra.mxu1 %v1860_v54 }
 0x631   :  { %4978 = vmatprep.mubr.msk.bf16.mxu0 %vm1027_vm4, %v1674_v55 }
 0x632   :  { %4979 = vmatmul.mubr.msk.bf16.vlgmr.msra.gmra.mrb[44].mxu0 %vm1027_vm4, %v1675_v59 }
 0x636   :  { %v4962_v60 = vpop.f32.mrb[40].mxu1 }
 0x637   :  { %v1656_v58 = vpop.f32.mrb[41].mxu1  ;;  %v1677_v57 = vpack.c.bf16 %v4962_v60, %v4962_v60 }
 0x638   :  { %v4963_v62 = vpop.f32.mrb[42].mxu1 }
 0x639   :  { %v1659_v63 = vpop.f32.mrb[43].mxu1 }
 0x63a   :  { %v1676_v52 = vpack.c.bf16 %v1659_v63, %v1656_v58 }
 0x63c   :  { %4984 = vmatprep.mubr.msk.bf16.mxu1 %vm1027_vm4, %v1676_v52 }
 0x63d   :  { %4985 = vmatmul.mubr.msk.bf16.vlgmr.msra.gmra.mrb[48].mxu1 %vm1027_vm4, %v1677_v57 }
 0x6f1   :  { %v4968_v61 = vpop.f32.mrb[40].mxu0 }
 0x6f2   :  { %v1725_v1 = vpop.f32.mrb[41].mxu0  ;;  %v1924_v4 = vsel %vm153_vm2, %v4968_v61, 0.0 }
 0x6f3   :  { %v4969_v2 = vpop.f32.mrb[42].mxu0  ;;  %v1910_v23 = vsel %vm153_vm2, %v1725_v1, 0.0 }
 0x6f4   :  { %v1728_v3 = vpop.f32.mrb[43].mxu0 }
 0x6f5   :  { %v1917_v14 = vsel %vm153_vm2, %v1728_v3, 0.0  ;;  %v5282_v3 = vld [vmem:[%s6496_s14] sm:$0xff]  }
 0x6f6   :  { %4988 = vmatprep.subr.bf16.mxu0 %v5282_v3 }
 0x6f7   :  { %4989 = vmatpush3.bf16.msra.mxu0 %v5282_v3 }
 0x702   :  { %v4974_v15 = vpop.f32.mrb[44].mxu1 }
 0x703   :  { %v1925_v5 = vsel %vm153_vm2, %v4974_v15, 0.0  ;;  %v1782_v6 = vpop.f32.mrb[45].mxu1  ;;  %v5283_v15 = vld [vmem:[%s6496_s14 + $0x8] sm:$0xff]  }
 0x704   :  { %v1926_v7 = vadd.f32 %v1925_v5, %v1924_v4  ;;  %v1911_v8 = vsel %vm153_vm2, %v1782_v6, 0.0  ;;  %v4975_v9 = vpop.f32.mrb[46].mxu1  ;;  %4990 = vmatprep.subr.bf16.mxu0 %v5283_v15 }
 0x705   :  { %v1912_v10 = vadd.f32 %v1911_v8, %v1910_v23  ;;  %v1785_v11 = vpop.f32.mrb[47].mxu1  ;;  %v4980_v12 = vpop.f32.mrb[44].mxu0  ;;  %4991 = vmatpush3.bf16.msra.mxu0 %v5283_v15 }
 0x706   :  { %v1918_v17 = vsel %vm153_vm2, %v1785_v11, 0.0  ;;  %v1927_v18 = vsel %vm153_vm2, %v4980_v12, 0.0  ;;  %v1839_v13 = vpop.f32.mrb[45].mxu0 }
 0x707   :  { %v1919_v19 = vadd.f32 %v1918_v17, %v1917_v14  ;;  %v1928_v16 = vadd.f32 %v1927_v18, %v1926_v7  ;;  %v1913_v20 = vsel %vm153_vm2, %v1839_v13, 0.0  ;;  %v4981_v21 = vpop.f32.mrb[46].mxu0  ;;  %v4403_v14 = vld [vmem:[%s6497_s12] ss:$0 sm:$0xff] }
 0x708   :  { %v1914_v22 = vadd.f32 %v1913_v20, %v1912_v10  ;;  %v1842_v24 = vpop.f32.mrb[47].mxu0  ;;  %v4404_v20 = vld [vmem:[%s6498_s13] ss:$0 sm:$0xff] }
 0x709   :  { %v1920_v37 = vsel %vm153_vm2, %v1842_v24, 0.0 }
 0x70a   :  { %v1921_v25 = vadd.f32 %v1920_v37, %v1919_v19 }
 0x710   :  { %v4986_v26 = vpop.f32.mrb[48].mxu1 }
 0x711   :  { %v1929_v41 = vsel %vm153_vm2, %v4986_v26, 0.0  ;;  %v1896_v27 = vpop.f32.mrb[49].mxu1 }
 0x712   :  { %v1930_v28 = vadd.f32 %v1929_v41, %v1928_v16  ;;  %v1915_v29 = vsel %vm153_vm2, %v1896_v27, 0.0  ;;  %v4987_v31 = vpop.f32.mrb[50].mxu1 }
 0x713   :  { %v1916_v32 = vadd.f32 %v1915_v29, %v1914_v22  ;;  %v1899_v33 = vpop.f32.mrb[51].mxu1  ;;  %v5285_v29 = vld [vmem:[%s6499_s16 + $0x8] sm:$0xff]   ;;  %v5286_v31 = vld [vmem:[%s6499_s16 + $0x10] sm:$0xff]  }
 0x714   :  { %v1922_v34 = vsel %vm153_vm2, %v1899_v33, 0.0  ;;  %v1933_v30 = vadd.f32 %v5456_v36, %v1930_v28  ;;  %v5284_v28 = vld [vmem:[%s6499_s16] sm:$0xff]  }
 0x715   :  { %v1931_v39 = vadd.f32 %v5457_v38, %v1916_v32  ;;  %v1923_v40 = vadd.f32 %v1922_v34, %v1921_v25  ;;  %4996 = vmatprep.subr.bf16.mxu1 %v5284_v28  ;;  %v5287_v32 = vld [vmem:[%s6499_s16 + $0x18] sm:$0xff]   ;;  %v4405_v33 = vld [vmem:[%s6500_s15] ss:$0 sm:$0xff] }
 0x716   :  { %v5989_v47 = vadd.f32 %v4402_v35, %v1933_v30  ;;  %4997 = vmatpush3.bf16.msra.mxu1 %v5284_v28 }
 0x717   :  { %v1932_v43 = vadd.f32 %v5458_v42, %v1923_v40  ;;  %v5983_v44 = vadd.f32 %v4402_v35, %v1931_v39  ;;  %4998 = vmatprep.subr.bf16.mxu1 %v5285_v29 }
 0x718   :  { %v1952_v50 = vsel %vm153_vm2, %v5989_v47, 0.0 }
 0x719   :  { %v1946_v45 = vsel %vm153_vm2, %v5983_v44, 0.0  ;;  %v5987_v46 = vadd.f32 %v4402_v35, %v1932_v43 }
 0x71a   :  { %1947 = vadd.xlane.f32.xlu0 %v1946_v45  ;;  %4999 = vmatpush3.bf16.msra.mxu1 %v5285_v29 }
 0x71b   :  { %v1949_v49 = vsel %vm153_vm2, %v5987_v46, 0.0  ;;  %5000 = vmatprep.subr.bf16.mxu1 %v5286_v31 }
 0x71c   :  { %1950 = vadd.xlane.f32.xlu1 %v1949_v49 }
 0x71e   :  { %1953 = vadd.xlane.f32.xlu0 %v1952_v50  ;;  %5001 = vmatpush3.bf16.msra.mxu1 %v5286_v31 }
 0x71f   :  { %5002 = vmatprep.subr.bf16.mxu1 %v5287_v32 }
 0x722   :  { %5003 = vmatpush3.bf16.msra.mxu1 %v5287_v32 }
 0x7a7   :  { %v1948_v51 = vpop.xlane.xlu0 %1947 }
 0x7a8   :  { %v1955_v53 = vmul.f32 0.03125, %v1948_v51 }
 0x7a9   :  { %v1951_v54 = vpop.xlane.xlu1 %1950 }
 0x7aa   :  { %v1958_v56 = vsub.f32 %v5983_v44, %v1955_v53  ;;  %v1956_v55 = vmul.f32 0.03125, %v1951_v54 }
 0x7ab   :  { %v1954_v59 = vpop.xlane.xlu0 %1953 }
 0x7ac   :  { %v1959_v60 = vsub.f32 %v5987_v46, %v1956_v55  ;;  %v1957_v58 = vmul.f32 0.03125, %v1954_v59  ;;  %v1961_v62 = vmul.f32 %v1958_v56, %v1958_v56 }
 0x7ae   :  { %v1960_v63 = vsub.f32 %v5989_v47, %v1957_v58  ;;  %v1964_v52 = vsel %vm153_vm2, %v1961_v62, 0.0  ;;  %v1962_v57 = vmul.f32 %v1959_v60, %v1959_v60 }
 0x7af   :  { %1965 = vadd.xlane.f32.xlu1 %v1964_v52 }
 0x7b0   :  { %v1967_v61 = vsel %vm153_vm2, %v1962_v57, 0.0  ;;  %v1963_v1 = vmul.f32 %v1960_v63, %v1960_v63 }
 0x7b1   :  { %1968 = vadd.xlane.f32.xlu0 %v1967_v61 }
 0x7b2   :  { %v1970_v2 = vsel %vm153_vm2, %v1963_v1, 0.0 }
 0x7b3   :  { %1971 = vadd.xlane.f32.xlu1 %v1970_v2 }
 0x83c   :  { %v1966_v4 = vpop.xlane.xlu1 %1965 }
 0x83d   :  { %v1973_v5 = vmul.f32 0.03125, %v1966_v4 }
 0x83e   :  { %v1969_v6 = vpop.xlane.xlu0 %1968 }
 0x83f   :  { %v1976_v23 = vadd.f32 1e-05, %v1973_v5  ;;  %v1974_v7 = vmul.f32 0.03125, %v1969_v6 }
 0x840   :  { %v1972_v8 = vpop.xlane.xlu1 %1971 }
 0x841   :  { %5374 = vrsqrt.f32 %v1976_v23  ;;  %v1977_v9 = vadd.f32 1e-05, %v1974_v7  ;;  %v1975_v10 = vmul.f32 0.03125, %v1972_v8 }
 0x843   :  { %5376 = vrsqrt.f32 %v1977_v9  ;;  %v1978_v11 = vadd.f32 1e-05, %v1975_v10  ;;  %v4410_v10 = vld [vmem:[%s6501_s17] ss:$0 sm:$0xff] }
 0x845   :  { %5378 = vrsqrt.f32 %v1978_v11 }
 0x84b   :  { %v5375_v12 = vpop.eup %5374 }
 0x84c   :  { %v1982_v17 = vmul.f32 %v5375_v12, %v1958_v56 }
 0x84d   :  { %v5377_v18 = vpop.eup %5376 }
 0x84e   :  { %v1983_v13 = vmul.f32 %v5377_v18, %v1959_v60  ;;  %v1991_v19 = vmul.f32 %v4403_v14, %v1982_v17 }
 0x84f   :  { %v5379_v16 = vpop.eup %5378 }
 0x850   :  { %v1984_v21 = vmul.f32 %v5379_v16, %v1960_v63  ;;  %v1992_v22 = vmul.f32 %v4403_v14, %v1983_v13  ;;  %v2000_v24 = vadd.f32 %v4404_v20, %v1991_v19 }
 0x852   :  { %v2001_v37 = vadd.f32 %v4404_v20, %v1992_v22  ;;  %v1993_v25 = vmul.f32 %v4403_v14, %v1984_v21 }
 0x854   :  { %v2003_v26 = vpack.c.bf16 %v2001_v37, %v2000_v24  ;;  %v2002_v41 = vadd.f32 %v4404_v20, %v1993_v25 }
 0x856   :  { %4992 = vmatprep.mubr.msk.bf16.mxu0 %vm153_vm2, %v2003_v26  ;;  %v2004_v27 = vpack.c.bf16 %v2002_v41, %v2002_v41 }
 0x858   :  { %4993 = vmatmul.mubr.msk.bf16.vlgmr.msra.gmra.mrb[48].mxu0 %vm153_vm2, %v2004_v27 }
 0x92b   :  { %v4994_v34 = vpop.f32.mrb[48].mxu0 }
 0x92c   :  { %v2077_v35 = vadd.f32 %v4994_v34, %v4405_v33  ;;  %v2068_v36 = vpop.f32.mrb[49].mxu0 }
 0x92d   :  { %v2069_v30 = vadd.f32 %v4405_v33, %v2068_v36  ;;  %v4995_v38 = vpop.f32.mrb[50].mxu0 }
 0x92e   :  { %v2087_v39 = vmul.f32 0.044715, %v2077_v35  ;;  %v2071_v40 = vpop.f32.mrb[51].mxu0  ;;  %v2084_v3 = vmul.f32 0.5, %v2077_v35  ;;  %v5289_v38 = vld [vmem:[%s6489_s7 + $0x60] sm:$0xff]  }
 0x92f   :  { %v2085_v42 = vmul.f32 0.044715, %v2069_v30  ;;  %v2072_v43 = vadd.f32 %v4405_v33, %v2071_v40  ;;  %v2082_v15 = vmul.f32 0.5, %v2069_v30  ;;  %5024 = vmatprep.subr.bf16.mxu1 %v5289_v38  ;;  %v5291_v40 = vld [vmem:[%s6489_s7 + $0x68] sm:$0xff]  }
 0x930   :  { %v2090_v45 = vmul.f32 %v2087_v39, %v2077_v35  ;;  %v5290_v39 = vld [vmem:[%s6489_s7 + $0x48] sm:$0xff]  }
 0x931   :  { %v2088_v49 = vmul.f32 %v2085_v42, %v2069_v30  ;;  %v2086_v50 = vmul.f32 0.044715, %v2072_v43  ;;  %v2083_v4 = vmul.f32 0.5, %v2072_v43  ;;  %v5292_v42 = vld [vmem:[%s6489_s7 + $0x50] sm:$0xff]  }
 0x932   :  { %v2093_v51 = vmul.f32 %v2090_v45, %v2077_v35 }
 0x933   :  { %v2091_v53 = vmul.f32 %v2088_v49, %v2069_v30  ;;  %v2089_v54 = vmul.f32 %v2086_v50, %v2072_v43 }
 0x934   :  { %v2096_v56 = vadd.f32 %v2093_v51, %v2077_v35 }
 0x935   :  { %v2094_v55 = vadd.f32 %v2091_v53, %v2069_v30  ;;  %v2092_v59 = vmul.f32 %v2089_v54, %v2072_v43  ;;  %v5288_v30 = vld [vmem:[%s6489_s7 + $0x40] sm:$0xff]  }
 0x936   :  { %v2099_v60 = vmul.f32 0.7978846, %v2096_v56  ;;  %5008 = vmatprep.subr.bf16.mxu0 %v5288_v30 }
 0x937   :  { %v2097_v58 = vmul.f32 0.7978846, %v2094_v55  ;;  %v2095_v62 = vadd.f32 %v2092_v59, %v2072_v43  ;;  %5009 = vmatpush3.bf16.msra.mxu0 %v5288_v30  ;;  %v5293_v43 = vld [vmem:[%s6490_s8 + $0x40] sm:$0xff]  }
 0x938   :  { %5380 = vtanh.f32 %v2099_v60  ;;  %5010 = vmatprep.subr.bf16.mxu0 %v5290_v39 }
 0x939   :  { %5382 = vtanh.f32 %v2097_v58  ;;  %v2098_v63 = vmul.f32 0.7978846, %v2095_v62  ;;  %v4419_v58 = vld [vmem:[%s6492_s5 + $0x1] ss:$0 sm:$0xff] }
 0x93b   :  { %5384 = vtanh.f32 %v2098_v63  ;;  %5011 = vmatpush3.bf16.msra.mxu0 %v5290_v39 }
 0x93c   :  { %5016 = vmatprep.subr.bf16.mxu0 %v5292_v42 }
 0x942   :  { %v5381_v52 = vpop.eup %5380 }
 0x943   :  { %v5383_v57 = vpop.eup %5382  ;;  %v2105_v61 = vadd.f32 1.0, %v5381_v52 }
 0x944   :  { %v2103_v1 = vadd.f32 1.0, %v5383_v57 }
 0x945   :  { %v5385_v2 = vpop.eup %5384  ;;  %v2108_v6 = vmul.f32 %v2105_v61, %v2084_v3 }
 0x946   :  { %v2104_v5 = vadd.f32 1.0, %v5385_v2  ;;  %v2106_v23 = vmul.f32 %v2103_v1, %v2082_v15  ;;  %v4420_v1 = vld [vmem:[%s6493_s6 + $0x1] ss:$0 sm:$0xff] }
 0x947   :  { %v2110_v9 = vpack.c.bf16 %v2108_v6, %v2108_v6 }
 0x948   :  { %v2107_v7 = vmul.f32 %v2104_v5, %v2083_v4 }
 0x94a   :  { %v2109_v8 = vpack.c.bf16 %v2107_v7, %v2106_v23 }
 0x94c   :  { %5004 = vmatprep.mubr.msk.bf16.mxu1 %vm108_vm1, %v2109_v8  ;;  %v5294_v8 = vld [vmem:[%s6489_s7 + $0x58] sm:$0xff]  }
 0x94d   :  { %5005 = vmatmul.mubr.msk.bf16.vlgmr.msra.gmra.mrb[52].mxu1 %vm108_vm1, %v2110_v9  ;;  %v5295_v9 = vld [vmem:[%s6490_s8 + $0x48] sm:$0xff]  }
 0x94e   :  { %5025 = vmatpush3.bf16.msra.mxu1 %v5289_v38 }
 0x94f   :  { %5026 = vmatprep.subr.bf16.mxu1 %v5291_v40 }
 0x952   :  { %5027 = vmatpush3.bf16.msra.mxu1 %v5291_v40 }
 0x953   :  { %5040 = vmatprep.subr.bf16.mxu1 %v5293_v43 }
 0xa20   :  { %v5006_v11 = vpop.f32.mrb[52].mxu1 }
 0xa21   :  { %v2190_v12 = vpop.f32.mrb[53].mxu1  ;;  %v2199_v14 = vadd.f32 %v5006_v11, %v4410_v10  ;;  %v5297_v11 = vld [vmem:[%s6490_s8 + $0x60] sm:$0xff]  }
 0xa22   :  { %v2191_v17 = vadd.f32 %v4410_v10, %v2190_v12  ;;  %v5007_v18 = vpop.f32.mrb[54].mxu1  ;;  %v5298_v12 = vld [vmem:[%s6489_s7 + $0x78] sm:$0xff]  }
 0xa23   :  { %v2193_v13 = vpop.f32.mrb[55].mxu1  ;;  %v6039_v20 = vadd.f32 %v2199_v14, %v5989_v47  ;;  %v5299_v14 = vld [vmem:[%s6490_s8 + $0x68] sm:$0xff]   ;;  %v5301_v18 = vld [vmem:[%s6491_s9 + $0x40] sm:$0xff]  }
 0xa24   :  { %v6036_v19 = vadd.f32 %v2191_v17, %v5983_v44  ;;  %v2194_v16 = vadd.f32 %v4410_v10, %v2193_v13  ;;  %v5296_v10 = vld [vmem:[%s6489_s7 + $0x70] sm:$0xff]   ;;  %v5302_v13 = vld [vmem:[%s6490_s8 + $0x58] sm:$0xff]  }
 0xa25   :  { %v2217_v37 = vsel %vm153_vm2, %v6039_v20, 0.0  ;;  %v5300_v17 = vld [vmem:[%s6490_s8 + $0x50] sm:$0xff]  }
 0xa26   :  { %v6042_v21 = vadd.f32 %v2194_v16, %v5987_v46  ;;  %v2211_v22 = vsel %vm153_vm2, %v6036_v19, 0.0  ;;  %v5303_v16 = vld [vmem:[%s6491_s9 + $0x48] sm:$0xff]  }
 0xa27   :  { %2212 = vadd.xlane.f32.xlu0 %v2211_v22  ;;  %v5304_v22 = vld [vmem:[%s6490_s8 + $0x70] sm:$0xff]  }
 0xa28   :  { %v2214_v24 = vsel %vm153_vm2, %v6042_v21, 0.0 }
 0xa29   :  { %2215 = vadd.xlane.f32.xlu1 %v2214_v24  ;;  %v5305_v24 = vld [vmem:[%s6491_s9 + $0x60] sm:$0xff]  }
 0xa2b   :  { %2218 = vadd.xlane.f32.xlu0 %v2217_v37  ;;  %v5306_v37 = vld [vmem:[%s6490_s8 + $0x78] sm:$0xff]  }
 0xab4   :  { %v2213_v44 = vpop.xlane.xlu0 %2212 }
 0xab5   :  { %v2220_v25 = vmul.f32 0.03125, %v2213_v44  ;;  %v5307_v44 = vld [vmem:[%s6491_s9 + $0x68] sm:$0xff]  }
 0xab6   :  { %v2216_v26 = vpop.xlane.xlu1 %2215 }
 0xab7   :  { %v2223_v47 = vsub.f32 %v6036_v19, %v2220_v25  ;;  %v2221_v41 = vmul.f32 0.03125, %v2216_v26  ;;  %v5308_v25 = vld [vmem:[%s6491_s9 + $0x50] sm:$0xff]   ;;  %v5309_v26 = vld [vmem:[%s6491_s9 + $0x58] sm:$0xff]  }
 0xab8   :  { %v2219_v46 = vpop.xlane.xlu0 %2218 }
 0xab9   :  { %v2224_v27 = vsub.f32 %v6042_v21, %v2221_v41  ;;  %v2222_v28 = vmul.f32 0.03125, %v2219_v46  ;;  %v2226_v29 = vmul.f32 %v2223_v47, %v2223_v47  ;;  %v5311_v41 = vld [vmem:[%s6491_s9 + $0x78] sm:$0xff]  }
 0xabb   :  { %v2225_v31 = vsub.f32 %v6039_v20, %v2222_v28  ;;  %v2229_v32 = vsel %vm153_vm2, %v2226_v29, 0.0  ;;  %v2227_v33 = vmul.f32 %v2224_v27, %v2224_v27 }
 0xabc   :  { %2230 = vadd.xlane.f32.xlu1 %v2229_v32 }
 0xabd   :  { %v2232_v34 = vsel %vm153_vm2, %v2227_v33, 0.0  ;;  %v2228_v35 = vmul.f32 %v2225_v31, %v2225_v31 }
 0xabe   :  { %2233 = vadd.xlane.f32.xlu0 %v2232_v34 }
 0xabf   :  { %v2235_v36 = vsel %vm153_vm2, %v2228_v35, 0.0 }
 0xac0   :  { %2236 = vadd.xlane.f32.xlu1 %v2235_v36 }
 0xb49   :  { %v2231_v45 = vpop.xlane.xlu1 %2230 }
 0xb4a   :  { %v2238_v49 = vmul.f32 0.03125, %v2231_v45 }
 0xb4b   :  { %v2234_v50 = vpop.xlane.xlu0 %2233 }
 0xb4c   :  { %v2241_v51 = vadd.f32 1e-05, %v2238_v49  ;;  %v2239_v53 = vmul.f32 0.03125, %v2234_v50 }
 0xb4d   :  { %v2237_v54 = vpop.xlane.xlu1 %2236 }
 0xb4e   :  { %5386 = vrsqrt.f32 %v2241_v51  ;;  %v2242_v56 = vadd.f32 1e-05, %v2239_v53  ;;  %v2240_v55 = vmul.f32 0.03125, %v2237_v54 }
 0xb50   :  { %5388 = vrsqrt.f32 %v2242_v56  ;;  %v2243_v59 = vadd.f32 1e-05, %v2240_v55 }
 0xb52   :  { %5390 = vrsqrt.f32 %v2243_v59 }
 0xb58   :  { %v5387_v60 = vpop.eup %5386 }
 0xb59   :  { %v2247_v62 = vmul.f32 %v5387_v60, %v2223_v47  ;;  %v5310_v47 = vld [vmem:[%s6491_s9 + $0x70] sm:$0xff]  }
 0xb5a   :  { %v5389_v63 = vpop.eup %5388 }
 0xb5b   :  { %v2256_v52 = vmul.f32 %v4419_v58, %v2247_v62  ;;  %v2248_v57 = vmul.f32 %v5389_v63, %v2224_v27 }
 0xb5c   :  { %v5391_v61 = vpop.eup %5390 }
 0xb5d   :  { %v2257_v2 = vmul.f32 %v4419_v58, %v2248_v57  ;;  %v2249_v3 = vmul.f32 %v5391_v61, %v2225_v31  ;;  %v2265_v15 = vadd.f32 %v4420_v1, %v2256_v52 }
 0xb5f   :  { %v2266_v4 = vadd.f32 %v4420_v1, %v2257_v2  ;;  %v2258_v5 = vmul.f32 %v4419_v58, %v2249_v3 }
 0xb61   :  { %v6080_v6 = vpack.c.bf16 %v2266_v4, %v2265_v15  ;;  %v2267_v23 = vadd.f32 %v4420_v1, %v2258_v5 }
 0xb63   :  { %v6082_v7 = vpack.c.bf16 %v2267_v23, %v2267_v23  ;;  %5012 = vmatprep.mubr.msk.bf16.mxu0 %vm153_vm2, %v6080_v6  ;;  %5028 = vmatprep.mubr.msk.bf16.mxu1 %vm153_vm2, %v6080_v6 }
 0xb65   :  { %5013 = vmatmul.mubr.msk.bf16.vlgmr.msra.gmra.mrb[52].mxu0 %vm153_vm2, %v6082_v7  ;;  %5029 = vmatmul.mubr.msk.bf16.vlgmr.msra.gmra.mrb[56].mxu1 %vm153_vm2, %v6082_v7 }
 0xb66   :  { %5017 = vmatpush3.bf16.msra.mxu0 %v5292_v42  ;;  %5020 = vmatprep.mubr.msk.bf16.mxu0 %vm153_vm2, %v6080_v6 }
 0xb67   :  { %5041 = vmatpush3.bf16.msra.mxu1 %v5293_v43  ;;  %5044 = vmatprep.mubr.msk.bf16.mxu1 %vm153_vm2, %v6080_v6 }
 0xb68   :  { %5018 = vmatprep.subr.bf16.mxu0 %v5294_v8  ;;  %5042 = vmatprep.subr.bf16.mxu1 %v5295_v9 }
 0xb6a   :  { %5019 = vmatpush3.bf16.msra.mxu0 %v5294_v8 }
 0xb6b   :  { %5043 = vmatpush3.bf16.msra.mxu1 %v5295_v9  ;;  %5032 = vmatprep.subr.bf16.mxu0 %v5296_v10 }
 0xb6c   :  { %5056 = vmatprep.subr.bf16.mxu1 %v5297_v11 }
 0xb6d   :  { %5021 = vmatmul.mubr.msk.bf16.vlgmr.msra.gmra.mrb[56].mxu0 %vm153_vm2, %v6082_v7 }
 0xb6e   :  { %5033 = vmatpush3.bf16.msra.mxu0 %v5296_v10  ;;  %5045 = vmatmul.mubr.msk.bf16.vlgmr.msra.gmra.mrb[60].mxu1 %vm153_vm2, %v6082_v7 }
 0xb6f   :  { %5036 = vmatprep.mubr.msk.bf16.mxu0 %vm153_vm2, %v6080_v6  ;;  %5057 = vmatpush3.bf16.msra.mxu1 %v5297_v11 }
 0xb70   :  { %5060 = vmatprep.mubr.msk.bf16.mxu1 %vm153_vm2, %v6080_v6  ;;  %5034 = vmatprep.subr.bf16.mxu0 %v5298_v12 }
 0xb71   :  { %5058 = vmatprep.subr.bf16.mxu1 %v5299_v14 }
 0xb72   :  { %5035 = vmatpush3.bf16.msra.mxu0 %v5298_v12 }
 0xb73   :  { %5059 = vmatpush3.bf16.msra.mxu1 %v5299_v14  ;;  %5048 = vmatprep.subr.bf16.mxu0 %v5300_v17 }
 0xb74   :  { %5072 = vmatprep.subr.bf16.mxu1 %v5301_v18 }
 0xb75   :  { %5037 = vmatmul.mubr.msk.bf16.vlgmr.msra.gmra.mrb[60].mxu0 %vm153_vm2, %v6082_v7 }
 0xb76   :  { %5049 = vmatpush3.bf16.msra.mxu0 %v5300_v17  ;;  %5061 = vmatmul.mubr.msk.bf16.vlgmr.msra.gmra.mrb[64].mxu1 %vm153_vm2, %v6082_v7 }
 0xb77   :  { %5052 = vmatprep.mubr.msk.bf16.mxu0 %vm153_vm2, %v6080_v6  ;;  %5073 = vmatpush3.bf16.msra.mxu1 %v5301_v18 }
 0xb78   :  { %5076 = vmatprep.mubr.msk.bf16.mxu1 %vm153_vm2, %v6080_v6  ;;  %5050 = vmatprep.subr.bf16.mxu0 %v5302_v13 }
 0xb79   :  { %5074 = vmatprep.subr.bf16.mxu1 %v5303_v16 }
 0xb7a   :  { %5051 = vmatpush3.bf16.msra.mxu0 %v5302_v13 }
 0xb7b   :  { %5075 = vmatpush3.bf16.msra.mxu1 %v5303_v16  ;;  %5064 = vmatprep.subr.bf16.mxu0 %v5304_v22 }
 0xb7c   :  { %5088 = vmatprep.subr.bf16.mxu1 %v5305_v24 }
 0xb7d   :  { %5053 = vmatmul.mubr.msk.bf16.vlgmr.msra.gmra.mrb[64].mxu0 %vm153_vm2, %v6082_v7 }
 0xb7e   :  { %5077 = vmatmul.mubr.msk.bf16.vlgmr.msra.gmra.mrb[68].mxu1 %vm153_vm2, %v6082_v7  ;;  %5065 = vmatpush3.bf16.msra.mxu0 %v5304_v22 }
 0xb7f   :  { %5068 = vmatprep.mubr.msk.bf16.mxu0 %vm153_vm2, %v6080_v6  ;;  %5089 = vmatpush3.bf16.msra.mxu1 %v5305_v24 }
 0xb80   :  { %5092 = vmatprep.mubr.msk.bf16.mxu1 %vm153_vm2, %v6080_v6  ;;  %5066 = vmatprep.subr.bf16.mxu0 %v5306_v37 }
 0xb81   :  { %5090 = vmatprep.subr.bf16.mxu1 %v5307_v44 }
 0xb82   :  { %5067 = vmatpush3.bf16.msra.mxu0 %v5306_v37 }
 0xb83   :  { %5091 = vmatpush3.bf16.msra.mxu1 %v5307_v44  ;;  %5080 = vmatprep.subr.bf16.mxu0 %v5308_v25 }
 0xb85   :  { %5069 = vmatmul.mubr.msk.bf16.vlgmr.msra.gmra.mrb[68].mxu0 %vm153_vm2, %v6082_v7 }
 0xb86   :  { %5093 = vmatmul.mubr.msk.bf16.vlgmr.msra.gmra.mrb[72].mxu1 %vm153_vm2, %v6082_v7  ;;  %5081 = vmatpush3.bf16.msra.mxu0 %v5308_v25 }
 0xb87   :  { %5084 = vmatprep.mubr.msk.bf16.mxu0 %vm153_vm2, %v6080_v6  ;;  %5082 = vmatprep.subr.bf16.mxu0 %v5309_v26 }
 0xb8a   :  { %5083 = vmatpush3.bf16.msra.mxu0 %v5309_v26 }
 0xb8b   :  { %5096 = vmatprep.subr.bf16.mxu0 %v5310_v47 }
 0xb8d   :  { %5085 = vmatmul.mubr.msk.bf16.vlgmr.msra.gmra.mrb[72].mxu0 %vm153_vm2, %v6082_v7 }
 0xb8e   :  { %5097 = vmatpush3.bf16.msra.mxu0 %v5310_v47  ;;  %5100 = vmatprep.mubr.msk.bf16.mxu0 %vm153_vm2, %v6080_v6 }
 0xb8f   :  { %5098 = vmatprep.subr.bf16.mxu0 %v5311_v41 }
 0xb92   :  { %5099 = vmatpush3.bf16.msra.mxu0 %v5311_v41 }
 0xb95   :  { %5101 = vmatmul.mubr.msk.bf16.vlgmr.msra.gmra.mrb[76].mxu0 %vm153_vm2, %v6082_v7 }
 0xc38   :  { %v5014_v46 = vpop.f32.mrb[52].mxu0  ;;  %v6186_v27 = vpop.f32.mrb[56].mxu1 }
 0xc39   :  { %v2339_v28 = vpop.f32.mrb[53].mxu0  ;;  %v2459_v29 = vpop.f32.mrb[57].mxu1  ;;  %v3048_v9 = vpack.c.bf16 %v5014_v46, %v5014_v46 }
 0xc3a   :  { %v5015_v31 = vpop.f32.mrb[54].mxu0  ;;  %v5031_v32 = vpop.f32.mrb[58].mxu1 }
 0xc3b   :  { %v2342_v33 = vpop.f32.mrb[55].mxu0  ;;  %v2462_v34 = vpop.f32.mrb[59].mxu1 }
 0xc3c   :  { %v3047_v35 = vpack.c.bf16 %v2342_v33, %v2339_v28  ;;  %v3051_v36 = vpack.c.bf16 %v2462_v34, %v2459_v29 }
 0xc3e   :  { %5108 = vmatprep.mubr.msk.bf16.mxu1 %vm1027_vm4, %v3047_v35  ;;  %v3052_v35 = vpack.c.bf16 %v6186_v27, %v6186_v27 }
 0xc40   :  { %v6189_v30 = vpop.f32.mrb[56].mxu0 }
 0xc41   :  { %v5046_v38 = vpop.f32.mrb[60].mxu1  ;;  %v2399_v39 = vpop.f32.mrb[57].mxu0  ;;  %v3050_v33 = vpack.c.bf16 %v6189_v30, %v6189_v30 }
 0xc42   :  { %v2596_v40 = vpop.f32.mrb[61].mxu1  ;;  %v5023_v42 = vpop.f32.mrb[58].mxu0  ;;  %v3056_v53 = vpack.c.bf16 %v5046_v38, %v5046_v38 }
 0xc43   :  { %v5047_v43 = vpop.f32.mrb[62].mxu1  ;;  %v2402_v45 = vpop.f32.mrb[59].mxu0 }
 0xc44   :  { %v3049_v49 = vpack.c.bf16 %v2402_v45, %v2399_v39  ;;  %v2599_v50 = vpop.f32.mrb[63].mxu1  ;;  %v3073_v1 = vsel %vm1027_vm4, %v3056_v53, 0 }
 0xc45   :  { %v3055_v51 = vpack.c.bf16 %v2599_v50, %v2596_v40 }
 0xc46   :  { %5116 = vmatprep.mubr.msk.bf16.mxu0 %vm1027_vm4, %v3049_v49 }
 0xc47   :  { %v3070_v54 = vsel %vm1027_vm4, %v3055_v51, 0  ;;  %5236 = vmatprep.subr.msk.bf16.mxu1 %vm1027_vm4, %v3055_v51 }
 0xc48   :  { %5105 = vmatpush3.bf16.xpose.msra.mxu1 %v3070_v54  ;;  %v6194_v56 = vpop.f32.mrb[60].mxu0 }
 0xc49   :  { %v5062_v55 = vpop.f32.mrb[64].mxu1  ;;  %5237 = vmatprep.subr.msk.bf16.mxu1 %vm1027_vm4, %v3056_v53  ;;  %v6197_v59 = vpop.f32.mrb[61].mxu0  ;;  %v3054_v50 = vpack.c.bf16 %v6194_v56, %v6194_v56 }
 0xc4a   :  { %v2716_v60 = vpop.f32.mrb[65].mxu1  ;;  %v5039_v58 = vpop.f32.mrb[62].mxu0  ;;  %v3060_v12 = vpack.c.bf16 %v5062_v55, %v5062_v55 }
 0xc4b   :  { %v5063_v62 = vpop.f32.mrb[66].mxu1  ;;  %v2522_v63 = vpop.f32.mrb[63].mxu0 }
 0xc4c   :  { %v3053_v52 = vpack.c.bf16 %v2522_v63, %v6197_v59  ;;  %v2719_v57 = vpop.f32.mrb[67].mxu1  ;;  %v3193_v46 = vsel %vm1027_vm4, %v3060_v12, 0 }
 0xc4d   :  { %v3059_v61 = vpack.c.bf16 %v2719_v57, %v2716_v60 }
 0xc4f   :  { %v3190_v14 = vsel %vm1027_vm4, %v3059_v61, 0 }
 0xc50   :  { %5107 = vmatpush3.bf16.xpose.msra.mxu1 %v3073_v1  ;;  %v5054_v2 = vpop.f32.mrb[64].mxu0 }
 0xc51   :  { %v5078_v3 = vpop.f32.mrb[68].mxu1  ;;  %5240 = vmatprep.subr.msk.bf16.mxu1 %vm1027_vm4, %v3059_v61  ;;  %v2656_v15 = vpop.f32.mrb[65].mxu0  ;;  %v3058_v17 = vpack.c.bf16 %v5054_v2, %v5054_v2 }
 0xc52   :  { %v2853_v4 = vpop.f32.mrb[69].mxu1  ;;  %v5055_v5 = vpop.f32.mrb[66].mxu0  ;;  %v3468_v38 = vpack.c.bf16 %v5078_v3, %v5078_v3 }
 0xc53   :  { %v5079_v6 = vpop.f32.mrb[70].mxu1  ;;  %v2659_v23 = vpop.f32.mrb[67].mxu0  ;;  %v3133_v41 = vsel %vm1027_vm4, %v3058_v17, 0 }
 0xc54   :  { %v3057_v7 = vpack.c.bf16 %v2659_v23, %v2656_v15  ;;  %v2856_v8 = vpop.f32.mrb[71].mxu1  ;;  %v3482_v42 = vsel %vm1447_vm5, %v3468_v38, 0 }
 0xc55   :  { %v3467_v10 = vpack.c.bf16 %v2856_v8, %v2853_v4 }
 0xc56   :  { %v3130_v11 = vsel %vm1027_vm4, %v3057_v7, 0  ;;  %5238 = vmatprep.subr.msk.bf16.mxu0 %vm1027_vm4, %v3057_v7 }
 0xc57   :  { %5109 = vmatmul.mubr.msk.bf16.vlgmr.msra.gmra.mrb[76].mxu1 %vm1027_vm4, %v3048_v9  ;;  %5113 = vmatpush3.bf16.xpose.msra.mxu0 %v3130_v11 }
 0xc58   :  { %5121 = vmatpush3.bf16.xpose.msra.mxu1 %v3190_v14  ;;  %5124 = vmatprep.mubr.msk.bf16.mxu1 %vm1027_vm4, %v3051_v36  ;;  %v5070_v18 = vpop.f32.mrb[68].mxu0 }
 0xc59   :  { %v6207_v13 = vpop.f32.mrb[72].mxu1  ;;  %5239 = vmatprep.subr.msk.bf16.mxu0 %vm1027_vm4, %v3058_v17  ;;  %5241 = vmatprep.subr.msk.bf16.mxu1 %vm1027_vm4, %v3060_v12  ;;  %v2776_v16 = vpop.f32.mrb[69].mxu0  ;;  %v3062_v39 = vpack.c.bf16 %v5070_v18, %v5070_v18 }
 0xc5a   :  { %v2973_v22 = vpop.f32.mrb[73].mxu1  ;;  %v5071_v24 = vpop.f32.mrb[70].mxu0 }
 0xc5b   :  { %v5095_v37 = vpop.f32.mrb[74].mxu1  ;;  %v2779_v44 = vpop.f32.mrb[71].mxu0  ;;  %v3253_v49 = vsel %vm1027_vm4, %v3062_v39, 0 }
 0xc5c   :  { %v3061_v25 = vpack.c.bf16 %v2779_v44, %v2776_v16  ;;  %v2976_v26 = vpop.f32.mrb[75].mxu1 }
 0xc5d   :  { %v6211_v47 = vpack.c.bf16 %v2976_v26, %v2973_v22 }
 0xc5e   :  { %v3250_v36 = vsel %vm1027_vm4, %v3061_v25, 0 }
 0xc5f   :  { %5115 = vmatpush3.bf16.xpose.msra.mxu0 %v3133_v41 }
 0xc60   :  { %5123 = vmatpush3.bf16.xpose.msra.mxu1 %v3193_v46  ;;  %v5086_v28 = vpop.f32.mrb[72].mxu0  ;;  %5242 = vmatprep.subr.msk.bf16.mxu0 %vm1027_vm4, %v3061_v25 }
 0xc61   :  { %5136 = vmatprep.subr.bf16.mxu1 %v3467_v10  ;;  %v2913_v29 = vpop.f32.mrb[73].mxu0  ;;  %v3470_v51 = vpack.c.bf16 %v5086_v28, %v5086_v28 }
 0xc62   :  { %v5087_v31 = vpop.f32.mrb[74].mxu0 }
 0xc63   :  { %v2916_v32 = vpop.f32.mrb[75].mxu0  ;;  %v3539_v53 = vsel %vm1447_vm5, %v3470_v51, 0 }
 0xc64   :  { %v3469_v34 = vpack.c.bf16 %v2916_v32, %v2913_v29 }
 0xc66   :  { %5117 = vmatmul.mubr.msk.bf16.vlgmr.msra.gmra.mrb[80].mxu0 %vm1027_vm4, %v3050_v33 }
 0xc67   :  { %5125 = vmatmul.mubr.msk.bf16.vlgmr.msra.gmra.mrb[80].mxu1 %vm1027_vm4, %v3052_v35  ;;  %5129 = vmatpush3.bf16.xpose.msra.mxu0 %v3250_v36 }
 0xc68   :  { %5132 = vmatprep.mubr.msk.bf16.mxu0 %vm1027_vm4, %v3053_v52  ;;  %5137 = vmatpush3.bf16.msra.mxu1 %v3467_v10  ;;  %v6224_v40 = vpop.f32.mrb[76].mxu0 }
 0xc69   :  { %5243 = vmatprep.subr.msk.bf16.mxu0 %vm1027_vm4, %v3062_v39  ;;  %5244 = vmatprep.subr.msk.bf16.mxu1 %vm1447_vm5, %v3468_v38  ;;  %v3033_v30 = vpop.f32.mrb[77].mxu0 }
 0xc6a   :  { %v5103_v27 = vpop.f32.mrb[78].mxu0 }
 0xc6b   :  { %v3036_v43 = vpop.f32.mrb[79].mxu0 }
 0xc6c   :  { %v6229_v45 = vpack.c.bf16 %v3036_v43, %v3033_v30  ;;  %5139 = vmatpush3.bf16.msra.mxu1 %v3482_v42 }
 0xc6d   :  { %5152 = vmatprep.subr.bf16.mxu1 %v6211_v47 }
 0xc6f   :  { %5131 = vmatpush3.bf16.xpose.msra.mxu0 %v3253_v49 }
 0xc70   :  { %5144 = vmatprep.subr.bf16.mxu0 %v3469_v34 }
 0xc76   :  { %5133 = vmatmul.mubr.msk.bf16.vlgmr.msra.gmra.mrb[84].mxu0 %vm1027_vm4, %v3054_v50 }
 0xc77   :  { %5145 = vmatpush3.bf16.msra.mxu0 %v3469_v34 }
 0xc78   :  { %5245 = vmatprep.subr.msk.bf16.mxu0 %vm1447_vm5, %v3470_v51 }
 0xc7b   :  { %5147 = vmatpush3.bf16.msra.mxu0 %v3539_v53 }
 0xc7c   :  { %5160 = vmatprep.subr.bf16.mxu0 %v6229_v45 }
 0xd2a   :  { %v5110_v54 = vpop.f32.mrb[76].mxu1 }
 0xd2b   :  { %v3305_v55 = vmul.f32 0.35355338, %v5110_v54  ;;  %v3109_v59 = vpop.f32.mrb[77].mxu1 }
 0xd2c   :  { %v3303_v60 = vmul.f32 0.35355338, %v3109_v59  ;;  %v5111_v58 = vpop.f32.mrb[78].mxu1 }
 0xd2d   :  { %v3112_v62 = vpop.f32.mrb[79].mxu1  ;;  %v3317_v63 = vadd.f32 %v3305_v55, %v5804_v48 }
 0xd2e   :  { %v3304_v56 = vmul.f32 0.35355338, %v3112_v62  ;;  %v6242_v57 = vadd.f32 %v3303_v60, %v5804_v48 }
 0xd2f   :  { %v3333_v52 = vsel %vm1292_vm7, %v3317_v63, -inf }
 0xd30   :  { %3334 = vmax.xlane.f32.xlu0 %v3333_v52  ;;  %v3316_v61 = vadd.f32 %v3304_v56, %v5804_v48  ;;  %v3327_v2 = vsel %vm1292_vm7, %v6242_v57, -inf }
 0xd32   :  { %v3330_v1 = vsel %vm1292_vm7, %v3316_v61, -inf }
 0xd33   :  { %3331 = vmax.xlane.f32.xlu1 %v3330_v1 }
 0xd34   :  { %3328 = vmax.xlane.f32.xlu0 %v3327_v2 }
 0xd39   :  { %v5118_v3 = vpop.f32.mrb[80].mxu0 }
 0xd3a   :  { %v3308_v15 = vmul.f32 0.35355338, %v5118_v3  ;;  %v5126_v4 = vpop.f32.mrb[80].mxu1  ;;  %v3169_v5 = vpop.f32.mrb[81].mxu0 }
 0xd3b   :  { %v3306_v6 = vmul.f32 0.35355338, %v3169_v5  ;;  %v3229_v23 = vpop.f32.mrb[81].mxu1  ;;  %v5119_v7 = vpop.f32.mrb[82].mxu0  ;;  %v3311_v24 = vmul.f32 0.35355338, %v5126_v4 }
 0xd3c   :  { %v3309_v8 = vmul.f32 0.35355338, %v3229_v23  ;;  %v5127_v9 = vpop.f32.mrb[82].mxu1  ;;  %v3172_v10 = vpop.f32.mrb[83].mxu0  ;;  %v3320_v11 = vadd.f32 %v3308_v15, %v5804_v48 }
 0xd3d   :  { %v3307_v12 = vmul.f32 0.35355338, %v3172_v10  ;;  %v3232_v14 = vpop.f32.mrb[83].mxu1  ;;  %v6252_v22 = vadd.f32 %v3306_v6, %v5804_v48  ;;  %v6266_v46 = vadd.f32 %v3311_v24, %v5804_v48 }
 0xd3e   :  { %v3310_v17 = vmul.f32 0.35355338, %v3232_v14  ;;  %v3342_v18 = vsel %vm1292_vm7, %v3320_v11, -inf  ;;  %v3321_v16 = vadd.f32 %v3309_v8, %v5804_v48 }
 0xd3f   :  { %3343 = vmax.xlane.f32.xlu1 %v3342_v18  ;;  %v6256_v44 = vadd.f32 %v3307_v12, %v5804_v48  ;;  %v3336_v25 = vsel %vm1292_vm7, %v6252_v22, -inf  ;;  %v3351_v29 = vsel %vm1292_vm7, %v6266_v46, -inf }
 0xd40   :  { %v3345_v37 = vsel %vm1292_vm7, %v3321_v16, -inf  ;;  %v6261_v26 = vadd.f32 %v3310_v17, %v5804_v48 }
 0xd41   :  { %3346 = vmax.xlane.f32.xlu0 %v3345_v37  ;;  %v3339_v41 = vsel %vm1292_vm7, %v6256_v44, -inf }
 0xd42   :  { %v3348_v28 = vsel %vm1292_vm7, %v6261_v26, -inf }
 0xd43   :  { %3337 = vmax.xlane.f32.xlu1 %v3336_v25 }
 0xd45   :  { %3340 = vmax.xlane.f32.xlu0 %v3339_v41 }
 0xd47   :  { %3349 = vmax.xlane.f32.xlu1 %v3348_v28 }
 0xd49   :  { %3352 = vmax.xlane.f32.xlu0 %v3351_v29  ;;  %v5134_v31 = vpop.f32.mrb[84].mxu0 }
 0xd4a   :  { %v3289_v32 = vpop.f32.mrb[85].mxu0  ;;  %v3314_v33 = vmul.f32 0.35355338, %v5134_v31 }
 0xd4b   :  { %v3312_v34 = vmul.f32 0.35355338, %v3289_v32  ;;  %v5135_v35 = vpop.f32.mrb[86].mxu0 }
 0xd4c   :  { %v3292_v36 = vpop.f32.mrb[87].mxu0  ;;  %v6281_v42 = vadd.f32 %v3314_v33, %v5804_v48 }
 0xd4d   :  { %v3313_v38 = vmul.f32 0.35355338, %v3292_v36  ;;  %v6273_v39 = vadd.f32 %v3312_v34, %v5804_v48 }
 0xd4e   :  { %v3360_v49 = vsel %vm1292_vm7, %v6281_v42, -inf }
 0xd4f   :  { %v3354_v30 = vsel %vm1292_vm7, %v6273_v39, -inf  ;;  %v6278_v27 = vadd.f32 %v3313_v38, %v5804_v48 }
 0xd50   :  { %3355 = vmax.xlane.f32.xlu1 %v3354_v30 }
 0xd51   :  { %v3357_v43 = vsel %vm1292_vm7, %v6278_v27, -inf }
 0xd52   :  { %3358 = vmax.xlane.f32.xlu0 %v3357_v43 }
 0xd54   :  { %3361 = vmax.xlane.f32.xlu1 %v3360_v49 }
 0xdbd   :  { %v3335_v50 = vpop.xlane.xlu0 %3334 }
 0xdbe   :  { %v3365_v51 = vsub.f32 %v3317_v63, %v3335_v50 }
 0xdc0   :  { %v3379_v53 = vmul.f32 1.442695, %v3365_v51  ;;  %v3332_v54 = vpop.xlane.xlu1 %3331 }
 0xdc1   :  { %v3364_v55 = vsub.f32 %v3316_v61, %v3332_v54  ;;  %v3329_v59 = vpop.xlane.xlu0 %3328 }
 0xdc2   :  { %5392 = vpow2.f32 %v3379_v53  ;;  %v3363_v60 = vsub.f32 %v6242_v57, %v3329_v59 }
 0xdc3   :  { %v3377_v48 = vmul.f32 1.442695, %v3364_v55 }
 0xdc4   :  { %v3375_v58 = vmul.f32 1.442695, %v3363_v60 }
 0xdc5   :  { %5394 = vpow2.f32 %v3377_v48 }
 0xdc6   :  { %5396 = vpow2.f32 %v3375_v58 }
 0xdcc   :  { %v6288_v62 = vpop.eup %5392  ;;  %v3344_v56 = vpop.xlane.xlu1 %3343 }
 0xdcd   :  { %v3368_v52 = vsub.f32 %v3320_v11, %v3344_v56  ;;  %v3405_v1 = vsel %vm1292_vm7, %v6288_v62, 0.0 }
 0xdce   :  { %v3347_v2 = vpop.xlane.xlu0 %3346  ;;  %3406 = vadd.xlane.f32.xlu0 %v3405_v1 }
 0xdcf   :  { %v6292_v63 = vpop.eup %5394  ;;  %v3385_v61 = vmul.f32 1.442695, %v3368_v52  ;;  %v3369_v3 = vsub.f32 %v3321_v16, %v3347_v2 }
 0xdd0   :  { %v6294_v15 = vpop.eup %5396  ;;  %v3338_v57 = vpop.xlane.xlu1 %3337  ;;  %v3402_v4 = vsel %vm1292_vm7, %v6292_v63, 0.0 }
 0xdd1   :  { %5398 = vpow2.f32 %v3385_v61  ;;  %v3387_v5 = vmul.f32 1.442695, %v3369_v3  ;;  %v3366_v6 = vsub.f32 %v6252_v22, %v3338_v57  ;;  %3403 = vadd.xlane.f32.xlu1 %v3402_v4  ;;  %v3399_v23 = vsel %vm1292_vm7, %v6294_v15, 0.0 }
 0xdd2   :  { %v3341_v7 = vpop.xlane.xlu0 %3340  ;;  %3400 = vadd.xlane.f32.xlu0 %v3399_v23 }
 0xdd3   :  { %5400 = vpow2.f32 %v3387_v5  ;;  %v3381_v8 = vmul.f32 1.442695, %v3366_v6  ;;  %v3367_v9 = vsub.f32 %v6256_v44, %v3341_v7  ;;  %v3472_v6 = vpack.c.bf16 %v6207_v13, %v6207_v13 }
 0xdd4   :  { %v3350_v10 = vpop.xlane.xlu1 %3349 }
 0xdd5   :  { %5402 = vpow2.f32 %v3381_v8  ;;  %v3383_v11 = vmul.f32 1.442695, %v3367_v9  ;;  %v3370_v12 = vsub.f32 %v6261_v26, %v3350_v10 }
 0xdd6   :  { %v3353_v14 = vpop.xlane.xlu0 %3352 }
 0xdd7   :  { %5404 = vpow2.f32 %v3383_v11  ;;  %v3389_v17 = vmul.f32 1.442695, %v3370_v12  ;;  %v3371_v18 = vsub.f32 %v6266_v46, %v3353_v14 }
 0xdd9   :  { %5406 = vpow2.f32 %v3389_v17  ;;  %v3391_v16 = vmul.f32 1.442695, %v3371_v18 }
 0xddb   :  { %v6304_v22 = vpop.eup %5398  ;;  %5408 = vpow2.f32 %v3391_v16 }
 0xddc   :  { %v3414_v24 = vsel %vm1292_vm7, %v6304_v22, 0.0 }
 0xddd   :  { %v6308_v37 = vpop.eup %5400  ;;  %3415 = vadd.xlane.f32.xlu1 %v3414_v24  ;;  %v3356_v44 = vpop.xlane.xlu1 %3355 }
 0xdde   :  { %v3372_v25 = vsub.f32 %v6273_v39, %v3356_v44  ;;  %v3417_v26 = vsel %vm1292_vm7, %v6308_v37, 0.0 }
 0xddf   :  { %v6313_v41 = vpop.eup %5402  ;;  %3418 = vadd.xlane.f32.xlu0 %v3417_v26  ;;  %v3359_v46 = vpop.xlane.xlu0 %3358 }
 0xde0   :  { %v3393_v28 = vmul.f32 1.442695, %v3372_v25  ;;  %v3373_v29 = vsub.f32 %v6278_v27, %v3359_v46  ;;  %v3408_v31 = vsel %vm1292_vm7, %v6313_v41, 0.0  ;;  %v3474_v46 = vpack.c.bf16 %v6224_v40, %v6224_v40 }
 0xde1   :  { %v6318_v32 = vpop.eup %5404  ;;  %3409 = vadd.xlane.f32.xlu1 %v3408_v31  ;;  %v3362_v33 = vpop.xlane.xlu1 %3361 }
 0xde2   :  { %5410 = vpow2.f32 %v3393_v28  ;;  %v3395_v34 = vmul.f32 1.442695, %v3373_v29  ;;  %v3374_v35 = vsub.f32 %v6281_v42, %v3362_v33  ;;  %v3411_v36 = vsel %vm1292_vm7, %v6318_v32, 0.0 }
 0xde3   :  { %v6323_v38 = vpop.eup %5406  ;;  %3412 = vadd.xlane.f32.xlu0 %v3411_v36  ;;  %v3653_v28 = vsel %vm1447_vm5, %v3474_v46, 0  ;;  %v4533_v36 = vld [vmem:[%s6494_s10 + $0x10] sm:$0xf] }
 0xde4   :  { %5412 = vpow2.f32 %v3395_v34  ;;  %v3397_v39 = vmul.f32 1.442695, %v3374_v35  ;;  %v3420_v30 = vsel %vm1292_vm7, %v6323_v38, 0.0 }
 0xde5   :  { %v6327_v27 = vpop.eup %5408  ;;  %3421 = vadd.xlane.f32.xlu1 %v3420_v30 }
 0xde6   :  { %5414 = vpow2.f32 %v3397_v39  ;;  %v3423_v43 = vsel %vm1292_vm7, %v6327_v27, 0.0  ;;  %v4534_v39 = vld [vmem:[%s6494_s10 + $0x14] sm:$0xf] }
 0xde7   :  { %3424 = vadd.xlane.f32.xlu0 %v3423_v43  ;;  %v3780_v30 = vsel %vm1447_vm5, %v4534_v39, 0  ;;  %v4536_v43 = vld [vmem:[%s6494_s10 + $0x1c] sm:$0xf] }
 0xdec   :  { %v6331_v42 = vpop.eup %5410 }
 0xded   :  { %v3426_v49 = vsel %vm1292_vm7, %v6331_v42, 0.0 }
 0xdee   :  { %v6335_v50 = vpop.eup %5412  ;;  %3427 = vadd.xlane.f32.xlu1 %v3426_v49 }
 0xdef   :  { %v3429_v51 = vsel %vm1292_vm7, %v6335_v50, 0.0 }
 0xdf0   :  { %v6339_v53 = vpop.eup %5414  ;;  %3430 = vadd.xlane.f32.xlu0 %v3429_v51 }
 0xdf1   :  { %v3432_v54 = vsel %vm1292_vm7, %v6339_v53, 0.0 }
 0xdf2   :  { %3433 = vadd.xlane.f32.xlu1 %v3432_v54 }
 0xe5b   :  { %v3407_v55 = vpop.xlane.xlu0 %3406 }
 0xe5c   :  { %5416 = vrcp.f32 %v3407_v55 }
 0xe5e   :  { %v3404_v59 = vpop.xlane.xlu1 %3403 }
 0xe5f   :  { %5418 = vrcp.f32 %v3404_v59  ;;  %v3401_v60 = vpop.xlane.xlu0 %3400 }
 0xe60   :  { %5420 = vrcp.f32 %v3401_v60 }
 0xe66   :  { %v5417_v48 = vpop.eup %5416 }
 0xe67   :  { %v3449_v52 = vmul.f32 %v5417_v48, %v6288_v62 }
 0xe69   :  { %v5419_v58 = vpop.eup %5418  ;;  %v3460_v5 = vpack.c.bf16 %v3449_v52, %v3449_v52 }
 0xe6a   :  { %v5421_v56 = vpop.eup %5420  ;;  %v3416_v1 = vpop.xlane.xlu1 %3415  ;;  %v3448_v2 = vmul.f32 %v5419_v58, %v6292_v63 }
 0xe6b   :  { %v3447_v61 = vmul.f32 %v5421_v56, %v6294_v15  ;;  %5422 = vrcp.f32 %v3416_v1  ;;  %v3596_v15 = vsel %vm1447_vm5, %v3472_v6, 0 }
 0xe6c   :  { %v3419_v3 = vpop.xlane.xlu0 %3418 }
 0xe6d   :  { %v3459_v57 = vpack.c.bf16 %v3448_v2, %v3447_v61 }
 0xe6e   :  { %v3410_v4 = vpop.xlane.xlu1 %3409 }
 0xe6f   :  { %5424 = vrcp.f32 %v3410_v4  ;;  %5140 = vmatprep.mubr.msk.bf16.mxu1 %vm1292_vm7, %v3459_v57 }
 0xe70   :  { %5426 = vrcp.f32 %v3419_v3  ;;  %5141 = vmatmul.mubr.msk.bf16.vlgmr.msra.gmra.mrb[84].mxu1 %vm1292_vm7, %v3460_v5  ;;  %v3413_v62 = vpop.xlane.xlu0 %3412  ;;  %v3894_v3 = vsel %vm1447_vm5, %v4536_v43, 0 }
 0xe71   :  { %5153 = vmatpush3.bf16.msra.mxu1 %v6211_v47  ;;  %5428 = vrcp.f32 %v3413_v62 }
 0xe72   :  { %5246 = vmatprep.subr.msk.bf16.mxu1 %vm1447_vm5, %v3472_v6  ;;  %v3422_v63 = vpop.xlane.xlu1 %3421 }
 0xe73   :  { %5430 = vrcp.f32 %v3422_v63 }
 0xe74   :  { %v3425_v23 = vpop.xlane.xlu0 %3424 }
 0xe75   :  { %5155 = vmatpush3.bf16.msra.mxu1 %v3596_v15  ;;  %5432 = vrcp.f32 %v3425_v23  ;;  %v5423_v7 = vpop.eup %5422 }
 0xe76   :  { %v3452_v11 = vmul.f32 %v5423_v7, %v6304_v22  ;;  %5248 = vmatprep.subr.msk.bf16.mxu1 %vm1447_vm5, %v4533_v36 }
 0xe78   :  { %v3462_v26 = vpack.c.bf16 %v3452_v11, %v3452_v11 }
 0xe79   :  { %v5425_v8 = vpop.eup %5424 }
 0xe7a   :  { %v5427_v9 = vpop.eup %5426  ;;  %v3450_v13 = vmul.f32 %v5425_v8, %v6313_v41 }
 0xe7b   :  { %v5429_v10 = vpop.eup %5428  ;;  %v3428_v12 = vpop.xlane.xlu1 %3427  ;;  %v3453_v16 = vmul.f32 %v5427_v9, %v6308_v37 }
 0xe7c   :  { %5434 = vrcp.f32 %v3428_v12  ;;  %v3451_v47 = vmul.f32 %v5429_v10, %v6318_v32 }
 0xe7d   :  { %v5431_v14 = vpop.eup %5430  ;;  %v3431_v17 = vpop.xlane.xlu0 %3430 }
 0xe7e   :  { %5436 = vrcp.f32 %v3431_v17  ;;  %v3461_v18 = vpack.c.bf16 %v3451_v47, %v3450_v13  ;;  %v3454_v24 = vmul.f32 %v5431_v14, %v6323_v38  ;;  %v3723_v38 = vsel %vm1447_vm5, %v4533_v36, 0 }
 0xe7f   :  { %v5433_v44 = vpop.eup %5432  ;;  %v3434_v25 = vpop.xlane.xlu1 %3433 }
 0xe80   :  { %v3455_v41 = vmul.f32 %v5433_v44, %v6327_v27  ;;  %5438 = vrcp.f32 %v3434_v25  ;;  %5148 = vmatprep.mubr.msk.bf16.mxu0 %vm1292_vm7, %v3461_v18  ;;  %v3463_v22 = vpack.c.bf16 %v3454_v24, %v3453_v16  ;;  %v4535_v27 = vld [vmem:[%s6494_s10 + $0x18] sm:$0xf] }
 0xe81   :  { %5149 = vmatmul.mubr.msk.bf16.vlgmr.msra.gmra.mrb[88].mxu0 %vm1292_vm7, %v3462_v26  ;;  %v3837_v55 = vsel %vm1447_vm5, %v4535_v27, 0 }
 0xe82   :  { %5161 = vmatpush3.bf16.msra.mxu0 %v6229_v45  ;;  %5156 = vmatprep.mubr.msk.bf16.mxu1 %vm1292_vm7, %v3463_v22  ;;  %v3464_v37 = vpack.c.bf16 %v3455_v41, %v3455_v41 }
 0xe83   :  { %5247 = vmatprep.subr.msk.bf16.mxu0 %vm1447_vm5, %v3474_v46 }
 0xe84   :  { %5157 = vmatmul.mubr.msk.bf16.vlgmr.msra.gmra.mrb[88].mxu1 %vm1292_vm7, %v3464_v37 }
 0xe85   :  { %5169 = vmatpush3.bf16.msra.mxu1 %v3723_v38 }
 0xe86   :  { %v5435_v29 = vpop.eup %5434  ;;  %5163 = vmatpush3.bf16.msra.mxu0 %v3653_v28  ;;  %5250 = vmatprep.subr.msk.bf16.mxu1 %vm1447_vm5, %v4535_v27 }
 0xe87   :  { %v3456_v32 = vmul.f32 %v5435_v29, %v6331_v42  ;;  %5249 = vmatprep.subr.msk.bf16.mxu0 %vm1447_vm5, %v4534_v39 }
 0xe88   :  { %v5437_v31 = vpop.eup %5436 }
 0xe89   :  { %v3457_v40 = vmul.f32 %v5437_v31, %v6335_v50 }
 0xe8a   :  { %v5439_v33 = vpop.eup %5438 }
 0xe8b   :  { %v3458_v34 = vmul.f32 %v5439_v33, %v6339_v53  ;;  %v3465_v45 = vpack.c.bf16 %v3457_v40, %v3456_v32 }
 0xe8d   :  { %5164 = vmatprep.mubr.msk.bf16.mxu0 %vm1292_vm7, %v3465_v45  ;;  %v3466_v35 = vpack.c.bf16 %v3458_v34, %v3458_v34 }
 0xe8f   :  { %5165 = vmatmul.mubr.msk.bf16.vlgmr.msra.gmra.mrb[92].mxu0 %vm1292_vm7, %v3466_v35 }
 0xe90   :  { %5175 = vmatpush3.bf16.msra.mxu0 %v3780_v30 }
 0xe91   :  { %5251 = vmatprep.subr.msk.bf16.mxu0 %vm1447_vm5, %v4536_v43 }
 0xf43   :  { %v5142_v42 = vpop.f32.mrb[84].mxu1 }
 0xf44   :  { %v3518_v49 = vpop.f32.mrb[85].mxu1  ;;  %v3704_v54 = vpack.c.bf16 %v5142_v42, %v5142_v42 }
 0xf45   :  { %v5143_v50 = vpop.f32.mrb[86].mxu1 }
 0xf46   :  { %v3521_v51 = vpop.f32.mrb[87].mxu1  ;;  %v4546_v50 = vld [vmem:[%s6495_s11 + $0x1] ss:$0 sm:$0xff] }
 0xf47   :  { %v3703_v53 = vpack.c.bf16 %v3521_v51, %v3518_v49 }
 0xf49   :  { %5170 = vmatprep.mubr.msk.bf16.mxu1 %vm1027_vm4, %v3703_v53 }
 0xf4a   :  { %5171 = vmatmul.mubr.msk.bf16.vlgmr.msra.gmra.mrb[92].mxu1 %vm1027_vm4, %v3704_v54 }
 0xf4b   :  { %5181 = vmatpush3.bf16.msra.mxu1 %v3837_v55 }
 0xf54   :  { %v5150_v59 = vpop.f32.mrb[88].mxu0 }
 0xf55   :  { %v3575_v60 = vpop.f32.mrb[89].mxu0  ;;  %v3706_v2 = vpack.c.bf16 %v5150_v59, %v5150_v59 }
 0xf56   :  { %v5151_v48 = vpop.f32.mrb[90].mxu0 }
 0xf57   :  { %v3578_v58 = vpop.f32.mrb[91].mxu0  ;;  %v5158_v56 = vpop.f32.mrb[88].mxu1 }
 0xf58   :  { %v3705_v52 = vpack.c.bf16 %v3578_v58, %v3575_v60  ;;  %v3632_v1 = vpop.f32.mrb[89].mxu1  ;;  %v3708_v5 = vpack.c.bf16 %v5158_v56, %v5158_v56 }
 0xf59   :  { %v5159_v61 = vpop.f32.mrb[90].mxu1 }
 0xf5a   :  { %v3635_v57 = vpop.f32.mrb[91].mxu1  ;;  %5176 = vmatprep.mubr.msk.bf16.mxu0 %vm1027_vm4, %v3705_v52 }
 0xf5b   :  { %v3707_v4 = vpack.c.bf16 %v3635_v57, %v3632_v1  ;;  %5177 = vmatmul.mubr.msk.bf16.vlgmr.msra.gmra.mrb[96].mxu0 %vm1027_vm4, %v3706_v2 }
 0xf5c   :  { %5187 = vmatpush3.bf16.msra.mxu0 %v3894_v3 }
 0xf5d   :  { %5182 = vmatprep.mubr.msk.bf16.mxu1 %vm1027_vm4, %v3707_v4 }
 0xf5e   :  { %5183 = vmatmul.mubr.msk.bf16.vlgmr.msra.gmra.mrb[96].mxu1 %vm1027_vm4, %v3708_v5 }
 0xf62   :  { %v5166_v6 = vpop.f32.mrb[92].mxu0 }
 0xf63   :  { %v3689_v62 = vpop.f32.mrb[93].mxu0  ;;  %v3710_v7 = vpack.c.bf16 %v5166_v6, %v5166_v6 }
 0xf64   :  { %v5167_v63 = vpop.f32.mrb[94].mxu0 }
 0xf65   :  { %v3692_v15 = vpop.f32.mrb[95].mxu0 }
 0xf66   :  { %v3709_v23 = vpack.c.bf16 %v3692_v15, %v3689_v62 }
 0xf68   :  { %5188 = vmatprep.mubr.msk.bf16.mxu0 %vm1027_vm4, %v3709_v23 }
 0xf69   :  { %5189 = vmatmul.mubr.msk.bf16.vlgmr.msra.gmra.mrb[100].mxu0 %vm1027_vm4, %v3710_v7  ;;  %v5312_v7 = vld [vmem:[%s6496_s14 + $0x10] sm:$0xff]  }
 0xf6a   :  { %5192 = vmatprep.subr.bf16.mxu1 %v5312_v7 }
 0xf6b   :  { %5193 = vmatpush3.bf16.msra.mxu1 %v5312_v7 }
0x101d   :  { %v5172_v8 = vpop.f32.mrb[92].mxu1 }
0x101e   :  { %v3759_v9 = vpop.f32.mrb[93].mxu1  ;;  %v3958_v12 = vsel %vm153_vm2, %v5172_v8, 0.0  ;;  %v5313_v8 = vld [vmem:[%s6496_s14 + $0x18] sm:$0xff]  }
0x101f   :  { %v5173_v13 = vpop.f32.mrb[94].mxu1  ;;  %v3944_v17 = vsel %vm153_vm2, %v3759_v9, 0.0  ;;  %5194 = vmatprep.subr.bf16.mxu1 %v5313_v8 }
0x1020   :  { %v3762_v10 = vpop.f32.mrb[95].mxu1  ;;  %5195 = vmatpush3.bf16.msra.mxu1 %v5313_v8 }
0x1021   :  { %v3951_v41 = vsel %vm153_vm2, %v3762_v10, 0.0  ;;  %5212 = vmatprep.subr.bf16.mxu1 %v5459_v0 }
0x102e   :  { %v5178_v11 = vpop.f32.mrb[96].mxu0 }
0x102f   :  { %v3959_v47 = vsel %vm153_vm2, %v5178_v11, 0.0  ;;  %v3816_v14 = vpop.f32.mrb[97].mxu0 }
0x1030   :  { %v3960_v18 = vadd.f32 %v3959_v47, %v3958_v12  ;;  %v3945_v16 = vsel %vm153_vm2, %v3816_v14, 0.0  ;;  %v5179_v24 = vpop.f32.mrb[98].mxu0 }
0x1031   :  { %v3946_v44 = vadd.f32 %v3945_v16, %v3944_v17  ;;  %v3819_v25 = vpop.f32.mrb[99].mxu0  ;;  %v5184_v26 = vpop.f32.mrb[96].mxu1  ;;  %v4549_v24 = vld [vmem:[%s6497_s12 + $0x1] ss:$0 sm:$0xff] }
0x1032   :  { %v3952_v22 = vsel %vm153_vm2, %v3819_v25, 0.0  ;;  %v3961_v46 = vsel %vm153_vm2, %v5184_v26, 0.0  ;;  %v3873_v37 = vpop.f32.mrb[97].mxu1 }
0x1033   :  { %v3953_v28 = vadd.f32 %v3952_v22, %v3951_v41  ;;  %v3962_v29 = vadd.f32 %v3961_v46, %v3960_v18  ;;  %v3947_v31 = vsel %vm153_vm2, %v3873_v37, 0.0  ;;  %v5185_v32 = vpop.f32.mrb[98].mxu1  ;;  %v4550_v46 = vld [vmem:[%s6498_s13 + $0x1] ss:$0 sm:$0xff] }
0x1034   :  { %v3948_v40 = vadd.f32 %v3947_v31, %v3946_v44  ;;  %v3876_v33 = vpop.f32.mrb[99].mxu1 }
0x1035   :  { %v3954_v34 = vsel %vm153_vm2, %v3876_v33, 0.0 }
0x1036   :  { %v3955_v45 = vadd.f32 %v3954_v34, %v3953_v28 }
0x103c   :  { %v5190_v35 = vpop.f32.mrb[100].mxu0 }
0x103d   :  { %v3963_v36 = vsel %vm153_vm2, %v5190_v35, 0.0  ;;  %v3930_v38 = vpop.f32.mrb[101].mxu0  ;;  %v5315_v35 = vld [vmem:[%s6499_s16 + $0x28] sm:$0xff]  }
0x103e   :  { %v3964_v39 = vadd.f32 %v3963_v36, %v3962_v29  ;;  %v3949_v30 = vsel %vm153_vm2, %v3930_v38, 0.0  ;;  %v5191_v27 = vpop.f32.mrb[102].mxu0  ;;  %v5316_v36 = vld [vmem:[%s6499_s16 + $0x30] sm:$0xff]   ;;  %v5317_v38 = vld [vmem:[%s6499_s16 + $0x38] sm:$0xff]  }
0x103f   :  { %v3950_v43 = vadd.f32 %v3949_v30, %v3948_v40  ;;  %v3933_v42 = vpop.f32.mrb[103].mxu0 }
0x1040   :  { %v3956_v49 = vsel %vm153_vm2, %v3933_v42, 0.0  ;;  %v3967_v51 = vadd.f32 %v3964_v39, %v6039_v20  ;;  %v4556_v39 = vld [vmem:[%s6500_s15 + $0x1] ss:$0 sm:$0xff] }
0x1041   :  { %v3965_v53 = vadd.f32 %v3950_v43, %v6036_v19  ;;  %v3957_v54 = vadd.f32 %v3956_v49, %v3955_v45  ;;  %v5314_v45 = vld [vmem:[%s6499_s16 + $0x20] sm:$0xff]  }
0x1042   :  { %v3978_v58 = vadd.f32 %v4546_v50, %v3967_v51  ;;  %5200 = vmatprep.subr.bf16.mxu0 %v5314_v45 }
0x1043   :  { %v3966_v55 = vadd.f32 %v3957_v54, %v6042_v21  ;;  %v6419_v59 = vadd.f32 %v4546_v50, %v3965_v53  ;;  %5201 = vmatpush3.bf16.msra.mxu0 %v5314_v45 }
0x1044   :  { %v3989_v52 = vsel %vm153_vm2, %v3978_v58, 0.0  ;;  %5202 = vmatprep.subr.bf16.mxu0 %v5315_v35 }
0x1045   :  { %v3983_v60 = vsel %vm153_vm2, %v6419_v59, 0.0  ;;  %v3977_v48 = vadd.f32 %v4546_v50, %v3966_v55 }
0x1046   :  { %3984 = vadd.xlane.f32.xlu0 %v3983_v60 }
0x1047   :  { %v3986_v56 = vsel %vm153_vm2, %v3977_v48, 0.0  ;;  %5203 = vmatpush3.bf16.msra.mxu0 %v5315_v35 }
0x1048   :  { %3987 = vadd.xlane.f32.xlu1 %v3986_v56  ;;  %5204 = vmatprep.subr.bf16.mxu0 %v5316_v36 }
0x104a   :  { %3990 = vadd.xlane.f32.xlu0 %v3989_v52 }
0x104b   :  { %5205 = vmatpush3.bf16.msra.mxu0 %v5316_v36 }
0x104c   :  { %5206 = vmatprep.subr.bf16.mxu0 %v5317_v38 }
0x104f   :  { %5207 = vmatpush3.bf16.msra.mxu0 %v5317_v38 }
0x10d3   :  { %v3985_v20 = vpop.xlane.xlu0 %3984 }
0x10d4   :  { %v3992_v1 = vmul.f32 0.03125, %v3985_v20 }
0x10d5   :  { %v3988_v19 = vpop.xlane.xlu1 %3987 }
0x10d6   :  { %v3995_v2 = vsub.f32 %v6419_v59, %v3992_v1  ;;  %v3993_v21 = vmul.f32 0.03125, %v3988_v19 }
0x10d7   :  { %v3991_v61 = vpop.xlane.xlu0 %3990 }
0x10d8   :  { %v3996_v3 = vsub.f32 %v3977_v48, %v3993_v21  ;;  %v3994_v57 = vmul.f32 0.03125, %v3991_v61  ;;  %v3998_v4 = vmul.f32 %v3995_v2, %v3995_v2 }
0x10da   :  { %v3997_v5 = vsub.f32 %v3978_v58, %v3994_v57  ;;  %v4001_v6 = vsel %vm153_vm2, %v3998_v4, 0.0  ;;  %v3999_v62 = vmul.f32 %v3996_v3, %v3996_v3 }
0x10db   :  { %4002 = vadd.xlane.f32.xlu1 %v4001_v6 }
0x10dc   :  { %v4004_v63 = vsel %vm153_vm2, %v3999_v62, 0.0  ;;  %v4000_v15 = vmul.f32 %v3997_v5, %v3997_v5 }
0x10dd   :  { %4005 = vadd.xlane.f32.xlu0 %v4004_v63 }
0x10de   :  { %v4007_v23 = vsel %vm153_vm2, %v4000_v15, 0.0 }
0x10df   :  { %4008 = vadd.xlane.f32.xlu1 %v4007_v23 }
0x1168   :  { %v4003_v9 = vpop.xlane.xlu1 %4002 }
0x1169   :  { %v4010_v13 = vmul.f32 0.03125, %v4003_v9 }
0x116a   :  { %v4006_v10 = vpop.xlane.xlu0 %4005 }
0x116b   :  { %v4013_v11 = vadd.f32 1e-05, %v4010_v13  ;;  %v4011_v12 = vmul.f32 0.03125, %v4006_v10 }
0x116c   :  { %v4009_v47 = vpop.xlane.xlu1 %4008 }
0x116d   :  { %5440 = vrsqrt.f32 %v4013_v11  ;;  %v4014_v14 = vadd.f32 1e-05, %v4011_v12  ;;  %v4012_v17 = vmul.f32 0.03125, %v4009_v47  ;;  %v5318_v12 = vld [vmem:[%s6502_s18] sm:$0xff]   ;;  %v5319_v47 = vld [vmem:[%s6502_s18 + $0x8] sm:$0xff]  }
0x116f   :  { %5442 = vrsqrt.f32 %v4014_v14  ;;  %v4015_v18 = vadd.f32 1e-05, %v4012_v17  ;;  %v4570_v14 = vld [vmem:[%s6501_s17 + $0x1] ss:$0 sm:$0xff] }
0x1171   :  { %5444 = vrsqrt.f32 %v4015_v18 }
0x1177   :  { %v5441_v16 = vpop.eup %5440 }
0x1178   :  { %v4019_v44 = vmul.f32 %v5441_v16, %v3995_v2 }
0x1179   :  { %v5443_v25 = vpop.eup %5442 }
0x117a   :  { %v4020_v26 = vmul.f32 %v5443_v25, %v3996_v3  ;;  %v4028_v41 = vmul.f32 %v4549_v24, %v4019_v44 }
0x117b   :  { %v5445_v22 = vpop.eup %5444 }
0x117c   :  { %v4021_v37 = vmul.f32 %v5445_v22, %v3997_v5  ;;  %v4029_v28 = vmul.f32 %v4549_v24, %v4020_v26  ;;  %v4037_v29 = vadd.f32 %v4550_v46, %v4028_v41 }
0x117e   :  { %v4038_v31 = vadd.f32 %v4550_v46, %v4029_v28  ;;  %v4030_v32 = vmul.f32 %v4549_v24, %v4021_v37 }
0x1180   :  { %v4040_v40 = vpack.c.bf16 %v4038_v31, %v4037_v29  ;;  %v4039_v33 = vadd.f32 %v4550_v46, %v4030_v32 }
0x1182   :  { %5196 = vmatprep.mubr.msk.bf16.mxu1 %vm153_vm2, %v4040_v40  ;;  %v4041_v34 = vpack.c.bf16 %v4039_v33, %v4039_v33 }
0x1184   :  { %5197 = vmatmul.mubr.msk.bf16.vlgmr.msra.gmra.mrb[100].mxu1 %vm153_vm2, %v4041_v34 }
0x1185   :  { %5216 = vmatprep.mubr.msk.bf16.mxu1 %vm5460_vm0, %v5459_v0  ;;  %5213 = vmatpush3.bf16.msra.mxu1 %v5318_v12 }
0x1186   :  { %5214 = vmatprep.subr.bf16.mxu1 %v5459_v0  ;;  %v4249_v0 = vld [vmem:[%s6503_s19] sm:$0x1] }
0x1189   :  { %5215 = vmatpush3.bf16.msra.mxu1 %v5319_v47 }
0x1257   :  { %v5198_v30 = vpop.f32.mrb[100].mxu1 }
0x1258   :  { %v4116_v27 = vadd.f32 %v5198_v30, %v4556_v39  ;;  %v4107_v43 = vpop.f32.mrb[101].mxu1 }
0x1259   :  { %v4108_v42 = vadd.f32 %v4556_v39, %v4107_v43  ;;  %v5199_v49 = vpop.f32.mrb[102].mxu1 }
0x125a   :  { %v4126_v50 = vmul.f32 0.044715, %v4116_v27  ;;  %v4110_v51 = vpop.f32.mrb[103].mxu1  ;;  %v4123_v63 = vmul.f32 0.5, %v4116_v27 }
0x125b   :  { %v4124_v53 = vmul.f32 0.044715, %v4108_v42  ;;  %v4111_v54 = vadd.f32 %v4556_v39, %v4110_v51  ;;  %v4121_v15 = vmul.f32 0.5, %v4108_v42 }
0x125c   :  { %v4129_v55 = vmul.f32 %v4126_v50, %v4116_v27 }
0x125d   :  { %v4127_v60 = vmul.f32 %v4124_v53, %v4108_v42  ;;  %v4125_v48 = vmul.f32 0.044715, %v4111_v54  ;;  %v4122_v23 = vmul.f32 0.5, %v4111_v54 }
0x125e   :  { %v4132_v58 = vmul.f32 %v4129_v55, %v4116_v27 }
0x125f   :  { %v4130_v56 = vmul.f32 %v4127_v60, %v4108_v42  ;;  %v4128_v52 = vmul.f32 %v4125_v48, %v4111_v54 }
0x1260   :  { %v4135_v20 = vadd.f32 %v4132_v58, %v4116_v27 }
0x1261   :  { %v4133_v1 = vadd.f32 %v4130_v56, %v4108_v42  ;;  %v4131_v19 = vmul.f32 %v4128_v52, %v4111_v54 }
0x1262   :  { %v4138_v2 = vmul.f32 0.7978846, %v4135_v20 }
0x1263   :  { %v4136_v21 = vmul.f32 0.7978846, %v4133_v1  ;;  %v4134_v61 = vadd.f32 %v4131_v19, %v4111_v54 }
0x1264   :  { %5446 = vtanh.f32 %v4138_v2 }
0x1265   :  { %5448 = vtanh.f32 %v4136_v21  ;;  %v4137_v3 = vmul.f32 0.7978846, %v4134_v61 }
0x1267   :  { %5450 = vtanh.f32 %v4137_v3 }
0x126e   :  { %v5447_v57 = vpop.eup %5446 }
0x126f   :  { %v5449_v4 = vpop.eup %5448  ;;  %v4144_v5 = vadd.f32 1.0, %v5447_v57 }
0x1270   :  { %v4142_v6 = vadd.f32 1.0, %v5449_v4 }
0x1271   :  { %v5451_v62 = vpop.eup %5450  ;;  %v4147_v8 = vmul.f32 %v4144_v5, %v4123_v63 }
0x1272   :  { %v4143_v7 = vadd.f32 1.0, %v5451_v62  ;;  %v4145_v9 = vmul.f32 %v4142_v6, %v4121_v15 }
0x1273   :  { %v4149_v11 = vpack.c.bf16 %v4147_v8, %v4147_v8 }
0x1274   :  { %v4146_v13 = vmul.f32 %v4143_v7, %v4122_v23 }
0x1276   :  { %v4148_v10 = vpack.c.bf16 %v4146_v13, %v4145_v9 }
0x1278   :  { %5208 = vmatprep.mubr.msk.bf16.mxu0 %vm108_vm1, %v4148_v10 }
0x1279   :  { %5209 = vmatmul.mubr.msk.bf16.vlgmr.msra.gmra.mrb[104].mxu0 %vm108_vm1, %v4149_v11 }
0x134c   :  { %v5210_v17 = vpop.f32.mrb[104].mxu0 }
0x134d   :  { %v4231_v18 = vpop.f32.mrb[105].mxu0 }
0x134e   :  { %v4232_v16 = vadd.f32 %v4570_v14, %v4231_v18  ;;  %v5211_v24 = vpop.f32.mrb[106].mxu0 }
0x134f   :  { %v4234_v44 = vpop.f32.mrb[107].mxu0 }
0x1350   :  { %v4243_v25 = vadd.f32 %v4232_v16, %v6419_v59 }
0x1352   :  { %v4244_v26 = vpack.c.bf16 %v4243_v25, %v4243_v25 }
0x1354   :  { %5217 = vmatmul.mubr.msk.bf16.vlgmr.msra.gmra.mrb[104].mxu1 %vm153_vm2, %v4244_v26 }
0x1427   :  { %v4299_v41 = vpop.f32.mrb[104].mxu1 }
0x1428   :  { %v4300_v22 = vadd.f32 %v4299_v41, %v4249_v0  ;;  %v5218_v46 = vpop.f32.mrb[105].mxu1 }
0x1429   :  { %v4302_v37 = vpop.f32.mrb[106].mxu1 }
0x142a   :  { %v5219_v28 = vpop.f32.mrb[107].mxu1  ;;  %v4306_v29 = vsel %vm4305_vm8, %v4300_v22, -inf }
0x142b   :  { %4307 = vmax.xlane.f32.xlu0 %v4306_v29 }
0x14b8   :  { %v4308_v31 = vpop.xlane.xlu0 %4307 }
0x14b9   :  { %v4309_v32 = vsub.f32 %v4300_v22, %v4308_v31 }
0x14bb   :  { %v4310_v40 = vmul.f32 1.442695, %v4309_v32 }
0x14bd   :  { %5452 = vpow2.f32 %v4310_v40 }
0x14c7   :  { %v5453_v59 = vpop.eup %5452 }
0x14c8   :  { %v4312_v33 = vsel %vm4305_vm8, %v5453_v59, 0.0 }
0x14c9   :  { %4313 = vadd.xlane.f32.xlu1 %v4312_v33 }
0x1556   :  { %v4314_v34 = vpop.xlane.xlu1 %4313 }
0x1557   :  { %5454 = vrcp.f32 %v4314_v34 }
0x1561   :  { %v5455_v45 = vpop.eup %5454 }
0x1562   :  { %v4316_v35 = vmul.f32 %v5455_v45, %v5453_v59 }
0x1564   :  { %4317 = vst.msk [vmem:[%s6504_s20] sm:$0x1] %vm4305_vm8, %v4316_v35 }

</bundles_post_ra>
